<compile_context>
chip_gen: v6e
topology: v6e:2x2x1
jax: 0.10.0
libtpu: 0.0.40
codegen_flags: <defaults>
</compile_context>

<pallas_src>
import functools

import jax
import jax.numpy as jnp
from jax import lax
from jax.experimental import pallas as pl
from jax.experimental.pallas import tpu as pltpu

_EPS = 1e-5   # nn.BatchNorm2d default eps
_LANE = 128


def _round_up(x, m):
    return (x + m - 1) // m * m


def _channel_stats(v):
    """Per-channel (sum, sum_sq) of a (positions, channels) f32 slab -> (2, C)."""
    s = jnp.sum(v, axis=0, keepdims=True)
    sq = jnp.sum(v * v, axis=0, keepdims=True)
    return jnp.concatenate([s, sq], axis=0)


def _subsample_hw(a, s, hout, wout):
    """a[::s, ::s, :] for an (H, W, C) value; stride applied once per tile."""
    if s == 1:
        return a
    h, w, c = a.shape
    a = a[: hout * s].reshape(hout, s, w, c)[:, 0]
    a = a[:, : wout * s].reshape(hout, wout, s, c)[:, :, 0]
    return a


# --------------------------- stage kernels ---------------------------------


def _stage_a_kernel(x_ref, w1_ref, *rest, down_sampling, stride, dims):
    """conv1x1_1 (+ downsample conv1x1) raw outputs + per-image BN stats."""
    h, w, hout, wout = dims
    if down_sampling:
        wd_ref, h1_ref, s1_ref, idn_ref, sd_ref = rest
    else:
        h1_ref, s1_ref = rest

    x = x_ref[0]                                    # (H*W, Cpi) f32
    xb = x.astype(jnp.bfloat16)                     # bf16 MXU inputs, f32 accum
    h1 = jnp.dot(xb, w1_ref[...], preferred_element_type=jnp.float32)
    h1_ref[0] = h1
    s1_ref[0] = _channel_stats(h1)

    if down_sampling:
        xs = _subsample_hw(xb.reshape(h, w, xb.shape[-1]), stride, hout, wout)
        idn = jnp.dot(xs.reshape(hout * wout, xs.shape[-1]), wd_ref[...],
                      preferred_element_type=jnp.float32)
        idn_ref[0] = idn
        sd_ref[0] = _channel_stats(idn)


def _stage_b_kernel(h1_ref, w2_ref, sc1_ref, sh1_ref, h2_ref, s2_ref, hp_ref,
                    *, stride, dims):
    """BN1(affine)+ReLU -> 3x3 conv (stride) as a single im2col matmul + stats."""
    h, w, hout, wout, c = dims
    h1 = h1_ref[0]                                               # (H*W, C) f32
    h1n = jnp.maximum(h1 * sc1_ref[...] + sh1_ref[...], 0.0)     # BN1 + ReLU
    h1b = h1n.astype(jnp.bfloat16).reshape(h, w, c)

    # Zero only the 1-wide halo of the padded scratch (interior overwritten).
    hp_ref[0:1, :, :] = jnp.zeros((1, w + 2, c), jnp.bfloat16)
    hp_ref[h + 1:h + 2, :, :] = jnp.zeros((1, w + 2, c), jnp.bfloat16)
    hp_ref[1:h + 1, 0:1, :] = jnp.zeros((h, 1, c), jnp.bfloat16)
    hp_ref[1:h + 1, w + 1:w + 2, :] = jnp.zeros((h, 1, c), jnp.bfloat16)
    hp_ref[1:h + 1, 1:w + 1, :] = h1b

    # im2col: 9 shifted taps concatenated along the lane axis -> one K=9C dot.
    taps = [hp_ref[kh:kh + h, kw:kw + w, :] for kh in range(3) for kw in range(3)]
    patches = jnp.concatenate(taps, axis=-1)                     # (H, W, 9C) bf16
    patches = _subsample_hw(patches, stride, hout, wout)         # stride once
    h2 = jnp.dot(patches.reshape(hout * wout, 9 * c), w2_ref[...],
                 preferred_element_type=jnp.float32)
    h2_ref[0] = h2
    s2_ref[0] = _channel_stats(h2)


def _stage_c_kernel(h2_ref, w3_ref, sc2_ref, sh2_ref, h3_ref, s3_ref):
    """BN2(affine)+ReLU -> conv1x1_3 raw output + BN3 stats."""
    h2 = h2_ref[0]
    h2n = jnp.maximum(h2 * sc2_ref[...] + sh2_ref[...], 0.0)
    h3 = jnp.dot(h2n.astype(jnp.bfloat16), w3_ref[...],
                 preferred_element_type=jnp.float32)
    h3_ref[0] = h3
    s3_ref[0] = _channel_stats(h3)


def _stage_d_kernel(h3_ref, idn_ref, sc3_ref, sh3_ref, *rest, down_sampling):
    """BN3(affine) + (BN_d(affine) identity | raw identity) + add + ReLU."""
    if down_sampling:
        scd_ref, shd_ref, o_ref = rest
    else:
        (o_ref,) = rest
    h3 = h3_ref[0] * sc3_ref[...] + sh3_ref[...]
    idn = idn_ref[0]
    if down_sampling:
        idn = idn * scd_ref[...] + shd_ref[...]
    o_ref[0] = jnp.maximum(h3 + idn, 0.0)


# ------------------------------ wrapper -------------------------------------


def _finalize_bn(partial_stats, gamma_p, beta_p, count):
    """Reduce per-image (sum, sum_sq) partials -> BN scale/shift, shape (1, C)."""
    tot = jnp.sum(partial_stats, axis=0)                       # (2, C)
    mean = tot[0] / count
    var = jnp.maximum(tot[1] / count - mean * mean, 0.0)       # biased variance
    scale = gamma_p * lax.rsqrt(var + _EPS)
    shift = beta_p - mean * scale
    return scale[None, :], shift[None, :]


def _pad2(a, r, c):
    return jnp.zeros((r, c), jnp.float32).at[: a.shape[0], : a.shape[1]].set(a)


def _pad_vec(v, c, fill):
    return jnp.full((c,), fill, jnp.float32).at[: v.size].set(v.reshape(-1))


def bottleneck_block(x_nchw, params, *, down_sampling, stride):
    """Forward pass of BottleneckBuildingBlock. Input/output are NCHW.

    The NCHW<->NHWC transposes exist only to match the PyTorch interface; an
    end-to-end NHWC model would drop them.
    """
    x = jnp.transpose(x_nchw, (0, 2, 3, 1)).astype(jnp.float32)
    n, h, w, cin = x.shape
    cmid = params['w1'].shape[1]
    cout = params['w3'].shape[1]
    s = stride
    if s > 1:
        assert h % s == 0 and w % s == 0, "strided path assumes divisible spatial dims"
    if not down_sampling:
        assert cin == cout and s == 1, "identity path requires cin == cout and stride 1"
    hout = (h + 2 - 3) // s + 1
    wout = (w + 2 - 3) // s + 1
    m1, m2 = h * w, hout * wout

    # Pad channels to lane-dense multiples of 128 (zero pads contribute nothing).
    cpi, cpm, cpo = (_round_up(c, _LANE) for c in (cin, cmid, cout))

    xp = jnp.zeros((n, m1, cpi), jnp.float32).at[:, :, :cin].set(x.reshape(n, m1, cin))
    w1p = _pad2(params['w1'], cpi, cpm).astype(jnp.bfloat16)
    w2p = jnp.zeros((9, cpm, cpm), jnp.float32).at[:, :cmid, :cmid].set(params['w2'])
    w2p = w2p.reshape(9 * cpm, cpm).astype(jnp.bfloat16)
    w3p = _pad2(params['w3'], cpm, cpo).astype(jnp.bfloat16)
    g1p, b1p = _pad_vec(params['g1'], cpm, 1.0), _pad_vec(params['b1'], cpm, 0.0)
    g2p, b2p = _pad_vec(params['g2'], cpm, 1.0), _pad_vec(params['b2'], cpm, 0.0)
    g3p, b3p = _pad_vec(params['g3'], cpo, 1.0), _pad_vec(params['b3'], cpo, 0.0)
    if down_sampling:
        wdp = _pad2(params['wd'], cpi, cpo).astype(jnp.bfloat16)
        gdp, bdp = _pad_vec(params['gd'], cpo, 1.0), _pad_vec(params['bd'], cpo, 0.0)

    cparams = pltpu.CompilerParams(
        dimension_semantics=("parallel",),          # batch axis -> both TCs on v7x
        vmem_limit_bytes=64 * 1024 * 1024)          # raise scoped-VMEM default

    def cost(flops, nbytes):
        return pl.CostEstimate(flops=max(int(flops), 1), transcendentals=0,
                               bytes_accessed=max(int(nbytes), 1))

    act_spec = lambda m, c: pl.BlockSpec((1, m, c), lambda i: (i, 0, 0))
    stat_spec = lambda c: pl.BlockSpec((1, 2, c), lambda i: (i, 0, 0))
    wgt_spec = lambda r, c: pl.BlockSpec((r, c), lambda i: (0, 0))
    vec_spec = lambda c: pl.BlockSpec((1, c), lambda i: (0, 0))

    # ---- stage A: conv1x1_1 (+ downsample conv1x1), raw outputs + stats ----
    in_specs = [act_spec(m1, cpi), wgt_spec(cpi, cpm)]
    out_shapes = [jax.ShapeDtypeStruct((n, m1, cpm), jnp.float32),
                  jax.ShapeDtypeStruct((n, 2, cpm), jnp.float32)]
    out_specs = [act_spec(m1, cpm), stat_spec(cpm)]
    args = [xp, w1p]
    flops_a = 2 * n * m1 * cpi * cpm
    bytes_a = xp.size * 4 + w1p.size * 2 + n * m1 * cpm * 4
    if down_sampling:
        in_specs.append(wgt_spec(cpi, cpo))
        out_shapes += [jax.ShapeDtypeStruct((n, m2, cpo), jnp.float32),
                       jax.ShapeDtypeStruct((n, 2, cpo), jnp.float32)]
        out_specs += [act_spec(m2, cpo), stat_spec(cpo)]
        args.append(wdp)
        flops_a += 2 * n * m2 * cpi * cpo
        bytes_a += wdp.size * 2 + n * m2 * cpo * 4
    res = pl.pallas_call(
        functools.partial(_stage_a_kernel, down_sampling=down_sampling,
                          stride=s, dims=(h, w, hout, wout)),
        grid=(n,), in_specs=in_specs, out_specs=out_specs, out_shape=out_shapes,
        compiler_params=cparams, cost_estimate=cost(flops_a, bytes_a),
    )(*args)
    if down_sampling:
        h1_raw, s1, idn_raw, sd = res
    else:
        h1_raw, s1 = res
    sc1, sh1 = _finalize_bn(s1, g1p, b1p, n * m1)

    # ---- stage B: BN1+ReLU -> 3x3 conv as a single im2col matmul + stats ----
    h2_raw, s2 = pl.pallas_call(
        functools.partial(_stage_b_kernel, stride=s, dims=(h, w, hout, wout, cpm)),
        grid=(n,),
        in_specs=[act_spec(m1, cpm), wgt_spec(9 * cpm, cpm),
                  vec_spec(cpm), vec_spec(cpm)],
        out_specs=[act_spec(m2, cpm), stat_spec(cpm)],
        out_shape=[jax.ShapeDtypeStruct((n, m2, cpm), jnp.float32),
                   jax.ShapeDtypeStruct((n, 2, cpm), jnp.float32)],
        scratch_shapes=[pltpu.VMEM((h + 2, w + 2, cpm), jnp.bfloat16)],
        compiler_params=cparams,
        cost_estimate=cost(2 * n * m2 * 9 * cpm * cpm,
                           n * m1 * cpm * 4 + w2p.size * 2 + n * m2 * cpm * 4),
    )(h1_raw, w2p, sc1, sh1)
    sc2, sh2 = _finalize_bn(s2, g2p, b2p, n * m2)

    # ---- stage C: BN2+ReLU -> conv1x1_3 + stats ----
    h3_raw, s3 = pl.pallas_call(
        _stage_c_kernel, grid=(n,),
        in_specs=[act_spec(m2, cpm), wgt_spec(cpm, cpo),
                  vec_spec(cpm), vec_spec(cpm)],
        out_specs=[act_spec(m2, cpo), stat_spec(cpo)],
        out_shape=[jax.ShapeDtypeStruct((n, m2, cpo), jnp.float32),
                   jax.ShapeDtypeStruct((n, 2, cpo), jnp.float32)],
        compiler_params=cparams,
        cost_estimate=cost(2 * n * m2 * cpm * cpo,
                           n * m2 * cpm * 4 + w3p.size * 2 + n * m2 * cpo * 4),
    )(h2_raw, w3p, sc2, sh2)
    sc3, sh3 = _finalize_bn(s3, g3p, b3p, n * m2)

    # ---- stage D: BN3 + identity (BN_d) + add + ReLU (lane-dense output) ----
    if down_sampling:
        scd, shd = _finalize_bn(sd, gdp, bdp, n * m2)
        idn_in, extra, extra_specs = idn_raw, [scd, shd], [vec_spec(cpo), vec_spec(cpo)]
    else:
        idn_in, extra, extra_specs = xp, [], []
    out_p = pl.pallas_call(
        functools.partial(_stage_d_kernel, down_sampling=down_sampling),
        grid=(n,),
        in_specs=[act_spec(m2, cpo), act_spec(m2, cpo),
                  vec_spec(cpo), vec_spec(cpo)] + extra_specs,
        out_specs=act_spec(m2, cpo),
        out_shape=jax.ShapeDtypeStruct((n, m2, cpo), jnp.float32),
        compiler_params=cparams,
        cost_estimate=cost(4 * n * m2 * cpo, 3 * n * m2 * cpo * 4),
    )(h3_raw, idn_in, sc3, sh3, *extra)

    out = out_p[:, :, :cout].reshape(n, hout, wout, cout)
    return jnp.transpose(out, (0, 3, 1, 2))  # -> NCHW


# ------------------------------ params / reference --------------------------


def init_params(key, in_channels, mid_channels, out_channels, down_sampling):
    """Deterministic parameter init (bias-free convs; BN gamma=1, beta=0)."""
    ks = jax.random.split(key, 4)

    def conv_init(k, shape, fan_in):
        return jax.random.normal(k, shape, jnp.float32) * (1.0 / jnp.sqrt(fan_in))

    p = {
        'w1': conv_init(ks[0], (in_channels, mid_channels), in_channels),
        'g1': jnp.ones((1, mid_channels), jnp.float32),
        'b1': jnp.zeros((1, mid_channels), jnp.float32),
        # 3x3 weights stored as (kh*3+kw, Cin, Cout)
        'w2': conv_init(ks[1], (9, mid_channels, mid_channels), 9 * mid_channels),
        'g2': jnp.ones((1, mid_channels), jnp.float32),
        'b2': jnp.zeros((1, mid_channels), jnp.float32),
        'w3': conv_init(ks[2], (mid_channels, out_channels), mid_channels),
        'g3': jnp.ones((1, out_channels), jnp.float32),
        'b3': jnp.zeros((1, out_channels), jnp.float32),
    }
    if down_sampling:
        p['wd'] = conv_init(ks[3], (in_channels, out_channels), in_channels)
        p['gd'] = jnp.ones((1, out_channels), jnp.float32)
        p['bd'] = jnp.zeros((1, out_channels), jnp.float32)
    return p


def _reference(x_nhwc, params, cmid, down_sampling, stride):
    """Pure-JAX reference (NHWC); convolutions at the kernel's operating
    precision (bf16 MXU inputs, f32 accumulation), BN/ReLU in f32."""
    def bn(v, g, b):
        m = jnp.mean(v, axis=(0, 1, 2), keepdims=True)
        var = jnp.mean(jnp.square(v - m), axis=(0, 1, 2), keepdims=True)
        return (v - m) / jnp.sqrt(var + _EPS) * g + b

    dn = ('NHWC', 'HWIO', 'NHWC')

    def conv(x, wgt, strides, padding):
        return lax.conv_general_dilated(
            x.astype(jnp.bfloat16), wgt.astype(jnp.bfloat16), strides, padding,
            dimension_numbers=dn, preferred_element_type=jnp.float32)

    h = conv(x_nhwc, params['w1'][None, None], (1, 1), 'VALID')
    h = jax.nn.relu(bn(h, params['g1'], params['b1']))
    h = conv(h, params['w2'].reshape(3, 3, cmid, cmid), (stride, stride),
             ((1, 1), (1, 1)))
    h = jax.nn.relu(bn(h, params['g2'], params['b2']))
    h = conv(h, params['w3'][None, None], (1, 1), 'VALID')
    h = bn(h, params['g3'], params['b3'])
    if down_sampling:
        idn = conv(x_nhwc, params['wd'][None, None], (stride, stride), 'VALID')
        idn = bn(idn, params['gd'], params['bd'])
    else:
        idn = x_nhwc
    return jax.nn.relu(h + idn)


if __name__ == "__main__":
    key = jax.random.PRNGKey(0)
    kx, kp = jax.random.split(key)

    # Module config: BottleneckBuildingBlock(4, 4, 16, down_sampling=True, layer_index=1)
    N, Cin, Hsp, Wsp = 2, 4, 16, 16
    Cmid, Cout = 4, 16
    down_sampling = True
    layer_index = 1
    stride = 2 if (down_sampling and layer_index != 1) else 1

    x_nchw = jax.random.normal(kx, (N, Cin, Hsp, Wsp), jnp.float32)
    params = init_params(kp, Cin, Cmid, Cout, down_sampling)

    fwd = jax.jit(functools.partial(bottleneck_block,
                                    down_sampling=down_sampling, stride=stride))
    out = jax.block_until_ready(fwd(x_nchw, params))

    ref = _reference(jnp.transpose(x_nchw, (0, 2, 3, 1)), params, Cmid,
                     down_sampling, stride)
    ref = jnp.transpose(ref, (0, 3, 1, 2))
    assert out.shape == ref.shape, (out.shape, ref.shape)
    max_err = float(jnp.max(jnp.abs(out - ref)))
    assert jnp.allclose(out, ref, rtol=1e-2, atol=1e-2), max_err  # bf16 MXU tolerance

    print("KERNEL_OK")
</pallas_src>

<mosaic_0001>
module attributes {stable_mosaic.version = 11 : i64} {
  func.func @_stage_a_kernel(%arg0: i32, %arg1: memref<1x256x128xf32, #tpu.memory_space<vmem>>, %arg2: memref<128x128xbf16, #tpu.memory_space<vmem>>, %arg3: memref<128x128xbf16, #tpu.memory_space<vmem>>, %arg4: memref<1x256x128xf32, #tpu.memory_space<vmem>>, %arg5: memref<1x2x128xf32, #tpu.memory_space<vmem>>, %arg6: memref<1x256x128xf32, #tpu.memory_space<vmem>>, %arg7: memref<1x2x128xf32, #tpu.memory_space<vmem>>) attributes {dimension_semantics = [#tpu.dimension_semantics<parallel>], iteration_bounds = array<i64: 2>, scalar_prefetch = 0 : i64, scratch_operands = 0 : i64, tpu.core_type = #tpu.core_type<tc>, window_params = [{transform_indices = @transform_0, window_bounds = array<i64: 1, 256, 128>}, {pipeline_mode = #tpu.pipeline_mode<synchronous>, transform_indices = @transform_1, window_bounds = array<i64: 128, 128>}, {pipeline_mode = #tpu.pipeline_mode<synchronous>, transform_indices = @transform_2, window_bounds = array<i64: 128, 128>}, {transform_indices = @transform_3, window_bounds = array<i64: 1, 256, 128>}, {transform_indices = @transform_4, window_bounds = array<i64: 1, 2, 128>}, {transform_indices = @transform_5, window_bounds = array<i64: 1, 256, 128>}, {transform_indices = @transform_6, window_bounds = array<i64: 1, 2, 128>}]} {
    %c0 = arith.constant 0 : index
    %c0_0 = arith.constant 0 : index
    %c0_1 = arith.constant 0 : index
    %0 = vector.load %arg1[%c0, %c0_0, %c0_1] : memref<1x256x128xf32, #tpu.memory_space<vmem>>, vector<1x256x128xf32>
    %1 = vector.shape_cast %0 : vector<1x256x128xf32> to vector<256x128xf32>
    %2 = arith.truncf %1 : vector<256x128xf32> to vector<256x128xbf16>
    %c0_2 = arith.constant 0 : index
    %c0_3 = arith.constant 0 : index
    %3 = vector.load %arg2[%c0_2, %c0_3] : memref<128x128xbf16, #tpu.memory_space<vmem>>, vector<128x128xbf16>
    %cst = arith.constant dense<0.000000e+00> : vector<256x128xf32>
    %4 = tpu.matmul %2, %3, %cst {dimension_numbers = #tpu.dot_dimension_numbers<[1], [0], [0], [1], [0, 0, 1, 1], [], []>} : vector<256x128xbf16>, vector<128x128xbf16>, vector<256x128xf32> -> vector<256x128xf32>
    %c0_4 = arith.constant 0 : index
    %c0_5 = arith.constant 0 : index
    %c0_6 = arith.constant 0 : index
    %5 = vector.load %arg4[%c0_4, %c0_5, %c0_6] : memref<1x256x128xf32, #tpu.memory_space<vmem>>, vector<1x256x128xf32>
    %6 = vector.shape_cast %5 : vector<1x256x128xf32> to vector<256x128xf32>
    %7 = vector.shape_cast %4 : vector<256x128xf32> to vector<1x256x128xf32>
    tpu.vector_store %arg4[%c0_4, %c0_5, %c0_6], %7 {strides = array<i32>} : memref<1x256x128xf32, #tpu.memory_space<vmem>>, vector<1x256x128xf32>,
    %cst_7 = arith.constant dense<0.000000e+00> : vector<128xf32>
    %8 = vector.multi_reduction <add>, %4, %cst_7 [0] : vector<256x128xf32> to vector<128xf32>
    %9 = vector.shape_cast %8 : vector<128xf32> to vector<1x128xf32>
    %10 = arith.mulf %4, %4 : vector<256x128xf32>
    %cst_8 = arith.constant dense<0.000000e+00> : vector<128xf32>
    %11 = vector.multi_reduction <add>, %10, %cst_8 [0] : vector<256x128xf32> to vector<128xf32>
    %12 = vector.shape_cast %11 : vector<128xf32> to vector<1x128xf32>
    %13 = tpu.concatenate %9, %12 in 0 : vector<1x128xf32>, vector<1x128xf32> -> vector<2x128xf32>
    %c0_9 = arith.constant 0 : index
    %c0_10 = arith.constant 0 : index
    %c0_11 = arith.constant 0 : index
    %14 = vector.load %arg5[%c0_9, %c0_10, %c0_11] : memref<1x2x128xf32, #tpu.memory_space<vmem>>, vector<1x2x128xf32>
    %15 = vector.shape_cast %14 : vector<1x2x128xf32> to vector<2x128xf32>
    %16 = vector.shape_cast %13 : vector<2x128xf32> to vector<1x2x128xf32>
    tpu.vector_store %arg5[%c0_9, %c0_10, %c0_11], %16 {strides = array<i32>} : memref<1x2x128xf32, #tpu.memory_space<vmem>>, vector<1x2x128xf32>,
    %17 = vector.shape_cast %2 : vector<256x128xbf16> to vector<16x16x128xbf16>
    %18 = vector.shape_cast %17 : vector<16x16x128xbf16> to vector<256x128xbf16>
    %c0_12 = arith.constant 0 : index
    %c0_13 = arith.constant 0 : index
    %19 = vector.load %arg3[%c0_12, %c0_13] : memref<128x128xbf16, #tpu.memory_space<vmem>>, vector<128x128xbf16>
    %cst_14 = arith.constant dense<0.000000e+00> : vector<256x128xf32>
    %20 = tpu.matmul %18, %19, %cst_14 {dimension_numbers = #tpu.dot_dimension_numbers<[1], [0], [0], [1], [0, 0, 1, 1], [], []>} : vector<256x128xbf16>, vector<128x128xbf16>, vector<256x128xf32> -> vector<256x128xf32>
    %c0_15 = arith.constant 0 : index
    %c0_16 = arith.constant 0 : index
    %c0_17 = arith.constant 0 : index
    %21 = vector.load %arg6[%c0_15, %c0_16, %c0_17] : memref<1x256x128xf32, #tpu.memory_space<vmem>>, vector<1x256x128xf32>
    %22 = vector.shape_cast %21 : vector<1x256x128xf32> to vector<256x128xf32>
    %23 = vector.shape_cast %20 : vector<256x128xf32> to vector<1x256x128xf32>
    tpu.vector_store %arg6[%c0_15, %c0_16, %c0_17], %23 {strides = array<i32>} : memref<1x256x128xf32, #tpu.memory_space<vmem>>, vector<1x256x128xf32>,
    %cst_18 = arith.constant dense<0.000000e+00> : vector<128xf32>
    %24 = vector.multi_reduction <add>, %20, %cst_18 [0] : vector<256x128xf32> to vector<128xf32>
    %25 = vector.shape_cast %24 : vector<128xf32> to vector<1x128xf32>
    %26 = arith.mulf %20, %20 : vector<256x128xf32>
    %cst_19 = arith.constant dense<0.000000e+00> : vector<128xf32>
    %27 = vector.multi_reduction <add>, %26, %cst_19 [0] : vector<256x128xf32> to vector<128xf32>
    %28 = vector.shape_cast %27 : vector<128xf32> to vector<1x128xf32>
    %29 = tpu.concatenate %25, %28 in 0 : vector<1x128xf32>, vector<1x128xf32> -> vector<2x128xf32>
    %c0_20 = arith.constant 0 : index
    %c0_21 = arith.constant 0 : index
    %c0_22 = arith.constant 0 : index
    %30 = vector.load %arg7[%c0_20, %c0_21, %c0_22] : memref<1x2x128xf32, #tpu.memory_space<vmem>>, vector<1x2x128xf32>
    %31 = vector.shape_cast %30 : vector<1x2x128xf32> to vector<2x128xf32>
    %32 = vector.shape_cast %29 : vector<2x128xf32> to vector<1x2x128xf32>
    tpu.vector_store %arg7[%c0_20, %c0_21, %c0_22], %32 {strides = array<i32>} : memref<1x2x128xf32, #tpu.memory_space<vmem>>, vector<1x2x128xf32>,
    return
  }
  func.func @transform_0(%arg0: i32) -> (i32, i32, i32) {
    %c0_i32 = arith.constant 0 : i32
    %c0_i32_0 = arith.constant 0 : i32
    %c0_i32_1 = arith.constant 0 : i32
    return %arg0, %c0_i32, %c0_i32_0 : i32, i32, i32
  }
  func.func @transform_1(%arg0: i32) -> (i32, i32) {
    %c0_i32 = arith.constant 0 : i32
    %c0_i32_0 = arith.constant 0 : i32
    %c0_i32_1 = arith.constant 0 : i32
    return %c0_i32, %c0_i32_0 : i32, i32
  }
  func.func @transform_2(%arg0: i32) -> (i32, i32) {
    %c0_i32 = arith.constant 0 : i32
    %c0_i32_0 = arith.constant 0 : i32
    %c0_i32_1 = arith.constant 0 : i32
    return %c0_i32, %c0_i32_0 : i32, i32
  }
  func.func @transform_3(%arg0: i32) -> (i32, i32, i32) {
    %c0_i32 = arith.constant 0 : i32
    %c0_i32_0 = arith.constant 0 : i32
    %c0_i32_1 = arith.constant 0 : i32
    return %arg0, %c0_i32, %c0_i32_0 : i32, i32, i32
  }
  func.func @transform_4(%arg0: i32) -> (i32, i32, i32) {
    %c0_i32 = arith.constant 0 : i32
    %c0_i32_0 = arith.constant 0 : i32
    %c0_i32_1 = arith.constant 0 : i32
    return %arg0, %c0_i32, %c0_i32_0 : i32, i32, i32
  }
  func.func @transform_5(%arg0: i32) -> (i32, i32, i32) {
    %c0_i32 = arith.constant 0 : i32
    %c0_i32_0 = arith.constant 0 : i32
    %c0_i32_1 = arith.constant 0 : i32
    return %arg0, %c0_i32, %c0_i32_0 : i32, i32, i32
  }
  func.func @transform_6(%arg0: i32) -> (i32, i32, i32) {
    %c0_i32 = arith.constant 0 : i32
    %c0_i32_0 = arith.constant 0 : i32
    %c0_i32_1 = arith.constant 0 : i32
    return %arg0, %c0_i32, %c0_i32_0 : i32, i32, i32
  }
}

module attributes {stable_mosaic.version = 11 : i64} {
  func.func @_stage_b_kernel(%arg0: i32, %arg1: memref<1x256x128xf32, #tpu.memory_space<vmem>>, %arg2: memref<1152x128xbf16, #tpu.memory_space<vmem>>, %arg3: memref<1x128xf32, #tpu.memory_space<vmem>>, %arg4: memref<1x128xf32, #tpu.memory_space<vmem>>, %arg5: memref<1x256x128xf32, #tpu.memory_space<vmem>>, %arg6: memref<1x2x128xf32, #tpu.memory_space<vmem>>, %arg7: memref<18x18x128xbf16, #tpu.memory_space<vmem>>) attributes {dimension_semantics = [#tpu.dimension_semantics<parallel>], iteration_bounds = array<i64: 2>, scalar_prefetch = 0 : i64, scratch_operands = 1 : i64, tpu.core_type = #tpu.core_type<tc>, window_params = [{transform_indices = @transform_0, window_bounds = array<i64: 1, 256, 128>}, {pipeline_mode = #tpu.pipeline_mode<synchronous>, transform_indices = @transform_1, window_bounds = array<i64: 1152, 128>}, {pipeline_mode = #tpu.pipeline_mode<synchronous>, transform_indices = @transform_2, window_bounds = array<i64: 1, 128>}, {pipeline_mode = #tpu.pipeline_mode<synchronous>, transform_indices = @transform_3, window_bounds = array<i64: 1, 128>}, {transform_indices = @transform_4, window_bounds = array<i64: 1, 256, 128>}, {transform_indices = @transform_5, window_bounds = array<i64: 1, 2, 128>}]} {
    %c0 = arith.constant 0 : index
    %c0_0 = arith.constant 0 : index
    %c0_1 = arith.constant 0 : index
    %0 = vector.load %arg1[%c0, %c0_0, %c0_1] : memref<1x256x128xf32, #tpu.memory_space<vmem>>, vector<1x256x128xf32>
    %1 = vector.shape_cast %0 : vector<1x256x128xf32> to vector<256x128xf32>
    %c0_2 = arith.constant 0 : index
    %c0_3 = arith.constant 0 : index
    %2 = vector.load %arg3[%c0_2, %c0_3] : memref<1x128xf32, #tpu.memory_space<vmem>>, vector<1x128xf32>
    %3 = vector.broadcast %2 : vector<1x128xf32> to vector<256x128xf32>
    %4 = arith.mulf %1, %3 : vector<256x128xf32>
    %c0_4 = arith.constant 0 : index
    %c0_5 = arith.constant 0 : index
    %5 = vector.load %arg4[%c0_4, %c0_5] : memref<1x128xf32, #tpu.memory_space<vmem>>, vector<1x128xf32>
    %6 = vector.broadcast %5 : vector<1x128xf32> to vector<256x128xf32>
    %7 = arith.addf %4, %6 : vector<256x128xf32>
    %cst = arith.constant 0.000000e+00 : f32
    %8 = vector.broadcast %cst : f32 to vector<256x128xf32>
    %9 = arith.maximumf %7, %8 : vector<256x128xf32>
    %10 = arith.truncf %9 : vector<256x128xf32> to vector<256x128xbf16>
    %11 = vector.shape_cast %10 : vector<256x128xbf16> to vector<16x16x128xbf16>
    %cst_6 = arith.constant 0.000000e+00 : bf16
    %12 = vector.broadcast %cst_6 : bf16 to vector<1x18x128xbf16>
    %c0_7 = arith.constant 0 : index
    %c0_8 = arith.constant 0 : index
    %c0_9 = arith.constant 0 : index
    %13 = vector.load %arg7[%c0_7, %c0_8, %c0_9] : memref<18x18x128xbf16, #tpu.memory_space<vmem>>, vector<1x18x128xbf16>
    tpu.vector_store %arg7[%c0_7, %c0_8, %c0_9], %12 {strides = array<i32>} : memref<18x18x128xbf16, #tpu.memory_space<vmem>>, vector<1x18x128xbf16>,
    %cst_10 = arith.constant 0.000000e+00 : bf16
    %14 = vector.broadcast %cst_10 : bf16 to vector<1x18x128xbf16>
    %c17 = arith.constant 17 : index
    %c0_11 = arith.constant 0 : index
    %c0_12 = arith.constant 0 : index
    %15 = vector.load %arg7[%c17, %c0_11, %c0_12] : memref<18x18x128xbf16, #tpu.memory_space<vmem>>, vector<1x18x128xbf16>
    tpu.vector_store %arg7[%c17, %c0_11, %c0_12], %14 {strides = array<i32>} : memref<18x18x128xbf16, #tpu.memory_space<vmem>>, vector<1x18x128xbf16>,
    %cst_13 = arith.constant 0.000000e+00 : bf16
    %16 = vector.broadcast %cst_13 : bf16 to vector<16x1x128xbf16>
    %c1 = arith.constant 1 : index
    %c0_14 = arith.constant 0 : index
    %c0_15 = arith.constant 0 : index
    %17 = vector.load %arg7[%c1, %c0_14, %c0_15] : memref<18x18x128xbf16, #tpu.memory_space<vmem>>, vector<16x1x128xbf16>
    tpu.vector_store %arg7[%c1, %c0_14, %c0_15], %16 {strides = array<i32>} : memref<18x18x128xbf16, #tpu.memory_space<vmem>>, vector<16x1x128xbf16>,
    %cst_16 = arith.constant 0.000000e+00 : bf16
    %18 = vector.broadcast %cst_16 : bf16 to vector<16x1x128xbf16>
    %c1_17 = arith.constant 1 : index
    %c17_18 = arith.constant 17 : index
    %c0_19 = arith.constant 0 : index
    %19 = vector.load %arg7[%c1_17, %c17_18, %c0_19] : memref<18x18x128xbf16, #tpu.memory_space<vmem>>, vector<16x1x128xbf16>
    tpu.vector_store %arg7[%c1_17, %c17_18, %c0_19], %18 {strides = array<i32>} : memref<18x18x128xbf16, #tpu.memory_space<vmem>>, vector<16x1x128xbf16>,
    %c1_20 = arith.constant 1 : index
    %c1_21 = arith.constant 1 : index
    %c0_22 = arith.constant 0 : index
    %20 = vector.load %arg7[%c1_20, %c1_21, %c0_22] : memref<18x18x128xbf16, #tpu.memory_space<vmem>>, vector<16x16x128xbf16>
    tpu.vector_store %arg7[%c1_20, %c1_21, %c0_22], %11 {strides = array<i32>} : memref<18x18x128xbf16, #tpu.memory_space<vmem>>, vector<16x16x128xbf16>,
    %c0_23 = arith.constant 0 : index
    %c0_24 = arith.constant 0 : index
    %c0_25 = arith.constant 0 : index
    %21 = vector.load %arg7[%c0_23, %c0_24, %c0_25] : memref<18x18x128xbf16, #tpu.memory_space<vmem>>, vector<16x16x128xbf16>
    %c0_26 = arith.constant 0 : index
    %c1_27 = arith.constant 1 : index
    %c0_28 = arith.constant 0 : index
    %22 = vector.load %arg7[%c0_26, %c1_27, %c0_28] : memref<18x18x128xbf16, #tpu.memory_space<vmem>>, vector<16x16x128xbf16>
    %c0_29 = arith.constant 0 : index
    %c2 = arith.constant 2 : index
    %c0_30 = arith.constant 0 : index
    %23 = vector.load %arg7[%c0_29, %c2, %c0_30] : memref<18x18x128xbf16, #tpu.memory_space<vmem>>, vector<16x16x128xbf16>
    %c1_31 = arith.constant 1 : index
    %c0_32 = arith.constant 0 : index
    %c0_33 = arith.constant 0 : index
    %24 = vector.load %arg7[%c1_31, %c0_32, %c0_33] : memref<18x18x128xbf16, #tpu.memory_space<vmem>>, vector<16x16x128xbf16>
    %c1_34 = arith.constant 1 : index
    %c1_35 = arith.constant 1 : index
    %c0_36 = arith.constant 0 : index
    %25 = vector.load %arg7[%c1_34, %c1_35, %c0_36] : memref<18x18x128xbf16, #tpu.memory_space<vmem>>, vector<16x16x128xbf16>
    %c1_37 = arith.constant 1 : index
    %c2_38 = arith.constant 2 : index
    %c0_39 = arith.constant 0 : index
    %26 = vector.load %arg7[%c1_37, %c2_38, %c0_39] : memref<18x18x128xbf16, #tpu.memory_space<vmem>>, vector<16x16x128xbf16>
    %c2_40 = arith.constant 2 : index
    %c0_41 = arith.constant 0 : index
    %c0_42 = arith.constant 0 : index
    %27 = vector.load %arg7[%c2_40, %c0_41, %c0_42] : memref<18x18x128xbf16, #tpu.memory_space<vmem>>, vector<16x16x128xbf16>
    %c2_43 = arith.constant 2 : index
    %c1_44 = arith.constant 1 : index
    %c0_45 = arith.constant 0 : index
    %28 = vector.load %arg7[%c2_43, %c1_44, %c0_45] : memref<18x18x128xbf16, #tpu.memory_space<vmem>>, vector<16x16x128xbf16>
    %c2_46 = arith.constant 2 : index
    %c2_47 = arith.constant 2 : index
    %c0_48 = arith.constant 0 : index
    %29 = vector.load %arg7[%c2_46, %c2_47, %c0_48] : memref<18x18x128xbf16, #tpu.memory_space<vmem>>, vector<16x16x128xbf16>
    %30 = tpu.concatenate %21, %22, %23, %24, %25, %26, %27, %28, %29 in 2 : vector<16x16x128xbf16>, vector<16x16x128xbf16>, vector<16x16x128xbf16>, vector<16x16x128xbf16>, vector<16x16x128xbf16>, vector<16x16x128xbf16>, vector<16x16x128xbf16>, vector<16x16x128xbf16>, vector<16x16x128xbf16> -> vector<16x16x1152xbf16>
    %31 = vector.shape_cast %30 : vector<16x16x1152xbf16> to vector<256x1152xbf16>
    %c0_49 = arith.constant 0 : index
    %c0_50 = arith.constant 0 : index
    %32 = vector.load %arg2[%c0_49, %c0_50] : memref<1152x128xbf16, #tpu.memory_space<vmem>>, vector<1152x128xbf16>
    %cst_51 = arith.constant dense<0.000000e+00> : vector<256x128xf32>
    %33 = tpu.matmul %31, %32, %cst_51 {dimension_numbers = #tpu.dot_dimension_numbers<[1], [0], [0], [1], [0, 0, 1, 1], [], []>} : vector<256x1152xbf16>, vector<1152x128xbf16>, vector<256x128xf32> -> vector<256x128xf32>
    %c0_52 = arith.constant 0 : index
    %c0_53 = arith.constant 0 : index
    %c0_54 = arith.constant 0 : index
    %34 = vector.load %arg5[%c0_52, %c0_53, %c0_54] : memref<1x256x128xf32, #tpu.memory_space<vmem>>, vector<1x256x128xf32>
    %35 = vector.shape_cast %34 : vector<1x256x128xf32> to vector<256x128xf32>
    %36 = vector.shape_cast %33 : vector<256x128xf32> to vector<1x256x128xf32>
    tpu.vector_store %arg5[%c0_52, %c0_53, %c0_54], %36 {strides = array<i32>} : memref<1x256x128xf32, #tpu.memory_space<vmem>>, vector<1x256x128xf32>,
    %cst_55 = arith.constant dense<0.000000e+00> : vector<128xf32>
    %37 = vector.multi_reduction <add>, %33, %cst_55 [0] : vector<256x128xf32> to vector<128xf32>
    %38 = vector.shape_cast %37 : vector<128xf32> to vector<1x128xf32>
    %39 = arith.mulf %33, %33 : vector<256x128xf32>
    %cst_56 = arith.constant dense<0.000000e+00> : vector<128xf32>
    %40 = vector.multi_reduction <add>, %39, %cst_56 [0] : vector<256x128xf32> to vector<128xf32>
    %41 = vector.shape_cast %40 : vector<128xf32> to vector<1x128xf32>
    %42 = tpu.concatenate %38, %41 in 0 : vector<1x128xf32>, vector<1x128xf32> -> vector<2x128xf32>
    %c0_57 = arith.constant 0 : index
    %c0_58 = arith.constant 0 : index
    %c0_59 = arith.constant 0 : index
    %43 = vector.load %arg6[%c0_57, %c0_58, %c0_59] : memref<1x2x128xf32, #tpu.memory_space<vmem>>, vector<1x2x128xf32>
    %44 = vector.shape_cast %43 : vector<1x2x128xf32> to vector<2x128xf32>
    %45 = vector.shape_cast %42 : vector<2x128xf32> to vector<1x2x128xf32>
    tpu.vector_store %arg6[%c0_57, %c0_58, %c0_59], %45 {strides = array<i32>} : memref<1x2x128xf32, #tpu.memory_space<vmem>>, vector<1x2x128xf32>,
    return
  }
  func.func @transform_0(%arg0: i32) -> (i32, i32, i32) {
    %c0_i32 = arith.constant 0 : i32
    %c0_i32_0 = arith.constant 0 : i32
    %c0_i32_1 = arith.constant 0 : i32
    return %arg0, %c0_i32, %c0_i32_0 : i32, i32, i32
  }
  func.func @transform_1(%arg0: i32) -> (i32, i32) {
    %c0_i32 = arith.constant 0 : i32
    %c0_i32_0 = arith.constant 0 : i32
    %c0_i32_1 = arith.constant 0 : i32
    return %c0_i32, %c0_i32_0 : i32, i32
  }
  func.func @transform_2(%arg0: i32) -> (i32, i32) {
    %c0_i32 = arith.constant 0 : i32
    %c0_i32_0 = arith.constant 0 : i32
    %c0_i32_1 = arith.constant 0 : i32
    return %c0_i32, %c0_i32_0 : i32, i32
  }
  func.func @transform_3(%arg0: i32) -> (i32, i32) {
    %c0_i32 = arith.constant 0 : i32
    %c0_i32_0 = arith.constant 0 : i32
    %c0_i32_1 = arith.constant 0 : i32
    return %c0_i32, %c0_i32_0 : i32, i32
  }
  func.func @transform_4(%arg0: i32) -> (i32, i32, i32) {
    %c0_i32 = arith.constant 0 : i32
    %c0_i32_0 = arith.constant 0 : i32
    %c0_i32_1 = arith.constant 0 : i32
    return %arg0, %c0_i32, %c0_i32_0 : i32, i32, i32
  }
  func.func @transform_5(%arg0: i32) -> (i32, i32, i32) {
    %c0_i32 = arith.constant 0 : i32
    %c0_i32_0 = arith.constant 0 : i32
    %c0_i32_1 = arith.constant 0 : i32
    return %arg0, %c0_i32, %c0_i32_0 : i32, i32, i32
  }
}

module attributes {stable_mosaic.version = 11 : i64} {
  func.func @_stage_c_kernel(%arg0: i32, %arg1: memref<1x256x128xf32, #tpu.memory_space<vmem>>, %arg2: memref<128x128xbf16, #tpu.memory_space<vmem>>, %arg3: memref<1x128xf32, #tpu.memory_space<vmem>>, %arg4: memref<1x128xf32, #tpu.memory_space<vmem>>, %arg5: memref<1x256x128xf32, #tpu.memory_space<vmem>>, %arg6: memref<1x2x128xf32, #tpu.memory_space<vmem>>) attributes {dimension_semantics = [#tpu.dimension_semantics<parallel>], iteration_bounds = array<i64: 2>, scalar_prefetch = 0 : i64, scratch_operands = 0 : i64, tpu.core_type = #tpu.core_type<tc>, window_params = [{transform_indices = @transform_0, window_bounds = array<i64: 1, 256, 128>}, {pipeline_mode = #tpu.pipeline_mode<synchronous>, transform_indices = @transform_1, window_bounds = array<i64: 128, 128>}, {pipeline_mode = #tpu.pipeline_mode<synchronous>, transform_indices = @transform_2, window_bounds = array<i64: 1, 128>}, {pipeline_mode = #tpu.pipeline_mode<synchronous>, transform_indices = @transform_3, window_bounds = array<i64: 1, 128>}, {transform_indices = @transform_4, window_bounds = array<i64: 1, 256, 128>}, {transform_indices = @transform_5, window_bounds = array<i64: 1, 2, 128>}]} {
    %c0 = arith.constant 0 : index
    %c0_0 = arith.constant 0 : index
    %c0_1 = arith.constant 0 : index
    %0 = vector.load %arg1[%c0, %c0_0, %c0_1] : memref<1x256x128xf32, #tpu.memory_space<vmem>>, vector<1x256x128xf32>
    %1 = vector.shape_cast %0 : vector<1x256x128xf32> to vector<256x128xf32>
    %c0_2 = arith.constant 0 : index
    %c0_3 = arith.constant 0 : index
    %2 = vector.load %arg3[%c0_2, %c0_3] : memref<1x128xf32, #tpu.memory_space<vmem>>, vector<1x128xf32>
    %3 = vector.broadcast %2 : vector<1x128xf32> to vector<256x128xf32>
    %4 = arith.mulf %1, %3 : vector<256x128xf32>
    %c0_4 = arith.constant 0 : index
    %c0_5 = arith.constant 0 : index
    %5 = vector.load %arg4[%c0_4, %c0_5] : memref<1x128xf32, #tpu.memory_space<vmem>>, vector<1x128xf32>
    %6 = vector.broadcast %5 : vector<1x128xf32> to vector<256x128xf32>
    %7 = arith.addf %4, %6 : vector<256x128xf32>
    %cst = arith.constant 0.000000e+00 : f32
    %8 = vector.broadcast %cst : f32 to vector<256x128xf32>
    %9 = arith.maximumf %7, %8 : vector<256x128xf32>
    %10 = arith.truncf %9 : vector<256x128xf32> to vector<256x128xbf16>
    %c0_6 = arith.constant 0 : index
    %c0_7 = arith.constant 0 : index
    %11 = vector.load %arg2[%c0_6, %c0_7] : memref<128x128xbf16, #tpu.memory_space<vmem>>, vector<128x128xbf16>
    %cst_8 = arith.constant dense<0.000000e+00> : vector<256x128xf32>
    %12 = tpu.matmul %10, %11, %cst_8 {dimension_numbers = #tpu.dot_dimension_numbers<[1], [0], [0], [1], [0, 0, 1, 1], [], []>} : vector<256x128xbf16>, vector<128x128xbf16>, vector<256x128xf32> -> vector<256x128xf32>
    %c0_9 = arith.constant 0 : index
    %c0_10 = arith.constant 0 : index
    %c0_11 = arith.constant 0 : index
    %13 = vector.load %arg5[%c0_9, %c0_10, %c0_11] : memref<1x256x128xf32, #tpu.memory_space<vmem>>, vector<1x256x128xf32>
    %14 = vector.shape_cast %13 : vector<1x256x128xf32> to vector<256x128xf32>
    %15 = vector.shape_cast %12 : vector<256x128xf32> to vector<1x256x128xf32>
    tpu.vector_store %arg5[%c0_9, %c0_10, %c0_11], %15 {strides = array<i32>} : memref<1x256x128xf32, #tpu.memory_space<vmem>>, vector<1x256x128xf32>,
    %cst_12 = arith.constant dense<0.000000e+00> : vector<128xf32>
    %16 = vector.multi_reduction <add>, %12, %cst_12 [0] : vector<256x128xf32> to vector<128xf32>
    %17 = vector.shape_cast %16 : vector<128xf32> to vector<1x128xf32>
    %18 = arith.mulf %12, %12 : vector<256x128xf32>
    %cst_13 = arith.constant dense<0.000000e+00> : vector<128xf32>
    %19 = vector.multi_reduction <add>, %18, %cst_13 [0] : vector<256x128xf32> to vector<128xf32>
    %20 = vector.shape_cast %19 : vector<128xf32> to vector<1x128xf32>
    %21 = tpu.concatenate %17, %20 in 0 : vector<1x128xf32>, vector<1x128xf32> -> vector<2x128xf32>
    %c0_14 = arith.constant 0 : index
    %c0_15 = arith.constant 0 : index
    %c0_16 = arith.constant 0 : index
    %22 = vector.load %arg6[%c0_14, %c0_15, %c0_16] : memref<1x2x128xf32, #tpu.memory_space<vmem>>, vector<1x2x128xf32>
    %23 = vector.shape_cast %22 : vector<1x2x128xf32> to vector<2x128xf32>
    %24 = vector.shape_cast %21 : vector<2x128xf32> to vector<1x2x128xf32>
    tpu.vector_store %arg6[%c0_14, %c0_15, %c0_16], %24 {strides = array<i32>} : memref<1x2x128xf32, #tpu.memory_space<vmem>>, vector<1x2x128xf32>,
    return
  }
  func.func @transform_0(%arg0: i32) -> (i32, i32, i32) {
    %c0_i32 = arith.constant 0 : i32
    %c0_i32_0 = arith.constant 0 : i32
    %c0_i32_1 = arith.constant 0 : i32
    return %arg0, %c0_i32, %c0_i32_0 : i32, i32, i32
  }
  func.func @transform_1(%arg0: i32) -> (i32, i32) {
    %c0_i32 = arith.constant 0 : i32
    %c0_i32_0 = arith.constant 0 : i32
    %c0_i32_1 = arith.constant 0 : i32
    return %c0_i32, %c0_i32_0 : i32, i32
  }
  func.func @transform_2(%arg0: i32) -> (i32, i32) {
    %c0_i32 = arith.constant 0 : i32
    %c0_i32_0 = arith.constant 0 : i32
    %c0_i32_1 = arith.constant 0 : i32
    return %c0_i32, %c0_i32_0 : i32, i32
  }
  func.func @transform_3(%arg0: i32) -> (i32, i32) {
    %c0_i32 = arith.constant 0 : i32
    %c0_i32_0 = arith.constant 0 : i32
    %c0_i32_1 = arith.constant 0 : i32
    return %c0_i32, %c0_i32_0 : i32, i32
  }
  func.func @transform_4(%arg0: i32) -> (i32, i32, i32) {
    %c0_i32 = arith.constant 0 : i32
    %c0_i32_0 = arith.constant 0 : i32
    %c0_i32_1 = arith.constant 0 : i32
    return %arg0, %c0_i32, %c0_i32_0 : i32, i32, i32
  }
  func.func @transform_5(%arg0: i32) -> (i32, i32, i32) {
    %c0_i32 = arith.constant 0 : i32
    %c0_i32_0 = arith.constant 0 : i32
    %c0_i32_1 = arith.constant 0 : i32
    return %arg0, %c0_i32, %c0_i32_0 : i32, i32, i32
  }
}

module attributes {stable_mosaic.version = 11 : i64} {
  func.func @_stage_d_kernel(%arg0: i32, %arg1: memref<1x256x128xf32, #tpu.memory_space<vmem>>, %arg2: memref<1x256x128xf32, #tpu.memory_space<vmem>>, %arg3: memref<1x128xf32, #tpu.memory_space<vmem>>, %arg4: memref<1x128xf32, #tpu.memory_space<vmem>>, %arg5: memref<1x128xf32, #tpu.memory_space<vmem>>, %arg6: memref<1x128xf32, #tpu.memory_space<vmem>>, %arg7: memref<1x256x128xf32, #tpu.memory_space<vmem>>) attributes {dimension_semantics = [#tpu.dimension_semantics<parallel>], iteration_bounds = array<i64: 2>, scalar_prefetch = 0 : i64, scratch_operands = 0 : i64, tpu.core_type = #tpu.core_type<tc>, window_params = [{transform_indices = @transform_0, window_bounds = array<i64: 1, 256, 128>}, {transform_indices = @transform_1, window_bounds = array<i64: 1, 256, 128>}, {pipeline_mode = #tpu.pipeline_mode<synchronous>, transform_indices = @transform_2, window_bounds = array<i64: 1, 128>}, {pipeline_mode = #tpu.pipeline_mode<synchronous>, transform_indices = @transform_3, window_bounds = array<i64: 1, 128>}, {pipeline_mode = #tpu.pipeline_mode<synchronous>, transform_indices = @transform_4, window_bounds = array<i64: 1, 128>}, {pipeline_mode = #tpu.pipeline_mode<synchronous>, transform_indices = @transform_5, window_bounds = array<i64: 1, 128>}, {transform_indices = @transform_6, window_bounds = array<i64: 1, 256, 128>}]} {
    %c0 = arith.constant 0 : index
    %c0_0 = arith.constant 0 : index
    %c0_1 = arith.constant 0 : index
    %0 = vector.load %arg1[%c0, %c0_0, %c0_1] : memref<1x256x128xf32, #tpu.memory_space<vmem>>, vector<1x256x128xf32>
    %1 = vector.shape_cast %0 : vector<1x256x128xf32> to vector<256x128xf32>
    %c0_2 = arith.constant 0 : index
    %c0_3 = arith.constant 0 : index
    %2 = vector.load %arg3[%c0_2, %c0_3] : memref<1x128xf32, #tpu.memory_space<vmem>>, vector<1x128xf32>
    %3 = vector.broadcast %2 : vector<1x128xf32> to vector<256x128xf32>
    %4 = arith.mulf %1, %3 : vector<256x128xf32>
    %c0_4 = arith.constant 0 : index
    %c0_5 = arith.constant 0 : index
    %5 = vector.load %arg4[%c0_4, %c0_5] : memref<1x128xf32, #tpu.memory_space<vmem>>, vector<1x128xf32>
    %6 = vector.broadcast %5 : vector<1x128xf32> to vector<256x128xf32>
    %7 = arith.addf %4, %6 : vector<256x128xf32>
    %c0_6 = arith.constant 0 : index
    %c0_7 = arith.constant 0 : index
    %c0_8 = arith.constant 0 : index
    %8 = vector.load %arg2[%c0_6, %c0_7, %c0_8] : memref<1x256x128xf32, #tpu.memory_space<vmem>>, vector<1x256x128xf32>
    %9 = vector.shape_cast %8 : vector<1x256x128xf32> to vector<256x128xf32>
    %c0_9 = arith.constant 0 : index
    %c0_10 = arith.constant 0 : index
    %10 = vector.load %arg5[%c0_9, %c0_10] : memref<1x128xf32, #tpu.memory_space<vmem>>, vector<1x128xf32>
    %11 = vector.broadcast %10 : vector<1x128xf32> to vector<256x128xf32>
    %12 = arith.mulf %9, %11 : vector<256x128xf32>
    %c0_11 = arith.constant 0 : index
    %c0_12 = arith.constant 0 : index
    %13 = vector.load %arg6[%c0_11, %c0_12] : memref<1x128xf32, #tpu.memory_space<vmem>>, vector<1x128xf32>
    %14 = vector.broadcast %13 : vector<1x128xf32> to vector<256x128xf32>
    %15 = arith.addf %12, %14 : vector<256x128xf32>
    %16 = arith.addf %7, %15 : vector<256x128xf32>
    %cst = arith.constant 0.000000e+00 : f32
    %17 = vector.broadcast %cst : f32 to vector<256x128xf32>
    %18 = arith.maximumf %16, %17 : vector<256x128xf32>
    %c0_13 = arith.constant 0 : index
    %c0_14 = arith.constant 0 : index
    %c0_15 = arith.constant 0 : index
    %19 = vector.load %arg7[%c0_13, %c0_14, %c0_15] : memref<1x256x128xf32, #tpu.memory_space<vmem>>, vector<1x256x128xf32>
    %20 = vector.shape_cast %19 : vector<1x256x128xf32> to vector<256x128xf32>
    %21 = vector.shape_cast %18 : vector<256x128xf32> to vector<1x256x128xf32>
    tpu.vector_store %arg7[%c0_13, %c0_14, %c0_15], %21 {strides = array<i32>} : memref<1x256x128xf32, #tpu.memory_space<vmem>>, vector<1x256x128xf32>,
    return
  }
  func.func @transform_0(%arg0: i32) -> (i32, i32, i32) {
    %c0_i32 = arith.constant 0 : i32
    %c0_i32_0 = arith.constant 0 : i32
    %c0_i32_1 = arith.constant 0 : i32
    return %arg0, %c0_i32, %c0_i32_0 : i32, i32, i32
  }
  func.func @transform_1(%arg0: i32) -> (i32, i32, i32) {
    %c0_i32 = arith.constant 0 : i32
    %c0_i32_0 = arith.constant 0 : i32
    %c0_i32_1 = arith.constant 0 : i32
    return %arg0, %c0_i32, %c0_i32_0 : i32, i32, i32
  }
  func.func @transform_2(%arg0: i32) -> (i32, i32) {
    %c0_i32 = arith.constant 0 : i32
    %c0_i32_0 = arith.constant 0 : i32
    %c0_i32_1 = arith.constant 0 : i32
    return %c0_i32, %c0_i32_0 : i32, i32
  }
  func.func @transform_3(%arg0: i32) -> (i32, i32) {
    %c0_i32 = arith.constant 0 : i32
    %c0_i32_0 = arith.constant 0 : i32
    %c0_i32_1 = arith.constant 0 : i32
    return %c0_i32, %c0_i32_0 : i32, i32
  }
  func.func @transform_4(%arg0: i32) -> (i32, i32) {
    %c0_i32 = arith.constant 0 : i32
    %c0_i32_0 = arith.constant 0 : i32
    %c0_i32_1 = arith.constant 0 : i32
    return %c0_i32, %c0_i32_0 : i32, i32
  }
  func.func @transform_5(%arg0: i32) -> (i32, i32) {
    %c0_i32 = arith.constant 0 : i32
    %c0_i32_0 = arith.constant 0 : i32
    %c0_i32_1 = arith.constant 0 : i32
    return %c0_i32, %c0_i32_0 : i32, i32
  }
  func.func @transform_6(%arg0: i32) -> (i32, i32, i32) {
    %c0_i32 = arith.constant 0 : i32
    %c0_i32_0 = arith.constant 0 : i32
    %c0_i32_1 = arith.constant 0 : i32
    return %arg0, %c0_i32, %c0_i32_0 : i32, i32, i32
  }
}

</mosaic_0001>

<bundles_post_ra>
// kernel: bottleneck_block.6
= control target key start
LH: loop header
LB: loop body
LE: loop exit
PB: predicated region body
PF: predicated region fallthrough
CT: control target
= control target key end

     0   :  { %s1013_s18 = smov 0   ;;  %s1312_s0 = inlined_call_operand.vmem [shape: f32[2,256,128], index: 0, kind: input, shape index: {}]   ;;  %s1313_s1 = inlined_call_operand.vmem [shape: bf16[128,128], index: 1, kind: input, shape index: {}]   ;;  %s1314_s2 = inlined_call_operand.vmem [shape: f32[1,128], index: 2, kind: input, shape index: {}]   ;;  %s1315_s3 = inlined_call_operand.vmem [shape: f32[1,128], index: 3, kind: input, shape index: {}]   ;;  %s1316_s4 = inlined_call_operand.vmem [shape: f32[2,256,128], index: 4, kind: output, shape index: {0}]   ;;  %s1317_s5 = inlined_call_operand.vmem [shape: f32[2,2,128], index: 5, kind: output, shape index: {1}]  }
   0x1 LB: > { %s847_s19 = sadd.s32 4294967295, %s981_s18   ;;  %p851_p0 = scmp.ge.s32.totalorder %s981_s18, 1  ;;  %s981_s18 = sphi %s1013_s18, %s16_s18  }
   0x2   : > { %p190_p1 = scmp.lt.s32.totalorder %s981_s18, 3 }
   0x4   : > { %p191_p2 = pnand %p851_p0, %p190_p1 }
   0x5   : > { %p222_p3 = scmp.lt.s32.totalorder (!%p191_p2), %s847_s19, 1 }
   0x6   : > { %194 = sbr.rel (%p191_p2) target bundleno = 321 (0x141), region = 36 }
   0xb   : > { %v967_v0 = vld [vmem:[%s1313_s1 + $0x38] sm:$0xff]   ;;  %v968_v1 = vld [vmem:[%s1313_s1 + $0x30] sm:$0xff]   ;;  %s1319_s19 = smov (!%p222_p3, %s847_s19), 1  ;;  %v969_v2 = vld [vmem:[%s1313_s1 + $0x28] sm:$0xff]   ;;  %vm758_vm0 = vcmask 1040384  }
   0xc   : > { %895 = vmatprep.subr.bf16.mxu0 %v967_v0  ;;  %943 = vmatprep.subr.bf16.mxu1 %v967_v0  ;;  %s869_s26 = sshll.u32 %s1319_s19, 8  ;;  %v970_v3 = vld [vmem:[%s1313_s1 + $0x20] sm:$0xff]   ;;  %v971_v17 = vld [vmem:[%s1313_s1 + $0x18] sm:$0xff]   ;;  %v972_v26 = vld [vmem:[%s1313_s1 + $0x10] sm:$0xff]   ;;  %s856_s24 = sshll.u32 %s1319_s19, 1 }
   0xd   : > { %896 = vmatpush3.bf16.msra.mxu0 %v967_v0  ;;  %951 = vmatpush3.bf16.msra.mxu1 %v967_v0  ;;  %s1038_s29 = scalar_lea.vmem %s1312_s0, %s869_s26  ;;  %v1048_v6 = vld [vmem:[%s1314_s2] ss:$0 sm:$0xff]  ;;  %v973_v35 = vld [vmem:[%s1313_s1 + $0x8] sm:$0xff]   ;;  %s1187_s23 = scalar_lea.vmem %s1316_s4, %s869_s26 }
   0xe   : > { %897 = vmatprep.subr.bf16.mxu0 %v968_v1  ;;  %944 = vmatprep.subr.bf16.mxu1 %v968_v1  ;;  %v237_v4 = vld [vmem:[%s1038_s29] sm:$0xff]  ;;  %v238_v5 = vld [vmem:[%s1038_s29 + $0x8] sm:$0xff]  ;;  %v239_v10 = vld [vmem:[%s1038_s29 + $0x10] sm:$0xff]  ;;  %s235_s27 = scalar_lea.vmem %s1317_s5, %s856_s24 }
   0xf   : > { %v276_v7 = vmul.f32 %v1048_v6, %v237_v4  ;;  %v277_v8 = vmul.f32 %v1048_v6, %v238_v5  ;;  %v1055_v9 = vld [vmem:[%s1315_s3] ss:$0 sm:$0xff]  ;;  %v240_v11 = vld [vmem:[%s1038_s29 + $0x18] sm:$0xff]  ;;  %v278_v12 = vmul.f32 %v1048_v6, %v239_v10  ;;  %v242_v20 = vld [vmem:[%s1038_s29 + $0x28] sm:$0xff] }
  0x10   : > { %v279_v15 = vmul.f32 %v1048_v6, %v240_v11  ;;  %v241_v16 = vld [vmem:[%s1038_s29 + $0x20] sm:$0xff]  ;;  %v243_v25 = vld [vmem:[%s1038_s29 + $0x30] sm:$0xff]  ;;  %v281_v27 = vmul.f32 %v1048_v6, %v242_v20  ;;  %v244_v28 = vld [vmem:[%s1038_s29 + $0x38] sm:$0xff] }
  0x11   : > { %898 = vmatpush3.bf16.msra.mxu0 %v968_v1  ;;  %952 = vmatpush3.bf16.msra.mxu1 %v968_v1  ;;  %v315_v13 = vadd.f32 %v1055_v9, %v276_v7  ;;  %v316_v14 = vadd.f32 %v1055_v9, %v277_v8  ;;  %v280_v21 = vmul.f32 %v1048_v6, %v241_v16  ;;  %v245_v30 = vld [vmem:[%s1038_s29 + $0x40] sm:$0xff]  ;;  %v246_v37 = vld [vmem:[%s1038_s29 + $0x48] sm:$0xff]  ;;  %v255_v41 = vld [vmem:[%s1038_s29 + $0x90] sm:$0xff] }
  0x12   : > { %899 = vmatprep.subr.bf16.mxu0 %v969_v2  ;;  %945 = vmatprep.subr.bf16.mxu1 %v969_v2  ;;  %v317_v23 = vadd.f32 %v1055_v9, %v278_v12  ;;  %v318_v24 = vadd.f32 %v1055_v9, %v279_v15  ;;  %v282_v29 = vmul.f32 %v1048_v6, %v243_v25  ;;  %v253_v34 = vld [vmem:[%s1038_s29 + $0x80] sm:$0xff]  ;;  %v254_v38 = vld [vmem:[%s1038_s29 + $0x88] sm:$0xff]  ;;  %v256_v42 = vld [vmem:[%s1038_s29 + $0x98] sm:$0xff] }
  0x13   : > { %v347_v18 = vmax.f32 %v315_v13, 0.0  ;;  %v348_v19 = vmax.f32 %v316_v14, 0.0  ;;  %v1080_v33 = vadd.f32 %v1055_v9, %v280_v21  ;;  %v1087_v36 = vadd.f32 %v1055_v9, %v281_v27  ;;  %v257_v45 = vld [vmem:[%s1038_s29 + $0xa0] sm:$0xff]  ;;  %v258_v50 = vld [vmem:[%s1038_s29 + $0xa8] sm:$0xff]  ;;  %v259_v56 = vld [vmem:[%s1038_s29 + $0xb0] sm:$0xff] }
  0x14   : > { %v349_v31 = vmax.f32 %v317_v23, 0.0  ;;  %v350_v32 = vmax.f32 %v318_v24, 0.0  ;;  %v283_v39 = vmul.f32 %v1048_v6, %v244_v28  ;;  %v284_v40 = vmul.f32 %v1048_v6, %v245_v30  ;;  %v974_v51 = vld [vmem:[%s1313_s1] sm:$0xff]   ;;  %v260_v61 = vld [vmem:[%s1038_s29 + $0xb8] sm:$0xff]  ;;  %v262_v8 = vld [vmem:[%s1038_s29 + $0xc8] sm:$0xff] }
  0x15   : > { %900 = vmatpush3.bf16.msra.mxu0 %v969_v2  ;;  %953 = vmatpush3.bf16.msra.mxu1 %v969_v2  ;;  %v379_v22 = vpack.c.bf16 %v348_v19, %v347_v18  ;;  %v1096_v43 = vadd.f32 %v1055_v9, %v282_v29  ;;  %v292_v44 = vmul.f32 %v1048_v6, %v253_v34  ;;  %v351_v47 = vmax.f32 %v1080_v33, 0.0  ;;  %v261_v2 = vld [vmem:[%s1038_s29 + $0xc0] sm:$0xff]  ;;  %v247_v10 = vld [vmem:[%s1038_s29 + $0x50] sm:$0xff]  ;;  %v248_v15 = vld [vmem:[%s1038_s29 + $0x58] sm:$0xff] }
  0x16   : > { %901 = vmatprep.subr.bf16.mxu0 %v970_v3  ;;  %946 = vmatprep.subr.bf16.mxu1 %v970_v3  ;;  %v1100_v46 = vpack.c.bf16 %v350_v32, %v349_v31  ;;  %v285_v48 = vmul.f32 %v1048_v6, %v246_v37  ;;  %v293_v49 = vmul.f32 %v1048_v6, %v254_v38  ;;  %v352_v52 = vmax.f32 %v1087_v36, 0.0  ;;  %v249_v20 = vld [vmem:[%s1038_s29 + $0x60] sm:$0xff]  ;;  %v250_v21 = vld [vmem:[%s1038_s29 + $0x68] sm:$0xff]  ;;  %v263_v30 = vld [vmem:[%s1038_s29 + $0xd0] sm:$0xff] }
  0x17   : > { %911 = vmatprep.mubr.bf16.mxu0 %v379_v22  ;;  %v331_v53 = vadd.f32 %v1055_v9, %v292_v44  ;;  %v294_v54 = vmul.f32 %v1048_v6, %v255_v41  ;;  %v295_v55 = vmul.f32 %v1048_v6, %v256_v42  ;;  %v1115_v57 = vadd.f32 %v1055_v9, %v283_v39  ;;  %v264_v31 = vld [vmem:[%s1038_s29 + $0xd8] sm:$0xff]  ;;  %v265_v36 = vld [vmem:[%s1038_s29 + $0xe0] sm:$0xff]  ;;  %v266_v37 = vld [vmem:[%s1038_s29 + $0xe8] sm:$0xff] }
  0x18   : > { %v1118_v58 = vadd.f32 %v1055_v9, %v284_v40  ;;  %v332_v59 = vadd.f32 %v1055_v9, %v293_v49  ;;  %v296_v60 = vmul.f32 %v1048_v6, %v257_v45  ;;  %v297_v1 = vmul.f32 %v1048_v6, %v258_v50 }
  0x19   : > { %902 = vmatpush3.bf16.msra.mxu0 %v970_v3  ;;  %954 = vmatpush3.bf16.msra.mxu1 %v970_v3  ;;  %v363_v62 = vmax.f32 %v331_v53, 0.0  ;;  %v333_v63 = vadd.f32 %v1055_v9, %v294_v54  ;;  %v334_v0 = vadd.f32 %v1055_v9, %v295_v55  ;;  %v1128_v3 = vadd.f32 %v1055_v9, %v285_v48  ;;  %v251_v55 = vld [vmem:[%s1038_s29 + $0x70] sm:$0xff] }
  0x1a   : > { %903 = vmatprep.subr.bf16.mxu0 %v971_v17  ;;  %947 = vmatprep.subr.bf16.mxu1 %v971_v17  ;;  %v364_v4 = vmax.f32 %v332_v59, 0.0  ;;  %v335_v5 = vadd.f32 %v1055_v9, %v296_v60  ;;  %v298_v7 = vmul.f32 %v1048_v6, %v259_v56  ;;  %v336_v13 = vadd.f32 %v1055_v9, %v297_v1  ;;  %v252_v56 = vld [vmem:[%s1038_s29 + $0x78] sm:$0xff] }
  0x1b   : > { %v365_v11 = vmax.f32 %v333_v63, 0.0  ;;  %v366_v12 = vmax.f32 %v334_v0, 0.0  ;;  %v299_v14 = vmul.f32 %v1048_v6, %v260_v61  ;;  %v300_v19 = vmul.f32 %v1048_v6, %v261_v2  ;;  %v267_v0 = vld [vmem:[%s1038_s29 + $0xf0] sm:$0xff]  ;;  %v268_v1 = vld [vmem:[%s1038_s29 + $0xf8] sm:$0xff] }
  0x1c   : > { %v387_v16 = vpack.c.bf16 %v364_v4, %v363_v62  ;;  %v337_v18 = vadd.f32 %v1055_v9, %v298_v7  ;;  %v368_v23 = vmax.f32 %v336_v13, 0.0  ;;  %v301_v25 = vmul.f32 %v1048_v6, %v262_v8 }
  0x1d   : > { %904 = vmatpush3.bf16.msra.mxu0 %v971_v17  ;;  %955 = vmatpush3.bf16.msra.mxu1 %v971_v17  ;;  %v367_v17 = vmax.f32 %v335_v5, 0.0  ;;  %v388_v22 = vpack.c.bf16 %v366_v12, %v365_v11  ;;  %v338_v24 = vadd.f32 %v1055_v9, %v299_v14  ;;  %v353_v27 = vmax.f32 %v1096_v43, 0.0 }
  0x1e   : > { %905 = vmatprep.subr.bf16.mxu0 %v972_v26  ;;  %948 = vmatprep.subr.bf16.mxu1 %v972_v26  ;;  %v286_v28 = vmul.f32 %v1048_v6, %v247_v10  ;;  %v339_v29 = vadd.f32 %v1055_v9, %v300_v19  ;;  %v354_v32 = vmax.f32 %v1115_v57, 0.0  ;;  %v287_v33 = vmul.f32 %v1048_v6, %v248_v15 }
  0x1f   : > { %927 = vmatprep.mubr.bf16.mxu1 %v387_v16  ;;  %v389_v34 = vpack.c.bf16 %v368_v23, %v367_v17  ;;  %v355_v38 = vmax.f32 %v1118_v58, 0.0  ;;  %v356_v39 = vmax.f32 %v1128_v3, 0.0  ;;  %v288_v40 = vmul.f32 %v1048_v6, %v249_v20 }
  0x20   : > { %v289_v41 = vmul.f32 %v1048_v6, %v250_v21  ;;  %v369_v42 = vmax.f32 %v337_v18, 0.0  ;;  %v370_v43 = vmax.f32 %v338_v24, 0.0  ;;  %v302_v44 = vmul.f32 %v1048_v6, %v263_v30 }
  0x21   : > { %906 = vmatpush3.bf16.msra.mxu0 %v972_v26  ;;  %956 = vmatpush3.bf16.msra.mxu1 %v972_v26  ;;  %v381_v26 = vpack.c.bf16 %v352_v52, %v351_v47  ;;  %v303_v45 = vmul.f32 %v1048_v6, %v264_v31  ;;  %v371_v47 = vmax.f32 %v339_v29, 0.0  ;;  %v304_v49 = vmul.f32 %v1048_v6, %v265_v36 }
  0x22   : > { %907 = vmatprep.subr.bf16.mxu0 %v973_v35  ;;  %949 = vmatprep.subr.bf16.mxu1 %v973_v35  ;;  %v305_v50 = vmul.f32 %v1048_v6, %v266_v37  ;;  %v326_v52 = vadd.f32 %v1055_v9, %v287_v33  ;;  %v327_v53 = vadd.f32 %v1055_v9, %v288_v40 }
  0x23   : > { %v328_v54 = vadd.f32 %v1055_v9, %v289_v41  ;;  %v390_v57 = vpack.c.bf16 %v370_v43, %v369_v42  ;;  %v341_v58 = vadd.f32 %v1055_v9, %v302_v44  ;;  %v342_v59 = vadd.f32 %v1055_v9, %v303_v45 }
  0x24   : > { %v383_v60 = vpack.c.bf16 %v356_v39, %v355_v38  ;;  %v343_v62 = vadd.f32 %v1055_v9, %v304_v49  ;;  %v344_v63 = vadd.f32 %v1055_v9, %v305_v50  ;;  %v358_v3 = vmax.f32 %v326_v52, 0.0 }
  0x25   : > { %908 = vmatpush3.bf16.msra.mxu0 %v973_v35  ;;  %957 = vmatpush3.bf16.msra.mxu1 %v973_v35  ;;  %v340_v35 = vadd.f32 %v1055_v9, %v301_v25  ;;  %v290_v4 = vmul.f32 %v1048_v6, %v251_v55  ;;  %v291_v5 = vmul.f32 %v1048_v6, %v252_v56  ;;  %v373_v7 = vmax.f32 %v341_v58, 0.0 }
  0x26   : > { %909 = vmatprep.subr.bf16.mxu0 %v974_v51  ;;  %950 = vmatprep.subr.bf16.mxu1 %v974_v51  ;;  %v374_v8 = vmax.f32 %v342_v59, 0.0  ;;  %v306_v10 = vmul.f32 %v1048_v6, %v267_v0  ;;  %v307_v11 = vmul.f32 %v1048_v6, %v268_v1  ;;  %v359_v12 = vmax.f32 %v327_v53, 0.0 }
  0x27   : > { %v372_v48 = vmax.f32 %v340_v35, 0.0  ;;  %v360_v13 = vmax.f32 %v328_v54, 0.0  ;;  %v375_v14 = vmax.f32 %v343_v62, 0.0  ;;  %v376_v15 = vmax.f32 %v344_v63, 0.0 }
  0x28   : > { %v329_v17 = vadd.f32 %v1055_v9, %v290_v4  ;;  %v330_v18 = vadd.f32 %v1055_v9, %v291_v5  ;;  %v392_v19 = vpack.c.bf16 %v374_v8, %v373_v7  ;;  %v345_v20 = vadd.f32 %v1055_v9, %v306_v10 }
  0x29   : > { %910 = vmatpush3.bf16.msra.mxu0 %v974_v51  ;;  %958 = vmatpush3.bf16.msra.mxu1 %v974_v51  ;;  %v325_v51 = vadd.f32 %v1055_v9, %v286_v28  ;;  %v391_v61 = vpack.c.bf16 %v372_v48, %v371_v47  ;;  %v346_v21 = vadd.f32 %v1055_v9, %v307_v11 }
  0x2a   : > { %v393_v23 = vpack.c.bf16 %v376_v15, %v375_v14  ;;  %v361_v6 = vmax.f32 %v329_v17, 0.0  ;;  %v362_v24 = vmax.f32 %v330_v18, 0.0  ;;  %v377_v25 = vmax.f32 %v345_v20, 0.0 }
  0x2b   : > { %v357_v2 = vmax.f32 %v325_v51, 0.0 }
  0x2c   : > { %912 = vmatmul.mubr.bf16.vlgmr.msra.gmra.mxu0 %v1100_v46  ;;  %928 = vmatmul.mubr.bf16.vlgmr.msra.gmra.mxu1 %v388_v22  ;;  %v382_v46 = vpack.c.bf16 %v354_v32, %v353_v27  ;;  %v385_v22 = vpack.c.bf16 %v360_v13, %v359_v12  ;;  %v386_v27 = vpack.c.bf16 %v362_v24, %v361_v6 }
  0x2d   : > { %915 = vmatprep.mubr.bf16.mxu0 %v381_v26  ;;  %931 = vmatprep.mubr.bf16.mxu1 %v389_v34  ;;  %v384_v16 = vpack.c.bf16 %v358_v3, %v357_v2  ;;  %v378_v26 = vmax.f32 %v346_v21, 0.0 }
  0x2f   : > { %v394_v28 = vpack.c.bf16 %v378_v26, %v377_v25 }
  0x34   : > { %916 = vmatmul.mubr.bf16.gmra.mxu0 %v382_v46  ;;  %932 = vmatmul.mubr.bf16.gmra.mxu1 %v390_v57 }
  0x35   : > { %919 = vmatprep.mubr.bf16.mxu0 %v383_v60  ;;  %935 = vmatprep.mubr.bf16.mxu1 %v391_v61 }
  0x3c   : > { %920 = vmatmul.mubr.bf16.gmra.mxu0 %v384_v16  ;;  %936 = vmatmul.mubr.bf16.gmra.mxu1 %v392_v19 }
  0x3d   : > { %923 = vmatprep.mubr.bf16.mxu0 %v385_v22  ;;  %939 = vmatprep.mubr.bf16.mxu1 %v393_v23 }
  0x44   : > { %924 = vmatmul.mubr.bf16.gmra.mxu0 %v386_v27  ;;  %940 = vmatmul.mubr.bf16.gmra.mxu1 %v394_v28 }
  0xec   : > { %v913_v9 = vpop.f32.mrf.mxu0  ;;  %v1189_v29 = vpop.f32.mrf.mxu1 }
  0xed   : > { %622 = vst [vmem:[%s1187_s23 + $0x10] sm:$0xff] %v913_v9  ;;  %638 = vst [vmem:[%s1187_s23 + $0x90] sm:$0xff] %v1189_v29  ;;  %v691_v41 = vmul.f32 %v913_v9, %v913_v9 }
  0xee   : > { %v493_v30 = vpop.f32.mrf.mxu0  ;;  %v1194_v31 = vpop.f32.mrf.mxu1 }
  0xef   : > { %620 = vst [vmem:[%s1187_s23] sm:$0xff] %v493_v30  ;;  %636 = vst [vmem:[%s1187_s23 + $0x80] sm:$0xff] %v1194_v31  ;;  %v689_v36 = vmul.f32 %v493_v30, %v493_v30 }
  0xf0   : > { %v914_v32 = vpop.f32.mrf.mxu0  ;;  %v1199_v33 = vpop.f32.mrf.mxu1 }
  0xf1   : > { %623 = vst [vmem:[%s1187_s23 + $0x18] sm:$0xff] %v914_v32  ;;  %639 = vst [vmem:[%s1187_s23 + $0x98] sm:$0xff] %v1199_v33  ;;  %v692_v47 = vmul.f32 %v914_v32, %v914_v32 }
  0xf2   : > { %v496_v34 = vpop.f32.mrf.mxu0  ;;  %v1204_v35 = vpop.f32.mrf.mxu1 }
  0xf3   : > { %621 = vst [vmem:[%s1187_s23 + $0x8] sm:$0xff] %v496_v34  ;;  %v652_v37 = vadd.f32 %v496_v34, %v493_v30  ;;  %v690_v38 = vmul.f32 %v496_v34, %v496_v34  ;;  %637 = vst [vmem:[%s1187_s23 + $0x88] sm:$0xff] %v1204_v35 }
  0xf4   : > { %v917_v39 = vpop.f32.mrf.mxu0  ;;  %v1209_v40 = vpop.f32.mrf.mxu1 }
  0xf5   : > { %v653_v42 = vadd.f32 %v913_v9, %v652_v37  ;;  %v721_v43 = vadd.f32 %v690_v38, %v689_v36  ;;  %626 = vst [vmem:[%s1187_s23 + $0x30] sm:$0xff] %v917_v39  ;;  %642 = vst [vmem:[%s1187_s23 + $0xb0] sm:$0xff] %v1209_v40  ;;  %v695_v61 = vmul.f32 %v917_v39, %v917_v39 }
  0xf6   : > { %v509_v44 = vpop.f32.mrf.mxu0  ;;  %v1214_v45 = vpop.f32.mrf.mxu1 }
  0xf7   : > { %v722_v48 = vadd.f32 %v721_v43, %v691_v41  ;;  %624 = vst [vmem:[%s1187_s23 + $0x20] sm:$0xff] %v509_v44  ;;  %v654_v49 = vadd.f32 %v914_v32, %v653_v42  ;;  %640 = vst [vmem:[%s1187_s23 + $0xa0] sm:$0xff] %v1214_v45  ;;  %v693_v52 = vmul.f32 %v509_v44, %v509_v44 }
  0xf8   : > { %v918_v50 = vpop.f32.mrf.mxu0  ;;  %v1219_v46 = vpop.f32.mrf.mxu1 }
  0xf9   : > { %v655_v51 = vadd.f32 %v654_v49, %v509_v44  ;;  %v723_v53 = vadd.f32 %v722_v48, %v692_v47  ;;  %627 = vst [vmem:[%s1187_s23 + $0x38] sm:$0xff] %v918_v50  ;;  %643 = vst [vmem:[%s1187_s23 + $0xb8] sm:$0xff] %v1219_v46  ;;  %v696_v2 = vmul.f32 %v918_v50, %v918_v50 }
  0xfa   : > { %v512_v54 = vpop.f32.mrf.mxu0  ;;  %v1224_v55 = vpop.f32.mrf.mxu1  ;;  %v705_v48 = vmul.f32 %v1194_v31, %v1194_v31 }
  0xfb   : > { %v724_v56 = vadd.f32 %v723_v53, %v693_v52  ;;  %625 = vst [vmem:[%s1187_s23 + $0x28] sm:$0xff] %v512_v54  ;;  %v656_v57 = vadd.f32 %v655_v51, %v512_v54  ;;  %v694_v58 = vmul.f32 %v512_v54, %v512_v54  ;;  %641 = vst [vmem:[%s1187_s23 + $0xa8] sm:$0xff] %v1224_v55 }
  0xfc   : > { %v921_v59 = vpop.f32.mrf.mxu0  ;;  %v1229_v60 = vpop.f32.mrf.mxu1  ;;  %v706_v52 = vmul.f32 %v1204_v35, %v1204_v35  ;;  %v707_v54 = vmul.f32 %v1189_v29, %v1189_v29 }
  0xfd   : > { %v657_v62 = vadd.f32 %v917_v39, %v656_v57  ;;  %v725_v63 = vadd.f32 %v724_v56, %v694_v58  ;;  %630 = vst [vmem:[%s1187_s23 + $0x50] sm:$0xff] %v921_v59  ;;  %646 = vst [vmem:[%s1187_s23 + $0xd0] sm:$0xff] %v1229_v60  ;;  %v699_v19 = vmul.f32 %v921_v59, %v921_v59 }
  0xfe   : > { %v525_v0 = vpop.f32.mrf.mxu0  ;;  %v1234_v1 = vpop.f32.mrf.mxu1  ;;  %v708_v58 = vmul.f32 %v1199_v33, %v1199_v33 }
  0xff   : > { %v726_v3 = vadd.f32 %v725_v63, %v695_v61  ;;  %628 = vst [vmem:[%s1187_s23 + $0x40] sm:$0xff] %v525_v0  ;;  %v658_v4 = vadd.f32 %v918_v50, %v657_v62  ;;  %644 = vst [vmem:[%s1187_s23 + $0xc0] sm:$0xff] %v1234_v1  ;;  %v697_v10 = vmul.f32 %v525_v0, %v525_v0 }
 0x100   : > { %v922_v5 = vpop.f32.mrf.mxu0  ;;  %v1239_v7 = vpop.f32.mrf.mxu1  ;;  %v709_v62 = vmul.f32 %v1214_v45, %v1214_v45 }
 0x101   : > { %v659_v8 = vadd.f32 %v658_v4, %v525_v0  ;;  %v727_v11 = vadd.f32 %v726_v3, %v696_v2  ;;  %631 = vst [vmem:[%s1187_s23 + $0x58] sm:$0xff] %v922_v5  ;;  %647 = vst [vmem:[%s1187_s23 + $0xd8] sm:$0xff] %v1239_v7  ;;  %v700_v6 = vmul.f32 %v922_v5, %v922_v5 }
 0x102   : > { %v528_v12 = vpop.f32.mrf.mxu0  ;;  %v1244_v13 = vpop.f32.mrf.mxu1  ;;  %v710_v2 = vmul.f32 %v1224_v55, %v1224_v55 }
 0x103   : > { %v728_v14 = vadd.f32 %v727_v11, %v697_v10  ;;  %629 = vst [vmem:[%s1187_s23 + $0x48] sm:$0xff] %v528_v12  ;;  %v660_v15 = vadd.f32 %v659_v8, %v528_v12  ;;  %v698_v16 = vmul.f32 %v528_v12, %v528_v12  ;;  %645 = vst [vmem:[%s1187_s23 + $0xc8] sm:$0xff] %v1244_v13 }
 0x104   : > { %v925_v17 = vpop.f32.mrf.mxu0  ;;  %v1249_v18 = vpop.f32.mrf.mxu1  ;;  %v713_v10 = vmul.f32 %v1234_v1, %v1234_v1 }
 0x105   : > { %v661_v20 = vadd.f32 %v921_v59, %v660_v15  ;;  %v729_v21 = vadd.f32 %v728_v14, %v698_v16  ;;  %634 = vst [vmem:[%s1187_s23 + $0x70] sm:$0xff] %v925_v17  ;;  %650 = vst [vmem:[%s1187_s23 + $0xf0] sm:$0xff] %v1249_v18  ;;  %v703_v39 = vmul.f32 %v925_v17, %v925_v17 }
 0x106   : > { %v541_v22 = vpop.f32.mrf.mxu0  ;;  %v605_v23 = vpop.f32.mrf.mxu1  ;;  %v714_v14 = vmul.f32 %v1244_v13, %v1244_v13 }
 0x107   : > { %v730_v24 = vadd.f32 %v729_v21, %v699_v19  ;;  %632 = vst [vmem:[%s1187_s23 + $0x60] sm:$0xff] %v541_v22  ;;  %v662_v25 = vadd.f32 %v922_v5, %v661_v20  ;;  %648 = vst [vmem:[%s1187_s23 + $0xe0] sm:$0xff] %v605_v23  ;;  %v701_v9 = vmul.f32 %v541_v22, %v541_v22 }
 0x108   : > { %v926_v26 = vpop.f32.mrf.mxu0  ;;  %v1256_v27 = vpop.f32.mrf.mxu1  ;;  %v717_v20 = vmul.f32 %v605_v23, %v605_v23 }
 0x109   : > { %v663_v28 = vadd.f32 %v662_v25, %v541_v22  ;;  %v731_v30 = vadd.f32 %v730_v24, %v700_v6  ;;  %635 = vst [vmem:[%s1187_s23 + $0x78] sm:$0xff] %v926_v26  ;;  %651 = vst [vmem:[%s1187_s23 + $0xf8] sm:$0xff] %v1256_v27  ;;  %v704_v43 = vmul.f32 %v926_v26, %v926_v26 }
 0x10a   : > { %v544_v32 = vpop.f32.mrf.mxu0  ;;  %v608_v34 = vpop.f32.mrf.mxu1 }
 0x10b   : > { %v732_v36 = vadd.f32 %v731_v30, %v701_v9  ;;  %633 = vst [vmem:[%s1187_s23 + $0x68] sm:$0xff] %v544_v32  ;;  %v664_v37 = vadd.f32 %v663_v28, %v544_v32  ;;  %v702_v38 = vmul.f32 %v544_v32, %v544_v32  ;;  %649 = vst [vmem:[%s1187_s23 + $0xe8] sm:$0xff] %v608_v34 }
 0x10c   : > { %v718_v24 = vmul.f32 %v608_v34, %v608_v34 }
 0x10d   : > { %v665_v41 = vadd.f32 %v925_v17, %v664_v37  ;;  %v733_v42 = vadd.f32 %v732_v36, %v702_v38 }
 0x10f   : > { %v666_v44 = vadd.f32 %v926_v26, %v665_v41  ;;  %v734_v47 = vadd.f32 %v733_v42, %v703_v39  ;;  %v720_v26 = vmul.f32 %v1256_v27, %v1256_v27 }
 0x111   : > { %v735_v49 = vadd.f32 %v734_v47, %v704_v43  ;;  %v667_v50 = vadd.f32 %v666_v44, %v1194_v31 }
 0x113   : > { %v668_v51 = vadd.f32 %v667_v50, %v1204_v35  ;;  %v736_v53 = vadd.f32 %v735_v49, %v705_v48 }
 0x115   : > { %v669_v56 = vadd.f32 %v1189_v29, %v668_v51  ;;  %v737_v57 = vadd.f32 %v736_v53, %v706_v52  ;;  %v711_v29 = vmul.f32 %v1209_v40, %v1209_v40 }
 0x117   : > { %v738_v59 = vadd.f32 %v737_v57, %v707_v54  ;;  %v670_v61 = vadd.f32 %v1199_v33, %v669_v56  ;;  %v712_v33 = vmul.f32 %v1219_v46, %v1219_v46 }
 0x119   : > { %v671_v31 = vadd.f32 %v670_v61, %v1214_v45  ;;  %v739_v63 = vadd.f32 %v738_v59, %v708_v58 }
 0x11b   : > { %v740_v35 = vadd.f32 %v739_v63, %v709_v62  ;;  %v672_v0 = vadd.f32 %v671_v31, %v1224_v55 }
 0x11d   : > { %v673_v3 = vadd.f32 %v1209_v40, %v672_v0  ;;  %v741_v4 = vadd.f32 %v740_v35, %v710_v2  ;;  %v715_v40 = vmul.f32 %v1229_v60, %v1229_v60 }
 0x11f   : > { %v742_v5 = vadd.f32 %v741_v4, %v711_v29  ;;  %v674_v8 = vadd.f32 %v1219_v46, %v673_v3  ;;  %v716_v46 = vmul.f32 %v1239_v7, %v1239_v7 }
 0x121   : > { %v675_v45 = vadd.f32 %v674_v8, %v1234_v1  ;;  %v743_v11 = vadd.f32 %v742_v5, %v712_v33 }
 0x123   : > { %v744_v12 = vadd.f32 %v743_v11, %v713_v10  ;;  %v676_v55 = vadd.f32 %v675_v45, %v1244_v13  ;;  %v719_v13 = vmul.f32 %v1249_v18, %v1249_v18 }
 0x125   : > { %v677_v15 = vadd.f32 %v1229_v60, %v676_v55  ;;  %v745_v16 = vadd.f32 %v744_v12, %v714_v14 }
 0x127   : > { %v746_v17 = vadd.f32 %v745_v16, %v715_v40  ;;  %v678_v19 = vadd.f32 %v1239_v7, %v677_v15 }
 0x129   : > { %v679_v1 = vadd.f32 %v678_v19, %v605_v23  ;;  %v747_v21 = vadd.f32 %v746_v17, %v716_v46 }
 0x12b   : > { %v748_v22 = vadd.f32 %v747_v21, %v717_v20  ;;  %v680_v6 = vadd.f32 %v679_v1, %v608_v34 }
 0x12d   : > { %v681_v25 = vadd.f32 %v1249_v18, %v680_v6  ;;  %v749_v60 = vadd.f32 %v748_v22, %v718_v24 }
 0x12f   : > { %v682_v28 = vadd.f32 %v1256_v27, %v681_v25  ;;  %v750_v9 = vadd.f32 %v749_v60, %v719_v13 }
 0x131   : > { %v683_v7 = vrot.slane %v682_v28, 4  ;;  %v751_v30 = vadd.f32 %v750_v9, %v720_v26 }
 0x133   : > { %v684_v23 = vadd.f32 %v683_v7, %v682_v28  ;;  %v752_v32 = vrot.slane %v751_v30, 4 }
 0x135   : > { %v685_v36 = vrot.slane %v684_v23, 2  ;;  %v753_v37 = vadd.f32 %v752_v32, %v751_v30 }
 0x137   : > { %v686_v34 = vadd.f32 %v685_v36, %v684_v23  ;;  %v754_v38 = vrot.slane %v753_v37, 2 }
 0x139   : > { %v687_v39 = vrot.slane %v686_v34, 1  ;;  %v755_v41 = vadd.f32 %v754_v38, %v753_v37 }
 0x13b   : > { %v756_v42 = vrot.slane %v755_v41, 1  ;;  %v688_v18 = vadd.f32 %v687_v39, %v686_v34 }
 0x13d   : > { %v757_v27 = vadd.f32 %v756_v42, %v755_v41 }
 0x13f   : > { %v759_v43 = vsel %vm758_vm0, %v688_v18, %v757_v27 }
 0x140   : > { %760 = vst [vmem:[%s235_s27] sm:$0x3] %v759_v43 }
 0x141 PF: > { %s16_s18 = sadd.s32 1, %s981_s18  }
 0x142   : > { %p13_p4 = scmp.ge.s32.totalorder %s16_s18, 4  }
 0x144   :  { %15 = sbr.rel (!%p13_p4) target bundleno = 1 (0x1), region = 78 }

// kernel: bottleneck_block.7
= control target key start
LH: loop header
LB: loop body
LE: loop exit
PB: predicated region body
PF: predicated region fallthrough
CT: control target
= control target key end

     0   :  { %s726_s21 = smov 0   ;;  %s1001_s0 = inlined_call_operand.vmem [shape: f32[2,256,128], index: 0, kind: input, shape index: {}]   ;;  %s1002_s1 = inlined_call_operand.vmem [shape: f32[2,256,128], index: 1, kind: input, shape index: {}]   ;;  %s1003_s2 = inlined_call_operand.vmem [shape: f32[1,128], index: 2, kind: input, shape index: {}]   ;;  %s1004_s3 = inlined_call_operand.vmem [shape: f32[1,128], index: 3, kind: input, shape index: {}]   ;;  %s1005_s4 = inlined_call_operand.vmem [shape: f32[1,128], index: 4, kind: input, shape index: {}]   ;;  %s1006_s5 = inlined_call_operand.vmem [shape: f32[1,128], index: 5, kind: input, shape index: {}]   ;;  %s1007_s6 = inlined_call_operand.vmem [shape: f32[2,256,128], index: 6, kind: output, shape index: {}]  }
   0x1 LB: > { %s655_s22 = sadd.s32 4294967295, %s689_s21   ;;  %p659_p0 = scmp.ge.s32.totalorder %s689_s21, 1  ;;  %s689_s21 = sphi %s726_s21, %s16_s21  }
   0x2   : > { %p222_p1 = scmp.lt.s32.totalorder %s689_s21, 3 }
   0x4   : > { %p223_p2 = pnand %p659_p0, %p222_p1 }
   0x5   : > { %p257_p3 = scmp.lt.s32.totalorder (!%p223_p2), %s655_s22, 1 }
   0x6   : > { %226 = sbr.rel (%p223_p2) target bundleno = 69 (0x45), region = 44 }
   0xb   : > { %s1009_s22 = smov (!%p257_p3, %s655_s22), 1  ;;  %v739_v0 = vld [vmem:[%s1003_s2] ss:$0 sm:$0xff] }
   0xc   : > { %s734_s23 = sshll.u32 %s1009_s22, 8  ;;  %v744_v1 = vld [vmem:[%s1005_s4] ss:$0 sm:$0xff] }
   0xd   : > { %s750_s30 = scalar_lea.vmem %s1001_s0, %s734_s23  ;;  %s756_s9 = scalar_lea.vmem %s1002_s1, %s734_s23  ;;  %v761_v2 = vld [vmem:[%s1004_s3] ss:$0 sm:$0xff] }
   0xe   : > { %v766_v3 = vld [vmem:[%s1006_s5] ss:$0 sm:$0xff]  ;;  %v273_v6 = vld [vmem:[%s750_s30 + $0x8] sm:$0xff]  ;;  %v274_v11 = vld [vmem:[%s750_s30 + $0x10] sm:$0xff]  ;;  %s801_s16 = scalar_lea.vmem %s1007_s6, %s734_s23 }
   0xf   : > { %v272_v4 = vld [vmem:[%s750_s30] sm:$0xff]  ;;  %v312_v9 = vmul.f32 %v739_v0, %v273_v6  ;;  %v383_v10 = vld [vmem:[%s756_s9 + $0x8] sm:$0xff]  ;;  %v384_v12 = vld [vmem:[%s756_s9 + $0x10] sm:$0xff]  ;;  %v313_v14 = vmul.f32 %v739_v0, %v274_v11 }
  0x10   : > { %v382_v5 = vld [vmem:[%s756_s9] sm:$0xff]  ;;  %v311_v7 = vmul.f32 %v739_v0, %v272_v4  ;;  %v422_v13 = vmul.f32 %v744_v1, %v383_v10  ;;  %v423_v15 = vmul.f32 %v744_v1, %v384_v12  ;;  %v275_v16 = vld [vmem:[%s750_s30 + $0x18] sm:$0xff]  ;;  %v277_v24 = vld [vmem:[%s750_s30 + $0x28] sm:$0xff] }
  0x11   : > { %v421_v8 = vmul.f32 %v744_v1, %v382_v5  ;;  %v385_v17 = vld [vmem:[%s756_s9 + $0x18] sm:$0xff]  ;;  %v276_v18 = vld [vmem:[%s750_s30 + $0x20] sm:$0xff]  ;;  %v351_v21 = vadd.f32 %v761_v2, %v312_v9  ;;  %v314_v22 = vmul.f32 %v739_v0, %v275_v16  ;;  %v352_v26 = vadd.f32 %v761_v2, %v313_v14  ;;  %v387_v29 = vld [vmem:[%s756_s9 + $0x28] sm:$0xff] }
  0x12   : > { %v350_v19 = vadd.f32 %v761_v2, %v311_v7  ;;  %v386_v23 = vld [vmem:[%s756_s9 + $0x20] sm:$0xff]  ;;  %v461_v25 = vadd.f32 %v766_v3, %v422_v13  ;;  %v462_v27 = vadd.f32 %v766_v3, %v423_v15  ;;  %v424_v28 = vmul.f32 %v744_v1, %v385_v17  ;;  %v278_v38 = vld [vmem:[%s750_s30 + $0x30] sm:$0xff]  ;;  %v279_v44 = vld [vmem:[%s750_s30 + $0x38] sm:$0xff] }
  0x13   : > { %v460_v20 = vadd.f32 %v766_v3, %v421_v8  ;;  %v353_v31 = vadd.f32 %v761_v2, %v314_v22  ;;  %v315_v32 = vmul.f32 %v739_v0, %v276_v18  ;;  %v425_v33 = vmul.f32 %v744_v1, %v386_v23  ;;  %v388_v39 = vld [vmem:[%s756_s9 + $0x30] sm:$0xff]  ;;  %v389_v45 = vld [vmem:[%s756_s9 + $0x38] sm:$0xff]  ;;  %v280_v46 = vld [vmem:[%s750_s30 + $0x40] sm:$0xff] }
  0x14   : > { %v493_v34 = vadd.f32 %v461_v25, %v351_v21  ;;  %v494_v35 = vadd.f32 %v462_v27, %v352_v26  ;;  %v463_v36 = vadd.f32 %v766_v3, %v424_v28  ;;  %v316_v37 = vmul.f32 %v739_v0, %v277_v24  ;;  %v390_v55 = vld [vmem:[%s756_s9 + $0x40] sm:$0xff]  ;;  %v281_v60 = vld [vmem:[%s750_s30 + $0x48] sm:$0xff]  ;;  %v282_v6 = vld [vmem:[%s750_s30 + $0x50] sm:$0xff] }
  0x15   : > { %v492_v30 = vadd.f32 %v460_v20, %v350_v19  ;;  %v354_v41 = vadd.f32 %v761_v2, %v315_v32  ;;  %v464_v42 = vadd.f32 %v766_v3, %v425_v33  ;;  %v426_v43 = vmul.f32 %v744_v1, %v387_v29  ;;  %v391_v61 = vld [vmem:[%s756_s9 + $0x48] sm:$0xff]  ;;  %v392_v7 = vld [vmem:[%s756_s9 + $0x50] sm:$0xff]  ;;  %v283_v12 = vld [vmem:[%s750_s30 + $0x58] sm:$0xff] }
  0x16   : > { %v525_v47 = vmax.f32 %v493_v34, 0.0  ;;  %v526_v48 = vmax.f32 %v494_v35, 0.0  ;;  %v495_v49 = vadd.f32 %v463_v36, %v353_v31  ;;  %v355_v50 = vadd.f32 %v761_v2, %v316_v37  ;;  %v393_v21 = vld [vmem:[%s756_s9 + $0x58] sm:$0xff]  ;;  %v284_v22 = vld [vmem:[%s750_s30 + $0x60] sm:$0xff]  ;;  %v285_v28 = vld [vmem:[%s750_s30 + $0x68] sm:$0xff] }
  0x17   : > { %v524_v40 = vmax.f32 %v492_v30, 0.0  ;;  %v496_v51 = vadd.f32 %v464_v42, %v354_v41  ;;  %v465_v52 = vadd.f32 %v766_v3, %v426_v43  ;;  %v317_v53 = vmul.f32 %v739_v0, %v278_v38  ;;  %v394_v27 = vld [vmem:[%s756_s9 + $0x60] sm:$0xff]  ;;  %v395_v33 = vld [vmem:[%s756_s9 + $0x68] sm:$0xff]  ;;  %v286_v38 = vld [vmem:[%s750_s30 + $0x70] sm:$0xff] }
  0x18   : > { %v427_v54 = vmul.f32 %v744_v1, %v388_v39  ;;  %557 = vst [vmem:[%s801_s16 + $0x8] sm:$0xff] %v525_v47  ;;  %558 = vst [vmem:[%s801_s16 + $0x10] sm:$0xff] %v526_v48  ;;  %v527_v56 = vmax.f32 %v495_v49, 0.0  ;;  %v318_v57 = vmul.f32 %v739_v0, %v279_v44  ;;  %v428_v58 = vmul.f32 %v744_v1, %v389_v45  ;;  %v396_v43 = vld [vmem:[%s756_s9 + $0x70] sm:$0xff]  ;;  %v287_v44 = vld [vmem:[%s750_s30 + $0x78] sm:$0xff] }
  0x19   : > { %556 = vst [vmem:[%s801_s16] sm:$0xff] %v524_v40  ;;  %v319_v59 = vmul.f32 %v739_v0, %v280_v46  ;;  %v528_v62 = vmax.f32 %v496_v51, 0.0  ;;  %v497_v63 = vadd.f32 %v465_v52, %v355_v50  ;;  %v356_v4 = vadd.f32 %v761_v2, %v317_v53  ;;  %v397_v49 = vld [vmem:[%s756_s9 + $0x78] sm:$0xff]  ;;  %v288_v50 = vld [vmem:[%s750_s30 + $0x80] sm:$0xff] }
  0x1a   : > { %v466_v5 = vadd.f32 %v766_v3, %v427_v54  ;;  %559 = vst [vmem:[%s801_s16 + $0x18] sm:$0xff] %v527_v56  ;;  %v357_v8 = vadd.f32 %v761_v2, %v318_v57  ;;  %v467_v9 = vadd.f32 %v766_v3, %v428_v58  ;;  %v429_v11 = vmul.f32 %v744_v1, %v390_v55 }
  0x1b   : > { %v358_v10 = vadd.f32 %v761_v2, %v319_v59  ;;  %560 = vst [vmem:[%s801_s16 + $0x20] sm:$0xff] %v528_v62  ;;  %v529_v13 = vmax.f32 %v497_v63, 0.0  ;;  %v320_v15 = vmul.f32 %v739_v0, %v281_v60  ;;  %v430_v16 = vmul.f32 %v744_v1, %v391_v61  ;;  %v398_v59 = vld [vmem:[%s756_s9 + $0x80] sm:$0xff] }
  0x1c   : > { %v498_v14 = vadd.f32 %v466_v5, %v356_v4  ;;  %v499_v17 = vadd.f32 %v467_v9, %v357_v8  ;;  %v468_v18 = vadd.f32 %v766_v3, %v429_v11  ;;  %v321_v19 = vmul.f32 %v739_v0, %v282_v6  ;;  %v289_v4 = vld [vmem:[%s750_s30 + $0x88] sm:$0xff]  ;;  %v400_v11 = vld [vmem:[%s756_s9 + $0x90] sm:$0xff] }
  0x1d   : > { %v431_v20 = vmul.f32 %v744_v1, %v392_v7  ;;  %561 = vst [vmem:[%s801_s16 + $0x28] sm:$0xff] %v529_v13  ;;  %v359_v24 = vadd.f32 %v761_v2, %v320_v15  ;;  %v469_v25 = vadd.f32 %v766_v3, %v430_v16  ;;  %v322_v26 = vmul.f32 %v739_v0, %v283_v12  ;;  %v399_v5 = vld [vmem:[%s756_s9 + $0x88] sm:$0xff]  ;;  %v291_v16 = vld [vmem:[%s750_s30 + $0x98] sm:$0xff] }
  0x1e   : > { %v530_v23 = vmax.f32 %v498_v14, 0.0  ;;  %v531_v29 = vmax.f32 %v499_v17, 0.0  ;;  %v500_v30 = vadd.f32 %v468_v18, %v358_v10  ;;  %v360_v31 = vadd.f32 %v761_v2, %v321_v19  ;;  %v290_v10 = vld [vmem:[%s750_s30 + $0x90] sm:$0xff] }
  0x1f   : > { %v470_v32 = vadd.f32 %v766_v3, %v431_v20  ;;  %v501_v34 = vadd.f32 %v469_v25, %v359_v24  ;;  %v361_v35 = vadd.f32 %v761_v2, %v322_v26  ;;  %v432_v36 = vmul.f32 %v744_v1, %v393_v21  ;;  %v401_v25 = vld [vmem:[%s756_s9 + $0x98] sm:$0xff]  ;;  %v292_v26 = vld [vmem:[%s750_s30 + $0xa0] sm:$0xff] }
  0x20   : > { %562 = vst [vmem:[%s801_s16 + $0x30] sm:$0xff] %v530_v23  ;;  %v323_v37 = vmul.f32 %v739_v0, %v284_v22  ;;  %563 = vst [vmem:[%s801_s16 + $0x38] sm:$0xff] %v531_v29  ;;  %v532_v39 = vmax.f32 %v500_v30, 0.0  ;;  %v433_v41 = vmul.f32 %v744_v1, %v394_v27  ;;  %v324_v42 = vmul.f32 %v739_v0, %v285_v28 }
  0x21   : > { %v502_v40 = vadd.f32 %v470_v32, %v360_v31  ;;  %v533_v45 = vmax.f32 %v501_v34, 0.0  ;;  %v471_v46 = vadd.f32 %v766_v3, %v432_v36  ;;  %v434_v48 = vmul.f32 %v744_v1, %v395_v33  ;;  %v402_v31 = vld [vmem:[%s756_s9 + $0xa0] sm:$0xff]  ;;  %v293_v32 = vld [vmem:[%s750_s30 + $0xa8] sm:$0xff] }
  0x22   : > { %v362_v47 = vadd.f32 %v761_v2, %v323_v37  ;;  %564 = vst [vmem:[%s801_s16 + $0x40] sm:$0xff] %v532_v39  ;;  %v472_v52 = vadd.f32 %v766_v3, %v433_v41  ;;  %v363_v53 = vadd.f32 %v761_v2, %v324_v42  ;;  %v325_v54 = vmul.f32 %v739_v0, %v286_v38  ;;  %v403_v37 = vld [vmem:[%s756_s9 + $0xa8] sm:$0xff]  ;;  %v294_v42 = vld [vmem:[%s750_s30 + $0xb0] sm:$0xff] }
  0x23   : > { %v534_v51 = vmax.f32 %v502_v40, 0.0  ;;  %565 = vst [vmem:[%s801_s16 + $0x48] sm:$0xff] %v533_v45  ;;  %v503_v55 = vadd.f32 %v471_v46, %v361_v35  ;;  %v473_v56 = vadd.f32 %v766_v3, %v434_v48  ;;  %v435_v57 = vmul.f32 %v744_v1, %v396_v43  ;;  %v295_v48 = vld [vmem:[%s750_s30 + $0xb8] sm:$0xff] }
  0x24   : > { %v326_v58 = vmul.f32 %v739_v0, %v287_v44  ;;  %v504_v60 = vadd.f32 %v472_v52, %v362_v47  ;;  %v364_v61 = vadd.f32 %v761_v2, %v325_v54  ;;  %v436_v62 = vmul.f32 %v744_v1, %v397_v49  ;;  %v404_v47 = vld [vmem:[%s756_s9 + $0xb0] sm:$0xff]  ;;  %v296_v54 = vld [vmem:[%s750_s30 + $0xc0] sm:$0xff] }
  0x25   : > { %566 = vst [vmem:[%s801_s16 + $0x50] sm:$0xff] %v534_v51  ;;  %v327_v63 = vmul.f32 %v739_v0, %v288_v50  ;;  %v535_v6 = vmax.f32 %v503_v55, 0.0  ;;  %v505_v7 = vadd.f32 %v473_v56, %v363_v53  ;;  %v474_v8 = vadd.f32 %v766_v3, %v435_v57  ;;  %v405_v53 = vld [vmem:[%s756_s9 + $0xb8] sm:$0xff] }
  0x26   : > { %v365_v9 = vadd.f32 %v761_v2, %v326_v58  ;;  %v536_v12 = vmax.f32 %v504_v60, 0.0  ;;  %v475_v13 = vadd.f32 %v766_v3, %v436_v62  ;;  %v437_v15 = vmul.f32 %v744_v1, %v398_v59 }
  0x27   : > { %v366_v14 = vadd.f32 %v761_v2, %v327_v63  ;;  %567 = vst [vmem:[%s801_s16 + $0x58] sm:$0xff] %v535_v6  ;;  %v537_v17 = vmax.f32 %v505_v7, 0.0  ;;  %v506_v18 = vadd.f32 %v474_v8, %v364_v61  ;;  %v328_v19 = vmul.f32 %v739_v0, %v289_v4  ;;  %v406_v63 = vld [vmem:[%s756_s9 + $0xc0] sm:$0xff]  ;;  %v297_v8 = vld [vmem:[%s750_s30 + $0xc8] sm:$0xff] }
  0x28   : > { %v438_v20 = vmul.f32 %v744_v1, %v399_v5  ;;  %568 = vst [vmem:[%s801_s16 + $0x60] sm:$0xff] %v536_v12  ;;  %v507_v21 = vadd.f32 %v475_v13, %v365_v9  ;;  %v476_v22 = vadd.f32 %v766_v3, %v437_v15  ;;  %v329_v23 = vmul.f32 %v739_v0, %v290_v10  ;;  %v407_v9 = vld [vmem:[%s756_s9 + $0xc8] sm:$0xff]  ;;  %v408_v15 = vld [vmem:[%s756_s9 + $0xd0] sm:$0xff] }
  0x29   : > { %v439_v24 = vmul.f32 %v744_v1, %v400_v11  ;;  %569 = vst [vmem:[%s801_s16 + $0x68] sm:$0xff] %v537_v17  ;;  %v538_v27 = vmax.f32 %v506_v18, 0.0  ;;  %v367_v28 = vadd.f32 %v761_v2, %v328_v19  ;;  %v330_v30 = vmul.f32 %v739_v0, %v291_v16 }
  0x2a   : > { %v477_v29 = vadd.f32 %v766_v3, %v438_v20  ;;  %v539_v33 = vmax.f32 %v507_v21, 0.0  ;;  %v508_v34 = vadd.f32 %v476_v22, %v366_v14  ;;  %v368_v35 = vadd.f32 %v761_v2, %v329_v23  ;;  %v298_v14 = vld [vmem:[%s750_s30 + $0xd0] sm:$0xff]  ;;  %v299_v20 = vld [vmem:[%s750_s30 + $0xd8] sm:$0xff] }
  0x2b   : > { %v478_v36 = vadd.f32 %v766_v3, %v439_v24  ;;  %570 = vst [vmem:[%s801_s16 + $0x70] sm:$0xff] %v538_v27  ;;  %v369_v39 = vadd.f32 %v761_v2, %v330_v30  ;;  %v440_v40 = vmul.f32 %v744_v1, %v401_v25  ;;  %v331_v41 = vmul.f32 %v739_v0, %v292_v26  ;;  %v300_v30 = vld [vmem:[%s750_s30 + $0xe0] sm:$0xff] }
  0x2c   : > { %v509_v38 = vadd.f32 %v477_v29, %v367_v28  ;;  %571 = vst [vmem:[%s801_s16 + $0x78] sm:$0xff] %v539_v33  ;;  %v540_v43 = vmax.f32 %v508_v34, 0.0  ;;  %v441_v45 = vmul.f32 %v744_v1, %v402_v31  ;;  %v332_v46 = vmul.f32 %v739_v0, %v293_v32  ;;  %v409_v29 = vld [vmem:[%s756_s9 + $0xd8] sm:$0xff] }
  0x2d   : > { %v510_v44 = vadd.f32 %v478_v36, %v368_v35  ;;  %v479_v50 = vadd.f32 %v766_v3, %v440_v40  ;;  %v370_v51 = vadd.f32 %v761_v2, %v331_v41  ;;  %v442_v52 = vmul.f32 %v744_v1, %v403_v37  ;;  %v410_v35 = vld [vmem:[%s756_s9 + $0xe0] sm:$0xff]  ;;  %v301_v36 = vld [vmem:[%s750_s30 + $0xe8] sm:$0xff] }
  0x2e   : > { %v541_v49 = vmax.f32 %v509_v38, 0.0  ;;  %572 = vst [vmem:[%s801_s16 + $0x80] sm:$0xff] %v540_v43  ;;  %v480_v56 = vadd.f32 %v766_v3, %v441_v45  ;;  %v371_v57 = vadd.f32 %v761_v2, %v332_v46  ;;  %v333_v58 = vmul.f32 %v739_v0, %v294_v42  ;;  %v411_v41 = vld [vmem:[%s756_s9 + $0xe8] sm:$0xff]  ;;  %v302_v46 = vld [vmem:[%s750_s30 + $0xf0] sm:$0xff] }
  0x2f   : > { %v542_v55 = vmax.f32 %v510_v44, 0.0  ;;  %v511_v59 = vadd.f32 %v479_v50, %v369_v39  ;;  %v481_v60 = vadd.f32 %v766_v3, %v442_v52  ;;  %v443_v61 = vmul.f32 %v744_v1, %v404_v47  ;;  %v303_v52 = vld [vmem:[%s750_s30 + $0xf8] sm:$0xff] }
  0x30   : > { %573 = vst [vmem:[%s801_s16 + $0x88] sm:$0xff] %v541_v49  ;;  %v334_v62 = vmul.f32 %v739_v0, %v295_v48  ;;  %v512_v4 = vadd.f32 %v480_v56, %v370_v51  ;;  %v372_v5 = vadd.f32 %v761_v2, %v333_v58  ;;  %v444_v6 = vmul.f32 %v744_v1, %v405_v53  ;;  %v412_v51 = vld [vmem:[%s756_s9 + $0xf0] sm:$0xff] }
  0x31   : > { %574 = vst [vmem:[%s801_s16 + $0x90] sm:$0xff] %v542_v55  ;;  %v335_v7 = vmul.f32 %v739_v0, %v296_v54  ;;  %v543_v10 = vmax.f32 %v511_v59, 0.0  ;;  %v513_v11 = vadd.f32 %v481_v60, %v371_v57  ;;  %v482_v12 = vadd.f32 %v766_v3, %v443_v61  ;;  %v413_v57 = vld [vmem:[%s756_s9 + $0xf8] sm:$0xff] }
  0x32   : > { %v373_v13 = vadd.f32 %v761_v2, %v334_v62  ;;  %v544_v16 = vmax.f32 %v512_v4, 0.0  ;;  %v483_v17 = vadd.f32 %v766_v3, %v444_v6  ;;  %v445_v19 = vmul.f32 %v744_v1, %v406_v63 }
  0x33   : > { %v374_v18 = vadd.f32 %v761_v2, %v335_v7  ;;  %575 = vst [vmem:[%s801_s16 + $0x98] sm:$0xff] %v543_v10  ;;  %v545_v21 = vmax.f32 %v513_v11, 0.0  ;;  %v514_v22 = vadd.f32 %v482_v12, %v372_v5  ;;  %v336_v23 = vmul.f32 %v739_v0, %v297_v8 }
  0x34   : > { %v446_v24 = vmul.f32 %v744_v1, %v407_v9  ;;  %576 = vst [vmem:[%s801_s16 + $0xa0] sm:$0xff] %v544_v16  ;;  %v515_v25 = vadd.f32 %v483_v17, %v373_v13  ;;  %v484_v26 = vadd.f32 %v766_v3, %v445_v19  ;;  %v337_v27 = vmul.f32 %v739_v0, %v298_v14 }
  0x35   : > { %v447_v28 = vmul.f32 %v744_v1, %v408_v15  ;;  %577 = vst [vmem:[%s801_s16 + $0xa8] sm:$0xff] %v545_v21  ;;  %v546_v31 = vmax.f32 %v514_v22, 0.0  ;;  %v375_v32 = vadd.f32 %v761_v2, %v336_v23  ;;  %v338_v34 = vmul.f32 %v739_v0, %v299_v20 }
  0x36   : > { %v485_v33 = vadd.f32 %v766_v3, %v446_v24  ;;  %v547_v37 = vmax.f32 %v515_v25, 0.0  ;;  %v516_v38 = vadd.f32 %v484_v26, %v374_v18  ;;  %v376_v39 = vadd.f32 %v761_v2, %v337_v27 }
  0x37   : > { %v486_v40 = vadd.f32 %v766_v3, %v447_v28  ;;  %578 = vst [vmem:[%s801_s16 + $0xb0] sm:$0xff] %v546_v31  ;;  %v377_v43 = vadd.f32 %v761_v2, %v338_v34  ;;  %v448_v44 = vmul.f32 %v744_v1, %v409_v29  ;;  %v339_v45 = vmul.f32 %v739_v0, %v300_v30 }
  0x38   : > { %v517_v42 = vadd.f32 %v485_v33, %v375_v32  ;;  %579 = vst [vmem:[%s801_s16 + $0xb8] sm:$0xff] %v547_v37  ;;  %v548_v47 = vmax.f32 %v516_v38, 0.0  ;;  %v449_v49 = vmul.f32 %v744_v1, %v410_v35  ;;  %v340_v50 = vmul.f32 %v739_v0, %v301_v36 }
  0x39   : > { %v518_v48 = vadd.f32 %v486_v40, %v376_v39  ;;  %v487_v54 = vadd.f32 %v766_v3, %v448_v44  ;;  %v378_v55 = vadd.f32 %v761_v2, %v339_v45  ;;  %v450_v56 = vmul.f32 %v744_v1, %v411_v41 }
  0x3a   : > { %v549_v53 = vmax.f32 %v517_v42, 0.0  ;;  %580 = vst [vmem:[%s801_s16 + $0xc0] sm:$0xff] %v548_v47  ;;  %v488_v59 = vadd.f32 %v766_v3, %v449_v49  ;;  %v379_v60 = vadd.f32 %v761_v2, %v340_v50  ;;  %v341_v61 = vmul.f32 %v739_v0, %v302_v46 }
  0x3b   : > { %v550_v58 = vmax.f32 %v518_v48, 0.0  ;;  %v519_v62 = vadd.f32 %v487_v54, %v377_v43  ;;  %v489_v63 = vadd.f32 %v766_v3, %v450_v56  ;;  %v451_v4 = vmul.f32 %v744_v1, %v412_v51 }
  0x3c   : > { %581 = vst [vmem:[%s801_s16 + $0xc8] sm:$0xff] %v549_v53  ;;  %v342_v5 = vmul.f32 %v739_v0, %v303_v52  ;;  %v520_v6 = vadd.f32 %v488_v59, %v378_v55  ;;  %v380_v7 = vadd.f32 %v761_v2, %v341_v61  ;;  %v452_v8 = vmul.f32 %v744_v1, %v413_v57 }
  0x3d   : > { %582 = vst [vmem:[%s801_s16 + $0xd0] sm:$0xff] %v550_v58  ;;  %v551_v9 = vmax.f32 %v519_v62, 0.0  ;;  %v521_v10 = vadd.f32 %v489_v63, %v379_v60  ;;  %v490_v11 = vadd.f32 %v766_v3, %v451_v4 }
  0x3e   : > { %v381_v12 = vadd.f32 %v761_v2, %v342_v5  ;;  %v552_v13 = vmax.f32 %v520_v6, 0.0  ;;  %v491_v14 = vadd.f32 %v766_v3, %v452_v8 }
  0x3f   : > { %583 = vst [vmem:[%s801_s16 + $0xd8] sm:$0xff] %v551_v9  ;;  %v553_v0 = vmax.f32 %v521_v10, 0.0  ;;  %v522_v15 = vadd.f32 %v490_v11, %v380_v7 }
  0x40   : > { %584 = vst [vmem:[%s801_s16 + $0xe0] sm:$0xff] %v552_v13  ;;  %v523_v16 = vadd.f32 %v491_v14, %v381_v12 }
  0x41   : > { %585 = vst [vmem:[%s801_s16 + $0xe8] sm:$0xff] %v553_v0  ;;  %v554_v17 = vmax.f32 %v522_v15, 0.0 }
  0x42   : > { %v555_v18 = vmax.f32 %v523_v16, 0.0 }
  0x43   : > { %586 = vst [vmem:[%s801_s16 + $0xf0] sm:$0xff] %v554_v17 }
  0x44   : > { %587 = vst [vmem:[%s801_s16 + $0xf8] sm:$0xff] %v555_v18 }
  0x45 PF: > { %s16_s21 = sadd.s32 1, %s689_s21  }
  0x46   : > { %p13_p4 = scmp.ge.s32.totalorder %s16_s21, 4  }
  0x48   :  { %15 = sbr.rel (!%p13_p4) target bundleno = 1 (0x1), region = 77 }

// kernel: bottleneck_block.4
= control target key start
LH: loop header
LB: loop body
LE: loop exit
PB: predicated region body
PF: predicated region fallthrough
CT: control target
= control target key end

     0   :  { %s1460_s21 = smov 0   ;;  %s1645_s0 = inlined_call_operand.vmem [shape: f32[2,256,128], index: 0, kind: input, shape index: {}]   ;;  %s1646_s1 = inlined_call_operand.vmem [shape: bf16[128,128], index: 1, kind: input, shape index: {}]   ;;  %s1647_s2 = inlined_call_operand.vmem [shape: bf16[128,128], index: 2, kind: input, shape index: {}]   ;;  %s1648_s3 = inlined_call_operand.vmem [shape: f32[2,256,128], index: 3, kind: output, shape index: {0}]   ;;  %s1649_s4 = inlined_call_operand.vmem [shape: f32[2,2,128], index: 4, kind: output, shape index: {1}]   ;;  %s1650_s5 = inlined_call_operand.vmem [shape: f32[2,256,128], index: 5, kind: output, shape index: {2}]   ;;  %s1651_s6 = inlined_call_operand.vmem [shape: f32[2,2,128], index: 6, kind: output, shape index: {3}]  }
   0x1 LB: > { %s1215_s22 = sadd.s32 4294967295, %s1423_s21   ;;  %p1219_p0 = scmp.ge.s32.totalorder %s1423_s21, 1  ;;  %s1423_s21 = sphi %s1460_s21, %s17_s21  }
   0x2   : > { %p219_p1 = scmp.lt.s32.totalorder %s1423_s21, 3 }
   0x4   : > { %p220_p2 = pnand %p1219_p0, %p219_p1 }
   0x5   : > { %p262_p3 = scmp.lt.s32.totalorder (!%p220_p2), %s1215_s22, 1 }
   0x6   : > { %223 = sbr.rel (%p220_p2) target bundleno = 322 (0x142), region = 32 }
   0xb   : > { %v1401_v0 = vld [vmem:[%s1646_s1 + $0x38] sm:$0xff]   ;;  %v1403_v2 = vld [vmem:[%s1646_s1 + $0x30] sm:$0xff]   ;;  %v1405_v4 = vld [vmem:[%s1646_s1 + $0x28] sm:$0xff]   ;;  %s1653_s22 = smov (!%p262_p3, %s1215_s22), 1  ;;  %vm697_vm0 = vcmask 1040384  }
   0xc   : > { %v1402_v1 = vld [vmem:[%s1647_s2 + $0x38] sm:$0xff]   ;;  %1297 = vmatprep.subr.bf16.mxu0 %v1401_v0  ;;  %v1404_v3 = vld [vmem:[%s1647_s2 + $0x30] sm:$0xff]   ;;  %v1406_v5 = vld [vmem:[%s1647_s2 + $0x28] sm:$0xff]   ;;  %s1495_s15 = sshll.u32 %s1653_s22, 8 }
   0xd   : > { %1345 = vmatprep.subr.bf16.mxu1 %v1402_v1  ;;  %1298 = vmatpush3.bf16.msra.mxu0 %v1401_v0  ;;  %v1407_v6 = vld [vmem:[%s1646_s1 + $0x20] sm:$0xff]   ;;  %v1409_v8 = vld [vmem:[%s1646_s1 + $0x18] sm:$0xff]   ;;  %s1507_s24 = scalar_lea.vmem %s1645_s0, %s1495_s15  ;;  %v1411_v10 = vld [vmem:[%s1646_s1 + $0x10] sm:$0xff]   ;;  %s1563_s16 = scalar_lea.vmem %s1648_s3, %s1495_s15 }
   0xe   : > { %1346 = vmatpush3.bf16.msra.mxu1 %v1402_v1  ;;  %1299 = vmatprep.subr.bf16.mxu0 %v1403_v2  ;;  %v1408_v7 = vld [vmem:[%s1647_s2 + $0x20] sm:$0xff]   ;;  %v1410_v9 = vld [vmem:[%s1647_s2 + $0x18] sm:$0xff]   ;;  %v287_v12 = vld [vmem:[%s1507_s24 + $0x8] sm:$0xff]  ;;  %s1569_s19 = scalar_lea.vmem %s1650_s5, %s1495_s15  ;;  %s1224_s15 = sshll.u32 %s1653_s22, 1 }
   0xf   : > { %1347 = vmatprep.subr.bf16.mxu1 %v1404_v3  ;;  %v286_v11 = vld [vmem:[%s1507_s24] sm:$0xff]  ;;  %v1412_v13 = vld [vmem:[%s1647_s2 + $0x10] sm:$0xff]   ;;  %v1413_v15 = vld [vmem:[%s1646_s1 + $0x8] sm:$0xff]   ;;  %s284_s27 = scalar_lea.vmem %s1651_s6, %s1224_s15 }
  0x10   : > { %v318_v14 = vpack.c.bf16 %v287_v12, %v286_v11  ;;  %v1414_v16 = vld [vmem:[%s1647_s2 + $0x8] sm:$0xff]   ;;  %v1415_v17 = vld [vmem:[%s1646_s1] sm:$0xff]   ;;  %v288_v19 = vld [vmem:[%s1507_s24 + $0x10] sm:$0xff] }
  0x11   : > { %1300 = vmatpush3.bf16.msra.mxu0 %v1403_v2  ;;  %v1416_v18 = vld [vmem:[%s1647_s2] sm:$0xff]   ;;  %v289_v20 = vld [vmem:[%s1507_s24 + $0x18] sm:$0xff]  ;;  %v291_v22 = vld [vmem:[%s1507_s24 + $0x28] sm:$0xff] }
  0x12   : > { %1348 = vmatpush3.bf16.msra.mxu1 %v1404_v3  ;;  %1301 = vmatprep.subr.bf16.mxu0 %v1405_v4  ;;  %v290_v21 = vld [vmem:[%s1507_s24 + $0x20] sm:$0xff]  ;;  %v319_v23 = vpack.c.bf16 %v289_v20, %v288_v19  ;;  %v292_v25 = vld [vmem:[%s1507_s24 + $0x30] sm:$0xff]  ;;  %v293_v26 = vld [vmem:[%s1507_s24 + $0x38] sm:$0xff] }
  0x13   : > { %1349 = vmatprep.subr.bf16.mxu1 %v1406_v5  ;;  %1313 = vmatprep.mubr.bf16.mxu0 %v318_v14  ;;  %v320_v24 = vpack.c.bf16 %v291_v22, %v290_v21  ;;  %v294_v27 = vld [vmem:[%s1507_s24 + $0x40] sm:$0xff]  ;;  %v295_v28 = vld [vmem:[%s1507_s24 + $0x48] sm:$0xff]  ;;  %v321_v29 = vpack.c.bf16 %v293_v26, %v292_v25  ;;  %v296_v31 = vld [vmem:[%s1507_s24 + $0x50] sm:$0xff] }
  0x14   : > { %1361 = vmatprep.mubr.bf16.mxu1 %v318_v14  ;;  %v322_v30 = vpack.c.bf16 %v295_v28, %v294_v27  ;;  %v297_v32 = vld [vmem:[%s1507_s24 + $0x58] sm:$0xff]  ;;  %v298_v33 = vld [vmem:[%s1507_s24 + $0x60] sm:$0xff]  ;;  %v299_v34 = vld [vmem:[%s1507_s24 + $0x68] sm:$0xff] }
  0x15   : > { %1302 = vmatpush3.bf16.msra.mxu0 %v1405_v4  ;;  %v323_v35 = vpack.c.bf16 %v297_v32, %v296_v31  ;;  %v324_v36 = vpack.c.bf16 %v299_v34, %v298_v33  ;;  %v300_v37 = vld [vmem:[%s1507_s24 + $0x70] sm:$0xff]  ;;  %v301_v38 = vld [vmem:[%s1507_s24 + $0x78] sm:$0xff]  ;;  %v302_v39 = vld [vmem:[%s1507_s24 + $0x80] sm:$0xff] }
  0x16   : > { %1350 = vmatpush3.bf16.msra.mxu1 %v1406_v5  ;;  %1303 = vmatprep.subr.bf16.mxu0 %v1407_v6  ;;  %v303_v40 = vld [vmem:[%s1507_s24 + $0x88] sm:$0xff]  ;;  %v325_v41 = vpack.c.bf16 %v301_v38, %v300_v37  ;;  %v304_v43 = vld [vmem:[%s1507_s24 + $0x90] sm:$0xff]  ;;  %v305_v44 = vld [vmem:[%s1507_s24 + $0x98] sm:$0xff] }
  0x17   : > { %1351 = vmatprep.subr.bf16.mxu1 %v1408_v7  ;;  %v326_v42 = vpack.c.bf16 %v303_v40, %v302_v39  ;;  %v306_v45 = vld [vmem:[%s1507_s24 + $0xa0] sm:$0xff]  ;;  %v307_v46 = vld [vmem:[%s1507_s24 + $0xa8] sm:$0xff]  ;;  %v327_v47 = vpack.c.bf16 %v305_v44, %v304_v43  ;;  %v308_v49 = vld [vmem:[%s1507_s24 + $0xb0] sm:$0xff] }
  0x18   : > { %v328_v48 = vpack.c.bf16 %v307_v46, %v306_v45  ;;  %v309_v50 = vld [vmem:[%s1507_s24 + $0xb8] sm:$0xff]  ;;  %v310_v51 = vld [vmem:[%s1507_s24 + $0xc0] sm:$0xff]  ;;  %v311_v52 = vld [vmem:[%s1507_s24 + $0xc8] sm:$0xff] }
  0x19   : > { %1304 = vmatpush3.bf16.msra.mxu0 %v1407_v6  ;;  %v329_v53 = vpack.c.bf16 %v309_v50, %v308_v49  ;;  %v330_v54 = vpack.c.bf16 %v311_v52, %v310_v51  ;;  %v312_v55 = vld [vmem:[%s1507_s24 + $0xd0] sm:$0xff]  ;;  %v313_v56 = vld [vmem:[%s1507_s24 + $0xd8] sm:$0xff]  ;;  %v314_v57 = vld [vmem:[%s1507_s24 + $0xe0] sm:$0xff] }
  0x1a   : > { %1352 = vmatpush3.bf16.msra.mxu1 %v1408_v7  ;;  %1305 = vmatprep.subr.bf16.mxu0 %v1409_v8  ;;  %v315_v58 = vld [vmem:[%s1507_s24 + $0xe8] sm:$0xff]  ;;  %v331_v59 = vpack.c.bf16 %v313_v56, %v312_v55  ;;  %v316_v61 = vld [vmem:[%s1507_s24 + $0xf0] sm:$0xff]  ;;  %v317_v62 = vld [vmem:[%s1507_s24 + $0xf8] sm:$0xff]  ;;  %s275_s24 = scalar_lea.vmem %s1649_s4, %s1224_s15 }
  0x1b   : > { %1353 = vmatprep.subr.bf16.mxu1 %v1410_v9  ;;  %v332_v60 = vpack.c.bf16 %v315_v58, %v314_v57  ;;  %v333_v63 = vpack.c.bf16 %v317_v62, %v316_v61 }
  0x1d   : > { %1306 = vmatpush3.bf16.msra.mxu0 %v1409_v8 }
  0x1e   : > { %1354 = vmatpush3.bf16.msra.mxu1 %v1410_v9  ;;  %1307 = vmatprep.subr.bf16.mxu0 %v1411_v10 }
  0x1f   : > { %1355 = vmatprep.subr.bf16.mxu1 %v1412_v13 }
  0x21   : > { %1308 = vmatpush3.bf16.msra.mxu0 %v1411_v10 }
  0x22   : > { %1356 = vmatpush3.bf16.msra.mxu1 %v1412_v13  ;;  %1309 = vmatprep.subr.bf16.mxu0 %v1413_v15 }
  0x23   : > { %1357 = vmatprep.subr.bf16.mxu1 %v1414_v16 }
  0x25   : > { %1310 = vmatpush3.bf16.msra.mxu0 %v1413_v15 }
  0x26   : > { %1358 = vmatpush3.bf16.msra.mxu1 %v1414_v16  ;;  %1311 = vmatprep.subr.bf16.mxu0 %v1415_v17 }
  0x27   : > { %1359 = vmatprep.subr.bf16.mxu1 %v1416_v18 }
  0x29   : > { %1312 = vmatpush3.bf16.msra.mxu0 %v1415_v17 }
  0x2a   : > { %1360 = vmatpush3.bf16.msra.mxu1 %v1416_v18 }
  0x2c   : > { %1314 = vmatmul.mubr.bf16.vlgmr.msra.gmra.mxu0 %v319_v23 }
  0x2d   : > { %1362 = vmatmul.mubr.bf16.vlgmr.msra.gmra.mxu1 %v319_v23  ;;  %1317 = vmatprep.mubr.bf16.mxu0 %v320_v24 }
  0x2e   : > { %1365 = vmatprep.mubr.bf16.mxu1 %v320_v24 }
  0x34   : > { %1318 = vmatmul.mubr.bf16.gmra.mxu0 %v321_v29 }
  0x35   : > { %1366 = vmatmul.mubr.bf16.gmra.mxu1 %v321_v29  ;;  %1321 = vmatprep.mubr.bf16.mxu0 %v322_v30 }
  0x36   : > { %1369 = vmatprep.mubr.bf16.mxu1 %v322_v30 }
  0x3c   : > { %1322 = vmatmul.mubr.bf16.gmra.mxu0 %v323_v35 }
  0x3d   : > { %1370 = vmatmul.mubr.bf16.gmra.mxu1 %v323_v35  ;;  %1325 = vmatprep.mubr.bf16.mxu0 %v324_v36 }
  0x3e   : > { %1373 = vmatprep.mubr.bf16.mxu1 %v324_v36 }
  0x44   : > { %1326 = vmatmul.mubr.bf16.gmra.mxu0 %v325_v41 }
  0x45   : > { %1374 = vmatmul.mubr.bf16.gmra.mxu1 %v325_v41  ;;  %1329 = vmatprep.mubr.bf16.mxu0 %v326_v42 }
  0x46   : > { %1377 = vmatprep.mubr.bf16.mxu1 %v326_v42 }
  0x4c   : > { %1330 = vmatmul.mubr.bf16.gmra.mxu0 %v327_v47 }
  0x4d   : > { %1378 = vmatmul.mubr.bf16.gmra.mxu1 %v327_v47  ;;  %1333 = vmatprep.mubr.bf16.mxu0 %v328_v48 }
  0x4e   : > { %1381 = vmatprep.mubr.bf16.mxu1 %v328_v48 }
  0x54   : > { %1334 = vmatmul.mubr.bf16.gmra.mxu0 %v329_v53 }
  0x55   : > { %1382 = vmatmul.mubr.bf16.gmra.mxu1 %v329_v53  ;;  %1337 = vmatprep.mubr.bf16.mxu0 %v330_v54 }
  0x56   : > { %1385 = vmatprep.mubr.bf16.mxu1 %v330_v54 }
  0x5c   : > { %1338 = vmatmul.mubr.bf16.gmra.mxu0 %v331_v59 }
  0x5d   : > { %1386 = vmatmul.mubr.bf16.gmra.mxu1 %v331_v59  ;;  %1341 = vmatprep.mubr.bf16.mxu0 %v332_v60 }
  0x5e   : > { %1389 = vmatprep.mubr.bf16.mxu1 %v332_v60 }
  0x64   : > { %1342 = vmatmul.mubr.bf16.gmra.mxu0 %v333_v63 }
  0x65   : > { %1390 = vmatmul.mubr.bf16.gmra.mxu1 %v333_v63 }
  0xec   : > { %v1315_v0 = vpop.f32.mrf.mxu0 }
  0xed   : > { %561 = vst [vmem:[%s1563_s16 + $0x10] sm:$0xff] %v1315_v0  ;;  %v1363_v1 = vpop.f32.mrf.mxu1  ;;  %v630_v15 = vmul.f32 %v1315_v0, %v1315_v0 }
  0xee   : > { %927 = vst [vmem:[%s1569_s19 + $0x10] sm:$0xff] %v1363_v1  ;;  %v432_v2 = vpop.f32.mrf.mxu0  ;;  %v996_v19 = vmul.f32 %v1363_v1, %v1363_v1 }
  0xef   : > { %559 = vst [vmem:[%s1563_s16] sm:$0xff] %v432_v2  ;;  %v798_v3 = vpop.f32.mrf.mxu1  ;;  %v628_v7 = vmul.f32 %v432_v2, %v432_v2 }
  0xf0   : > { %925 = vst [vmem:[%s1569_s19] sm:$0xff] %v798_v3  ;;  %v1316_v4 = vpop.f32.mrf.mxu0  ;;  %v994_v11 = vmul.f32 %v798_v3, %v798_v3 }
  0xf1   : > { %562 = vst [vmem:[%s1563_s16 + $0x18] sm:$0xff] %v1316_v4  ;;  %v1364_v5 = vpop.f32.mrf.mxu1  ;;  %v631_v23 = vmul.f32 %v1316_v4, %v1316_v4 }
  0xf2   : > { %928 = vst [vmem:[%s1569_s19 + $0x18] sm:$0xff] %v1364_v5  ;;  %v435_v6 = vpop.f32.mrf.mxu0  ;;  %v997_v27 = vmul.f32 %v1364_v5, %v1364_v5 }
  0xf3   : > { %560 = vst [vmem:[%s1563_s16 + $0x8] sm:$0xff] %v435_v6  ;;  %v591_v8 = vadd.f32 %v435_v6, %v432_v2  ;;  %v629_v9 = vmul.f32 %v435_v6, %v435_v6  ;;  %v801_v10 = vpop.f32.mrf.mxu1 }
  0xf4   : > { %926 = vst [vmem:[%s1569_s19 + $0x8] sm:$0xff] %v801_v10  ;;  %v957_v12 = vadd.f32 %v801_v10, %v798_v3  ;;  %v995_v13 = vmul.f32 %v801_v10, %v801_v10  ;;  %v1319_v14 = vpop.f32.mrf.mxu0 }
  0xf5   : > { %v592_v16 = vadd.f32 %v1315_v0, %v591_v8  ;;  %v660_v17 = vadd.f32 %v629_v9, %v628_v7  ;;  %565 = vst [vmem:[%s1563_s16 + $0x30] sm:$0xff] %v1319_v14  ;;  %v1367_v18 = vpop.f32.mrf.mxu1  ;;  %v634_v47 = vmul.f32 %v1319_v14, %v1319_v14 }
  0xf6   : > { %v958_v20 = vadd.f32 %v1363_v1, %v957_v12  ;;  %v1026_v21 = vadd.f32 %v995_v13, %v994_v11  ;;  %931 = vst [vmem:[%s1569_s19 + $0x30] sm:$0xff] %v1367_v18  ;;  %v448_v22 = vpop.f32.mrf.mxu0  ;;  %v1000_v51 = vmul.f32 %v1367_v18, %v1367_v18 }
  0xf7   : > { %v661_v24 = vadd.f32 %v660_v17, %v630_v15  ;;  %563 = vst [vmem:[%s1563_s16 + $0x20] sm:$0xff] %v448_v22  ;;  %v593_v25 = vadd.f32 %v1316_v4, %v592_v16  ;;  %v814_v26 = vpop.f32.mrf.mxu1  ;;  %v632_v32 = vmul.f32 %v448_v22, %v448_v22 }
  0xf8   : > { %v1027_v28 = vadd.f32 %v1026_v21, %v996_v19  ;;  %929 = vst [vmem:[%s1569_s19 + $0x20] sm:$0xff] %v814_v26  ;;  %v959_v29 = vadd.f32 %v1364_v5, %v958_v20  ;;  %v1320_v30 = vpop.f32.mrf.mxu0  ;;  %v998_v36 = vmul.f32 %v814_v26, %v814_v26 }
  0xf9   : > { %v594_v31 = vadd.f32 %v593_v25, %v448_v22  ;;  %v662_v33 = vadd.f32 %v661_v24, %v631_v23  ;;  %566 = vst [vmem:[%s1563_s16 + $0x38] sm:$0xff] %v1320_v30  ;;  %v1368_v34 = vpop.f32.mrf.mxu1  ;;  %v635_v55 = vmul.f32 %v1320_v30, %v1320_v30 }
  0xfa   : > { %v960_v35 = vadd.f32 %v959_v29, %v814_v26  ;;  %v1028_v37 = vadd.f32 %v1027_v28, %v997_v27  ;;  %932 = vst [vmem:[%s1569_s19 + $0x38] sm:$0xff] %v1368_v34  ;;  %v451_v38 = vpop.f32.mrf.mxu0  ;;  %v1001_v59 = vmul.f32 %v1368_v34, %v1368_v34 }
  0xfb   : > { %v663_v39 = vadd.f32 %v662_v33, %v632_v32  ;;  %564 = vst [vmem:[%s1563_s16 + $0x28] sm:$0xff] %v451_v38  ;;  %v595_v40 = vadd.f32 %v594_v31, %v451_v38  ;;  %v633_v41 = vmul.f32 %v451_v38, %v451_v38  ;;  %v817_v42 = vpop.f32.mrf.mxu1 }
  0xfc   : > { %v1029_v43 = vadd.f32 %v1028_v37, %v998_v36  ;;  %930 = vst [vmem:[%s1569_s19 + $0x28] sm:$0xff] %v817_v42  ;;  %v961_v44 = vadd.f32 %v960_v35, %v817_v42  ;;  %v999_v45 = vmul.f32 %v817_v42, %v817_v42  ;;  %v1323_v46 = vpop.f32.mrf.mxu0 }
  0xfd   : > { %v596_v48 = vadd.f32 %v1319_v14, %v595_v40  ;;  %v664_v49 = vadd.f32 %v663_v39, %v633_v41  ;;  %569 = vst [vmem:[%s1563_s16 + $0x50] sm:$0xff] %v1323_v46  ;;  %v1371_v50 = vpop.f32.mrf.mxu1  ;;  %v638_v15 = vmul.f32 %v1323_v46, %v1323_v46 }
  0xfe   : > { %v962_v52 = vadd.f32 %v1367_v18, %v961_v44  ;;  %v1030_v53 = vadd.f32 %v1029_v43, %v999_v45  ;;  %935 = vst [vmem:[%s1569_s19 + $0x50] sm:$0xff] %v1371_v50  ;;  %v464_v54 = vpop.f32.mrf.mxu0  ;;  %v1004_v19 = vmul.f32 %v1371_v50, %v1371_v50 }
  0xff   : > { %v665_v56 = vadd.f32 %v664_v49, %v634_v47  ;;  %567 = vst [vmem:[%s1563_s16 + $0x40] sm:$0xff] %v464_v54  ;;  %v597_v57 = vadd.f32 %v1320_v30, %v596_v48  ;;  %v830_v58 = vpop.f32.mrf.mxu1  ;;  %v636_v0 = vmul.f32 %v464_v54, %v464_v54 }
 0x100   : > { %v1031_v60 = vadd.f32 %v1030_v53, %v1000_v51  ;;  %933 = vst [vmem:[%s1569_s19 + $0x40] sm:$0xff] %v830_v58  ;;  %v963_v61 = vadd.f32 %v1368_v34, %v962_v52  ;;  %v1324_v62 = vpop.f32.mrf.mxu0  ;;  %v1002_v4 = vmul.f32 %v830_v58, %v830_v58 }
 0x101   : > { %v598_v63 = vadd.f32 %v597_v57, %v464_v54  ;;  %v666_v1 = vadd.f32 %v665_v56, %v635_v55  ;;  %570 = vst [vmem:[%s1563_s16 + $0x58] sm:$0xff] %v1324_v62  ;;  %v1372_v2 = vpop.f32.mrf.mxu1  ;;  %v639_v23 = vmul.f32 %v1324_v62, %v1324_v62 }
 0x102   : > { %v964_v3 = vadd.f32 %v963_v61, %v830_v58  ;;  %v1032_v5 = vadd.f32 %v1031_v60, %v1001_v59  ;;  %936 = vst [vmem:[%s1569_s19 + $0x58] sm:$0xff] %v1372_v2  ;;  %v467_v6 = vpop.f32.mrf.mxu0  ;;  %v1005_v27 = vmul.f32 %v1372_v2, %v1372_v2 }
 0x103   : > { %v667_v7 = vadd.f32 %v666_v1, %v636_v0  ;;  %568 = vst [vmem:[%s1563_s16 + $0x48] sm:$0xff] %v467_v6  ;;  %v599_v8 = vadd.f32 %v598_v63, %v467_v6  ;;  %v637_v9 = vmul.f32 %v467_v6, %v467_v6  ;;  %v833_v10 = vpop.f32.mrf.mxu1 }
 0x104   : > { %v1033_v11 = vadd.f32 %v1032_v5, %v1002_v4  ;;  %934 = vst [vmem:[%s1569_s19 + $0x48] sm:$0xff] %v833_v10  ;;  %v965_v12 = vadd.f32 %v964_v3, %v833_v10  ;;  %v1003_v13 = vmul.f32 %v833_v10, %v833_v10  ;;  %v1327_v14 = vpop.f32.mrf.mxu0 }
 0x105   : > { %v600_v16 = vadd.f32 %v1323_v46, %v599_v8  ;;  %v668_v17 = vadd.f32 %v667_v7, %v637_v9  ;;  %573 = vst [vmem:[%s1563_s16 + $0x70] sm:$0xff] %v1327_v14  ;;  %v1375_v18 = vpop.f32.mrf.mxu1  ;;  %v642_v47 = vmul.f32 %v1327_v14, %v1327_v14 }
 0x106   : > { %v966_v20 = vadd.f32 %v1371_v50, %v965_v12  ;;  %v1034_v21 = vadd.f32 %v1033_v11, %v1003_v13  ;;  %939 = vst [vmem:[%s1569_s19 + $0x70] sm:$0xff] %v1375_v18  ;;  %v480_v22 = vpop.f32.mrf.mxu0  ;;  %v1008_v51 = vmul.f32 %v1375_v18, %v1375_v18 }
 0x107   : > { %v669_v24 = vadd.f32 %v668_v17, %v638_v15  ;;  %571 = vst [vmem:[%s1563_s16 + $0x60] sm:$0xff] %v480_v22  ;;  %v601_v25 = vadd.f32 %v1324_v62, %v600_v16  ;;  %v846_v26 = vpop.f32.mrf.mxu1  ;;  %v640_v32 = vmul.f32 %v480_v22, %v480_v22 }
 0x108   : > { %v1035_v28 = vadd.f32 %v1034_v21, %v1004_v19  ;;  %937 = vst [vmem:[%s1569_s19 + $0x60] sm:$0xff] %v846_v26  ;;  %v967_v29 = vadd.f32 %v1372_v2, %v966_v20  ;;  %v1328_v30 = vpop.f32.mrf.mxu0  ;;  %v1006_v36 = vmul.f32 %v846_v26, %v846_v26 }
 0x109   : > { %v602_v31 = vadd.f32 %v601_v25, %v480_v22  ;;  %v670_v33 = vadd.f32 %v669_v24, %v639_v23  ;;  %574 = vst [vmem:[%s1563_s16 + $0x78] sm:$0xff] %v1328_v30  ;;  %v1376_v34 = vpop.f32.mrf.mxu1  ;;  %v643_v55 = vmul.f32 %v1328_v30, %v1328_v30 }
 0x10a   : > { %v968_v35 = vadd.f32 %v967_v29, %v846_v26  ;;  %v1036_v37 = vadd.f32 %v1035_v28, %v1005_v27  ;;  %940 = vst [vmem:[%s1569_s19 + $0x78] sm:$0xff] %v1376_v34  ;;  %v483_v38 = vpop.f32.mrf.mxu0  ;;  %v1009_v59 = vmul.f32 %v1376_v34, %v1376_v34 }
 0x10b   : > { %v671_v39 = vadd.f32 %v670_v33, %v640_v32  ;;  %572 = vst [vmem:[%s1563_s16 + $0x68] sm:$0xff] %v483_v38  ;;  %v603_v40 = vadd.f32 %v602_v31, %v483_v38  ;;  %v641_v41 = vmul.f32 %v483_v38, %v483_v38  ;;  %v849_v42 = vpop.f32.mrf.mxu1 }
 0x10c   : > { %v1037_v43 = vadd.f32 %v1036_v37, %v1006_v36  ;;  %938 = vst [vmem:[%s1569_s19 + $0x68] sm:$0xff] %v849_v42  ;;  %v969_v44 = vadd.f32 %v968_v35, %v849_v42  ;;  %v1007_v45 = vmul.f32 %v849_v42, %v849_v42  ;;  %v1331_v46 = vpop.f32.mrf.mxu0 }
 0x10d   : > { %v604_v48 = vadd.f32 %v1327_v14, %v603_v40  ;;  %v672_v49 = vadd.f32 %v671_v39, %v641_v41  ;;  %577 = vst [vmem:[%s1563_s16 + $0x90] sm:$0xff] %v1331_v46  ;;  %v1379_v50 = vpop.f32.mrf.mxu1  ;;  %v646_v15 = vmul.f32 %v1331_v46, %v1331_v46 }
 0x10e   : > { %v970_v52 = vadd.f32 %v1375_v18, %v969_v44  ;;  %v1038_v53 = vadd.f32 %v1037_v43, %v1007_v45  ;;  %943 = vst [vmem:[%s1569_s19 + $0x90] sm:$0xff] %v1379_v50  ;;  %v496_v54 = vpop.f32.mrf.mxu0  ;;  %v1012_v19 = vmul.f32 %v1379_v50, %v1379_v50 }
 0x10f   : > { %v673_v56 = vadd.f32 %v672_v49, %v642_v47  ;;  %575 = vst [vmem:[%s1563_s16 + $0x80] sm:$0xff] %v496_v54  ;;  %v605_v57 = vadd.f32 %v1328_v30, %v604_v48  ;;  %v862_v58 = vpop.f32.mrf.mxu1  ;;  %v644_v0 = vmul.f32 %v496_v54, %v496_v54 }
 0x110   : > { %v1039_v60 = vadd.f32 %v1038_v53, %v1008_v51  ;;  %941 = vst [vmem:[%s1569_s19 + $0x80] sm:$0xff] %v862_v58  ;;  %v971_v61 = vadd.f32 %v1376_v34, %v970_v52  ;;  %v1332_v62 = vpop.f32.mrf.mxu0  ;;  %v1010_v4 = vmul.f32 %v862_v58, %v862_v58 }
 0x111   : > { %v606_v63 = vadd.f32 %v605_v57, %v496_v54  ;;  %v674_v1 = vadd.f32 %v673_v56, %v643_v55  ;;  %578 = vst [vmem:[%s1563_s16 + $0x98] sm:$0xff] %v1332_v62  ;;  %v1380_v2 = vpop.f32.mrf.mxu1  ;;  %v647_v23 = vmul.f32 %v1332_v62, %v1332_v62 }
 0x112   : > { %v972_v3 = vadd.f32 %v971_v61, %v862_v58  ;;  %v1040_v5 = vadd.f32 %v1039_v60, %v1009_v59  ;;  %944 = vst [vmem:[%s1569_s19 + $0x98] sm:$0xff] %v1380_v2  ;;  %v499_v6 = vpop.f32.mrf.mxu0  ;;  %v1013_v27 = vmul.f32 %v1380_v2, %v1380_v2 }
 0x113   : > { %v675_v7 = vadd.f32 %v674_v1, %v644_v0  ;;  %576 = vst [vmem:[%s1563_s16 + $0x88] sm:$0xff] %v499_v6  ;;  %v607_v8 = vadd.f32 %v606_v63, %v499_v6  ;;  %v645_v9 = vmul.f32 %v499_v6, %v499_v6  ;;  %v865_v10 = vpop.f32.mrf.mxu1 }
 0x114   : > { %v1041_v11 = vadd.f32 %v1040_v5, %v1010_v4  ;;  %942 = vst [vmem:[%s1569_s19 + $0x88] sm:$0xff] %v865_v10  ;;  %v973_v12 = vadd.f32 %v972_v3, %v865_v10  ;;  %v1011_v13 = vmul.f32 %v865_v10, %v865_v10  ;;  %v1335_v14 = vpop.f32.mrf.mxu0 }
 0x115   : > { %v608_v16 = vadd.f32 %v1331_v46, %v607_v8  ;;  %v676_v17 = vadd.f32 %v675_v7, %v645_v9  ;;  %581 = vst [vmem:[%s1563_s16 + $0xb0] sm:$0xff] %v1335_v14  ;;  %v1383_v18 = vpop.f32.mrf.mxu1  ;;  %v650_v47 = vmul.f32 %v1335_v14, %v1335_v14 }
 0x116   : > { %v974_v20 = vadd.f32 %v1379_v50, %v973_v12  ;;  %v1042_v21 = vadd.f32 %v1041_v11, %v1011_v13  ;;  %947 = vst [vmem:[%s1569_s19 + $0xb0] sm:$0xff] %v1383_v18  ;;  %v512_v22 = vpop.f32.mrf.mxu0  ;;  %v1016_v51 = vmul.f32 %v1383_v18, %v1383_v18 }
 0x117   : > { %v677_v24 = vadd.f32 %v676_v17, %v646_v15  ;;  %579 = vst [vmem:[%s1563_s16 + $0xa0] sm:$0xff] %v512_v22  ;;  %v609_v25 = vadd.f32 %v1332_v62, %v608_v16  ;;  %v878_v26 = vpop.f32.mrf.mxu1  ;;  %v648_v32 = vmul.f32 %v512_v22, %v512_v22 }
 0x118   : > { %v1043_v28 = vadd.f32 %v1042_v21, %v1012_v19  ;;  %945 = vst [vmem:[%s1569_s19 + $0xa0] sm:$0xff] %v878_v26  ;;  %v975_v29 = vadd.f32 %v1380_v2, %v974_v20  ;;  %v1336_v30 = vpop.f32.mrf.mxu0  ;;  %v1014_v36 = vmul.f32 %v878_v26, %v878_v26 }
 0x119   : > { %v610_v31 = vadd.f32 %v609_v25, %v512_v22  ;;  %v678_v33 = vadd.f32 %v677_v24, %v647_v23  ;;  %582 = vst [vmem:[%s1563_s16 + $0xb8] sm:$0xff] %v1336_v30  ;;  %v1384_v34 = vpop.f32.mrf.mxu1  ;;  %v651_v55 = vmul.f32 %v1336_v30, %v1336_v30 }
 0x11a   : > { %v976_v35 = vadd.f32 %v975_v29, %v878_v26  ;;  %v1044_v37 = vadd.f32 %v1043_v28, %v1013_v27  ;;  %948 = vst [vmem:[%s1569_s19 + $0xb8] sm:$0xff] %v1384_v34  ;;  %v515_v38 = vpop.f32.mrf.mxu0  ;;  %v1017_v59 = vmul.f32 %v1384_v34, %v1384_v34 }
 0x11b   : > { %v679_v39 = vadd.f32 %v678_v33, %v648_v32  ;;  %580 = vst [vmem:[%s1563_s16 + $0xa8] sm:$0xff] %v515_v38  ;;  %v611_v40 = vadd.f32 %v610_v31, %v515_v38  ;;  %v649_v41 = vmul.f32 %v515_v38, %v515_v38  ;;  %v881_v42 = vpop.f32.mrf.mxu1 }
 0x11c   : > { %v1045_v43 = vadd.f32 %v1044_v37, %v1014_v36  ;;  %946 = vst [vmem:[%s1569_s19 + $0xa8] sm:$0xff] %v881_v42  ;;  %v977_v44 = vadd.f32 %v976_v35, %v881_v42  ;;  %v1015_v45 = vmul.f32 %v881_v42, %v881_v42  ;;  %v1339_v46 = vpop.f32.mrf.mxu0 }
 0x11d   : > { %v612_v48 = vadd.f32 %v1335_v14, %v611_v40  ;;  %v680_v49 = vadd.f32 %v679_v39, %v649_v41  ;;  %585 = vst [vmem:[%s1563_s16 + $0xd0] sm:$0xff] %v1339_v46  ;;  %v1387_v50 = vpop.f32.mrf.mxu1  ;;  %v654_v15 = vmul.f32 %v1339_v46, %v1339_v46 }
 0x11e   : > { %v978_v52 = vadd.f32 %v1383_v18, %v977_v44  ;;  %v1046_v53 = vadd.f32 %v1045_v43, %v1015_v45  ;;  %951 = vst [vmem:[%s1569_s19 + $0xd0] sm:$0xff] %v1387_v50  ;;  %v528_v54 = vpop.f32.mrf.mxu0  ;;  %v1020_v19 = vmul.f32 %v1387_v50, %v1387_v50 }
 0x11f   : > { %v681_v56 = vadd.f32 %v680_v49, %v650_v47  ;;  %583 = vst [vmem:[%s1563_s16 + $0xc0] sm:$0xff] %v528_v54  ;;  %v613_v57 = vadd.f32 %v1336_v30, %v612_v48  ;;  %v894_v58 = vpop.f32.mrf.mxu1  ;;  %v652_v0 = vmul.f32 %v528_v54, %v528_v54 }
 0x120   : > { %v1047_v60 = vadd.f32 %v1046_v53, %v1016_v51  ;;  %949 = vst [vmem:[%s1569_s19 + $0xc0] sm:$0xff] %v894_v58  ;;  %v979_v61 = vadd.f32 %v1384_v34, %v978_v52  ;;  %v1340_v62 = vpop.f32.mrf.mxu0  ;;  %v1018_v4 = vmul.f32 %v894_v58, %v894_v58 }
 0x121   : > { %v614_v63 = vadd.f32 %v613_v57, %v528_v54  ;;  %v682_v1 = vadd.f32 %v681_v56, %v651_v55  ;;  %586 = vst [vmem:[%s1563_s16 + $0xd8] sm:$0xff] %v1340_v62  ;;  %v1388_v2 = vpop.f32.mrf.mxu1  ;;  %v655_v23 = vmul.f32 %v1340_v62, %v1340_v62 }
 0x122   : > { %v980_v3 = vadd.f32 %v979_v61, %v894_v58  ;;  %v1048_v5 = vadd.f32 %v1047_v60, %v1017_v59  ;;  %952 = vst [vmem:[%s1569_s19 + $0xd8] sm:$0xff] %v1388_v2  ;;  %v531_v6 = vpop.f32.mrf.mxu0  ;;  %v1021_v27 = vmul.f32 %v1388_v2, %v1388_v2 }
 0x123   : > { %v683_v7 = vadd.f32 %v682_v1, %v652_v0  ;;  %584 = vst [vmem:[%s1563_s16 + $0xc8] sm:$0xff] %v531_v6  ;;  %v615_v8 = vadd.f32 %v614_v63, %v531_v6  ;;  %v653_v9 = vmul.f32 %v531_v6, %v531_v6  ;;  %v897_v10 = vpop.f32.mrf.mxu1 }
 0x124   : > { %v1049_v11 = vadd.f32 %v1048_v5, %v1018_v4  ;;  %950 = vst [vmem:[%s1569_s19 + $0xc8] sm:$0xff] %v897_v10  ;;  %v981_v12 = vadd.f32 %v980_v3, %v897_v10  ;;  %v1019_v13 = vmul.f32 %v897_v10, %v897_v10  ;;  %v1343_v14 = vpop.f32.mrf.mxu0 }
 0x125   : > { %v616_v16 = vadd.f32 %v1339_v46, %v615_v8  ;;  %v684_v17 = vadd.f32 %v683_v7, %v653_v9  ;;  %589 = vst [vmem:[%s1563_s16 + $0xf0] sm:$0xff] %v1343_v14  ;;  %v1391_v18 = vpop.f32.mrf.mxu1  ;;  %v658_v46 = vmul.f32 %v1343_v14, %v1343_v14 }
 0x126   : > { %v982_v20 = vadd.f32 %v1387_v50, %v981_v12  ;;  %v1050_v21 = vadd.f32 %v1049_v11, %v1019_v13  ;;  %955 = vst [vmem:[%s1569_s19 + $0xf0] sm:$0xff] %v1391_v18  ;;  %v544_v22 = vpop.f32.mrf.mxu0  ;;  %v1024_v49 = vmul.f32 %v1391_v18, %v1391_v18 }
 0x127   : > { %v685_v24 = vadd.f32 %v684_v17, %v654_v15  ;;  %587 = vst [vmem:[%s1563_s16 + $0xe0] sm:$0xff] %v544_v22  ;;  %v617_v25 = vadd.f32 %v1340_v62, %v616_v16  ;;  %v910_v26 = vpop.f32.mrf.mxu1  ;;  %v656_v32 = vmul.f32 %v544_v22, %v544_v22 }
 0x128   : > { %v1051_v28 = vadd.f32 %v1050_v21, %v1020_v19  ;;  %953 = vst [vmem:[%s1569_s19 + $0xe0] sm:$0xff] %v910_v26  ;;  %v983_v29 = vadd.f32 %v1388_v2, %v982_v20  ;;  %v1344_v30 = vpop.f32.mrf.mxu0  ;;  %v1022_v36 = vmul.f32 %v910_v26, %v910_v26 }
 0x129   : > { %v618_v31 = vadd.f32 %v617_v25, %v544_v22  ;;  %v686_v33 = vadd.f32 %v685_v24, %v655_v23  ;;  %590 = vst [vmem:[%s1563_s16 + $0xf8] sm:$0xff] %v1344_v30  ;;  %v1392_v34 = vpop.f32.mrf.mxu1  ;;  %v659_v52 = vmul.f32 %v1344_v30, %v1344_v30 }
 0x12a   : > { %v984_v35 = vadd.f32 %v983_v29, %v910_v26  ;;  %v1052_v37 = vadd.f32 %v1051_v28, %v1021_v27  ;;  %956 = vst [vmem:[%s1569_s19 + $0xf8] sm:$0xff] %v1392_v34  ;;  %v547_v38 = vpop.f32.mrf.mxu0  ;;  %v1025_v55 = vmul.f32 %v1392_v34, %v1392_v34 }
 0x12b   : > { %v687_v39 = vadd.f32 %v686_v33, %v656_v32  ;;  %588 = vst [vmem:[%s1563_s16 + $0xe8] sm:$0xff] %v547_v38  ;;  %v619_v40 = vadd.f32 %v618_v31, %v547_v38  ;;  %v657_v41 = vmul.f32 %v547_v38, %v547_v38  ;;  %v913_v42 = vpop.f32.mrf.mxu1 }
 0x12c   : > { %v1053_v43 = vadd.f32 %v1052_v37, %v1022_v36  ;;  %954 = vst [vmem:[%s1569_s19 + $0xe8] sm:$0xff] %v913_v42  ;;  %v985_v44 = vadd.f32 %v984_v35, %v913_v42  ;;  %v1023_v45 = vmul.f32 %v913_v42, %v913_v42 }
 0x12d   : > { %v620_v47 = vadd.f32 %v1343_v14, %v619_v40  ;;  %v688_v48 = vadd.f32 %v687_v39, %v657_v41 }
 0x12e   : > { %v986_v50 = vadd.f32 %v1391_v18, %v985_v44  ;;  %v1054_v51 = vadd.f32 %v1053_v43, %v1023_v45 }
 0x12f   : > { %v621_v53 = vadd.f32 %v1344_v30, %v620_v47  ;;  %v689_v54 = vadd.f32 %v688_v48, %v658_v46 }
 0x130   : > { %v987_v56 = vadd.f32 %v1392_v34, %v986_v50  ;;  %v1055_v57 = vadd.f32 %v1054_v51, %v1024_v49 }
 0x131   : > { %v622_v58 = vrot.slane %v621_v53, 4  ;;  %v690_v59 = vadd.f32 %v689_v54, %v659_v52 }
 0x132   : > { %v988_v60 = vrot.slane %v987_v56, 4  ;;  %v1056_v61 = vadd.f32 %v1055_v57, %v1025_v55 }
 0x133   : > { %v623_v62 = vadd.f32 %v622_v58, %v621_v53  ;;  %v691_v63 = vrot.slane %v690_v59, 4 }
 0x134   : > { %v989_v0 = vadd.f32 %v988_v60, %v987_v56  ;;  %v1057_v1 = vrot.slane %v1056_v61, 4 }
 0x135   : > { %v624_v2 = vrot.slane %v623_v62, 2  ;;  %v692_v3 = vadd.f32 %v691_v63, %v690_v59 }
 0x136   : > { %v990_v4 = vrot.slane %v989_v0, 2  ;;  %v1058_v5 = vadd.f32 %v1057_v1, %v1056_v61 }
 0x137   : > { %v625_v6 = vadd.f32 %v624_v2, %v623_v62  ;;  %v693_v7 = vrot.slane %v692_v3, 2 }
 0x138   : > { %v991_v8 = vadd.f32 %v990_v4, %v989_v0  ;;  %v1059_v9 = vrot.slane %v1058_v5, 2 }
 0x139   : > { %v626_v10 = vrot.slane %v625_v6, 1  ;;  %v694_v11 = vadd.f32 %v693_v7, %v692_v3 }
 0x13a   : > { %v992_v12 = vrot.slane %v991_v8, 1  ;;  %v1060_v13 = vadd.f32 %v1059_v9, %v1058_v5 }
 0x13b   : > { %v695_v14 = vrot.slane %v694_v11, 1  ;;  %v627_v16 = vadd.f32 %v626_v10, %v625_v6 }
 0x13c   : > { %v1061_v15 = vrot.slane %v1060_v13, 1  ;;  %v993_v18 = vadd.f32 %v992_v12, %v991_v8 }
 0x13d   : > { %v696_v17 = vadd.f32 %v695_v14, %v694_v11 }
 0x13e   : > { %v1062_v19 = vadd.f32 %v1061_v15, %v1060_v13 }
 0x13f   : > { %v698_v20 = vsel %vm697_vm0, %v627_v16, %v696_v17 }
 0x140   : > { %699 = vst [vmem:[%s275_s24] sm:$0x3] %v698_v20  ;;  %v1063_v21 = vsel %vm697_vm0, %v993_v18, %v1062_v19 }
 0x141   : > { %1064 = vst [vmem:[%s284_s27] sm:$0x3] %v1063_v21 }
 0x142 PF: > { %s17_s21 = sadd.s32 1, %s1423_s21  }
 0x143   : > { %p14_p4 = scmp.ge.s32.totalorder %s17_s21, 4  }
 0x145   :  { %16 = sbr.rel (!%p14_p4) target bundleno = 1 (0x1), region = 98 }

// kernel: bottleneck_block.5
= control target key start
LH: loop header
LB: loop body
LE: loop exit
PB: predicated region body
PF: predicated region fallthrough
CT: control target
= control target key end

     0   :  { %s5325_s18 = smov 0   ;;  %s6969_s0 = inlined_call_operand.vmem [shape: f32[2,256,128], index: 0, kind: input, shape index: {}]   ;;  %s6970_s1 = inlined_call_operand.vmem [shape: bf16[1152,128], index: 1, kind: input, shape index: {}]   ;;  %s6971_s2 = inlined_call_operand.vmem [shape: f32[1,128], index: 2, kind: input, shape index: {}]   ;;  %s6972_s3 = inlined_call_operand.vmem [shape: f32[1,128], index: 3, kind: input, shape index: {}]   ;;  %s6973_s4 = inlined_call_operand.vmem [shape: f32[2,256,128], index: 4, kind: output, shape index: {0}]   ;;  %s6974_s5 = inlined_call_operand.vmem [shape: f32[2,2,128], index: 5, kind: output, shape index: {1}]  }
   0x1 LB: > { %s4215_s19 = sadd.s32 4294967295, %s5292_s18   ;;  %p4219_p0 = scmp.ge.s32.totalorder %s5292_s18, 1  ;;  %s5292_s18 = sphi %s5325_s18, %s16_s18  }
   0x2   : > { %p190_p1 = scmp.lt.s32.totalorder %s5292_s18, 3 }
   0x4   : > { %p191_p2 = pnand %p4219_p0, %p190_p1 }
   0x6   : > { %194 = sbr.rel (%p191_p2) target bundleno = 591 (0x24f), region = 36 }
   0xb   : > { %v5056_v0 = vld [vmem:[%s6970_s1 + $0x78] sm:$0xff]   ;;  %v5294_v2 = vmov 0   ;;  %v5058_v3 = vld [vmem:[%s6970_s1 + $0x70] sm:$0xff]   ;;  %p222_p3 = scmp.lt.s32.totalorder %s4215_s19, 1  ;;  %v5060_v5 = vld [vmem:[%s6970_s1 + $0x68] sm:$0xff]   ;;  %vm403_vm0 = vcmask 1040384  }
   0xc   : > { %v5057_v1 = vld [vmem:[%s6970_s1 + $0x38] sm:$0xff]   ;;  %395 = vst [vmem:[#allocation2] sm:$0xf] %v5294_v2  ;;  %396 = vst [vmem:[#allocation2 + $0x4] sm:$0xf] %v5294_v2  ;;  %4511 = vmatprep.subr.bf16.mxu0 %v5056_v0  ;;  %5031 = vmatprep.subr.bf16.mxu1 %v5056_v0  ;;  %v5059_v4 = vld [vmem:[%s6970_s1 + $0x30] sm:$0xff]  }
   0xd   : > { %397 = vst [vmem:[#allocation2 + $0x8] sm:$0x1] %v5294_v2  ;;  %399 = vst [vmem:[#allocation2 + $0xcc] sm:$0xf] %v5294_v2  ;;  %4512 = vmatpush3.bf16.msra.mxu0 %v5057_v1  ;;  %5039 = vmatpush3.bf16.msra.mxu1 %v5057_v1  ;;  %v5061_v6 = vld [vmem:[%s6970_s1 + $0x28] sm:$0xff]   ;;  %s7018_s19 = smov (!%p222_p3, %s4215_s19), 1 }
   0xe   : > { %400 = vst [vmem:[#allocation2 + $0xd0] sm:$0xf] %v5294_v2  ;;  %401 = vst [vmem:[#allocation2 + $0xd4] sm:$0x1] %v5294_v2  ;;  %4513 = vmatprep.subr.bf16.mxu0 %v5058_v3  ;;  %5032 = vmatprep.subr.bf16.mxu1 %v5058_v3  ;;  %v5062_v7 = vld [vmem:[%s6970_s1 + $0x60] sm:$0xff]   ;;  %s4477_s11 = sshll.u32 %s7018_s19, 8 }
   0xf   : > { %v5063_v8 = vld [vmem:[%s6970_s1 + $0x20] sm:$0xff]   ;;  %v5064_v9 = vld [vmem:[%s6970_s1 + $0x58] sm:$0xff]   ;;  %s5371_s20 = scalar_lea.vmem %s6969_s0, %s4477_s11  ;;  %v5066_v11 = vld [vmem:[%s6970_s1 + $0x50] sm:$0xff]   ;;  %vm404_vm1 = vsmask.f32 256  ;;  %vm906_vm7 = vcmask 1043456   ;;  %s6804_s7 = scalar_lea.vmem %s6973_s4, %s4477_s11 }
  0x10   : > { %v5065_v10 = vld [vmem:[%s6970_s1 + $0x18] sm:$0xff]   ;;  %v5067_v14 = vld [vmem:[%s6970_s1 + $0x10] sm:$0xff]   ;;  %v5386_v19 = vld [vmem:[%s6971_s2] ss:$0 sm:$0xff]  ;;  %vm454_vm2 = vsmask.f32 7938 }
  0x11   : > { %4514 = vmatpush3.bf16.msra.mxu0 %v5059_v4  ;;  %5040 = vmatpush3.bf16.msra.mxu1 %v5059_v4  ;;  %v259_v17 = vld [vmem:[%s5371_s20 + $0xb0] sm:$0xff]  ;;  %v260_v18 = vld [vmem:[%s5371_s20 + $0xb8] sm:$0xff]  ;;  %v5391_v20 = vld [vmem:[%s6972_s3] ss:$0 sm:$0xff]  ;;  %vm1357_vm4 = vsmask.f32 7424 }
  0x12   : > { %4515 = vmatprep.subr.bf16.mxu0 %v5060_v5  ;;  %5033 = vmatprep.subr.bf16.mxu1 %v5060_v5  ;;  %v5068_v21 = vld [vmem:[%s6970_s1 + $0x48] sm:$0xff]   ;;  %v439_v25 = vld [vmem:[#allocation2 + $0x90] sm:$0x1]  ;;  %v298_v26 = vmul.f32 %v5386_v19, %v259_v17  ;;  %v299_v27 = vmul.f32 %v5386_v19, %v260_v18  ;;  %v489_v28 = vld [vmem:[#allocation2 + $0x98] sm:$0x1]  ;;  %vm1614_vm10 = vcmask 1046528  }
  0x13   : > { %v1020_v12 = vld [vmem:[#allocation2] sm:$0xf]  ;;  %v1021_v13 = vld [vmem:[#allocation2 + $0x4] sm:$0xf]  ;;  %vm5402_vm3 = vmand %vm403_vm0, %vm404_vm1  ;;  %vm584_vm6 = vsmask.f32 4368 }
  0x14   : > { %v5379_v15 = vcombine.low %v1020_v12, %v1021_v13  ;;  %v5073_v16 = vld [vmem:[#allocation2 + $0x8] ss:$0 sps:$4 sm:$0x11]   ;;  %v337_v32 = vadd.f32 %v5391_v20, %v298_v26  ;;  %v338_v33 = vadd.f32 %v5391_v20, %v299_v27  ;;  %v440_v34 = vsel %vm5402_vm3, 0, %v439_v25  ;;  %vm5412_vm5 = vmand %vm403_vm0, %vm454_vm2  ;;  %v5070_v39 = vld [vmem:[%s6970_s1 + $0x40] sm:$0xff]   ;;  %s4224_s11 = sshll.u32 %s7018_s19, 1 }
  0x15   : > { %4516 = vmatpush3.bf16.msra.mxu0 %v5061_v6  ;;  %5041 = vmatpush3.bf16.msra.mxu1 %v5061_v6  ;;  %v1366_v24 = vshll.u32 %v5073_v16, 16  ;;  %v5069_v36 = vld [vmem:[%s6970_s1 + $0x8] sm:$0xff]   ;;  %441 = vst [vmem:[#allocation2 + $0x90] sm:$0x1] %v440_v34  ;;  %v490_v38 = vsel %vm5412_vm5, 0, %v489_v28  ;;  %v5071_v42 = vld [vmem:[%s6970_s1] sm:$0xff]   ;;  %vm5439_vm8 = vmor %vm404_vm1, %vm584_vm6  ;;  %s235_s10 = scalar_lea.vmem %s6974_s5, %s4224_s11 }
  0x16   : > { %4517 = vmatprep.subr.bf16.mxu0 %v5062_v7  ;;  %5034 = vmatprep.subr.bf16.mxu1 %v5062_v7  ;;  %v1359_v22 = vshrl.u32 %v5379_v15, 16  ;;  %v1361_v23 = vshll.u32 %v5379_v15, 16  ;;  %v369_v40 = vmax.f32 %v337_v32, 0.0  ;;  %v370_v41 = vmax.f32 %v338_v33, 0.0  ;;  %491 = vst [vmem:[#allocation2 + $0x98] sm:$0x1] %v490_v38  ;;  %vm5454_vm9 = vmand %vm906_vm7, %vm454_vm2 }
  0x17   : > { %v1368_v30 = vrot.slane %v1366_v24, 1  ;;  %v5076_v46 = vld [vmem:[%s6970_s1 + $0xf8] sm:$0xff]   ;;  %v237_v48 = vld [vmem:[%s5371_s20] sm:$0xff]  ;;  %v238_v49 = vld [vmem:[%s5371_s20 + $0x8] sm:$0xff] }
  0x18   : > { %v1363_v29 = vrot.slane %v1361_v23, 1  ;;  %v4501_v44 = vpack.c.bf16 %v369_v40, %v369_v40  ;;  %v4502_v45 = vpack.c.bf16 %v370_v41, %v370_v41  ;;  %v5077_v47 = vld [vmem:[%s6970_s1 + $0x178] sm:$0xff]   ;;  %v276_v50 = vmul.f32 %v5386_v19, %v237_v48  ;;  %v406_v51 = vld [vmem:[#allocation2 + $0xc] sm:$0x1]  ;;  %v456_v52 = vld [vmem:[#allocation2 + $0x14] sm:$0x1] }
  0x19   : > { %4518 = vmatpush3.bf16.msra.mxu0 %v5063_v8  ;;  %5042 = vmatpush3.bf16.msra.mxu1 %v5063_v8  ;;  %v5079_v58 = vld [vmem:[%s6970_s1 + $0x138] sm:$0xff]   ;;  %v277_v59 = vmul.f32 %v5386_v19, %v238_v49  ;;  %v407_v61 = vsel %vm5402_vm3, 0, %v406_v51  ;;  %v457_v62 = vsel %vm5412_vm5, 0, %v456_v52  ;;  %v261_v6 = vld [vmem:[%s5371_s20 + $0xc0] sm:$0xff]  ;;  %v239_v25 = vld [vmem:[%s5371_s20 + $0x10] sm:$0xff] }
  0x1a   : > { %4519 = vmatprep.subr.bf16.mxu0 %v5064_v9  ;;  %5035 = vmatprep.subr.bf16.mxu1 %v5064_v9  ;;  %v1364_v37 = vor.u32 %v1363_v29, %v1359_v22  ;;  %v774_v53 = vshrl.u32 %v4501_v44, 16  ;;  %v777_v54 = vshll.u32 %v4501_v44, 16  ;;  %v782_v55 = vshrl.u32 %v4502_v45, 16  ;;  %408 = vst [vmem:[#allocation2 + $0xc] sm:$0x1] %v407_v61  ;;  %v240_v29 = vld [vmem:[%s5371_s20 + $0x18] sm:$0xff] }
  0x1b   : > { %v785_v56 = vshll.u32 %v4502_v45, 16  ;;  %v315_v60 = vadd.f32 %v5391_v20, %v276_v50  ;;  %458 = vst [vmem:[#allocation2 + $0x14] sm:$0x1] %v457_v62  ;;  %v316_v4 = vadd.f32 %v5391_v20, %v277_v59  ;;  %v442_v12 = vld [vmem:[#allocation2 + $0x9c] sm:$0x1]  ;;  %v300_v16 = vmul.f32 %v5386_v19, %v261_v6  ;;  %v5091_v38 = vld [vmem:[%s6970_s1 + $0x170] sm:$0xff]  }
  0x1c   : > { %v1369_v43 = vsel %vm1357_vm4, %v1364_v37, %v1368_v30  ;;  %v776_v63 = vrot.slane %v774_v53, 7  ;;  %v784_v0 = vrot.slane %v782_v55, 7  ;;  %v985_v2 = vld [vmem:[#allocation2 + $0x90] sm:$0xf]  ;;  %v492_v18 = vld [vmem:[#allocation2 + $0xa4] sm:$0x1]  ;;  %v278_v33 = vmul.f32 %v5386_v19, %v239_v25 }
  0x1d   : > { %4520 = vmatpush3.bf16.msra.mxu0 %v5065_v10  ;;  %5043 = vmatpush3.bf16.msra.mxu1 %v5065_v10  ;;  %v989_v3 = vld [vmem:[#allocation2 + $0x98] sm:$0x1]  ;;  %v347_v5 = vmax.f32 %v315_v60, 0.0  ;;  %v348_v13 = vmax.f32 %v316_v4, 0.0  ;;  %v443_v24 = vsel %vm5402_vm3, 0, %v442_v12  ;;  %v339_v28 = vadd.f32 %v5391_v20, %v300_v16 }
  0x1e   : > { %4521 = vmatprep.subr.bf16.mxu0 %v5066_v11  ;;  %5036 = vmatprep.subr.bf16.mxu1 %v5066_v11  ;;  %v779_v7 = vor.u32 %v777_v54, %v776_v63  ;;  %v780_v8 = vrot.slane %v776_v63, 4  ;;  %v787_v9 = vor.u32 %v785_v56, %v784_v0  ;;  %v789_v10 = vrot.slane %v784_v0, 4  ;;  %v262_v11 = vld [vmem:[%s5371_s20 + $0xc8] sm:$0xff]  ;;  %444 = vst [vmem:[#allocation2 + $0x9c] sm:$0x1] %v443_v24 }
  0x1f   : > { %3215 = vmatprep.mubr.bf16.mxu0 %v1369_v43  ;;  %v301_v17 = vmul.f32 %v5386_v19, %v262_v11  ;;  %v4480_v26 = vpack.c.bf16 %v348_v13, %v348_v13  ;;  %v493_v32 = vsel %vm5412_vm5, 0, %v492_v18  ;;  %v279_v34 = vmul.f32 %v5386_v19, %v240_v29  ;;  %v459_v37 = vld [vmem:[#allocation2 + $0x20] sm:$0x1] }
  0x20   : > { %v986_v22 = vsel %vm5454_vm9, %v779_v7, %v985_v2  ;;  %v990_v23 = vsel %vm5402_vm3, %v789_v10, %v989_v3  ;;  %v371_v43 = vmax.f32 %v339_v28, 0.0  ;;  %494 = vst [vmem:[#allocation2 + $0xa4] sm:$0x1] %v493_v32  ;;  %v460_v56 = vsel %vm5412_vm5, 0, %v459_v37 }
  0x21   : > { %4522 = vmatpush3.bf16.msra.mxu0 %v5067_v14  ;;  %5044 = vmatpush3.bf16.msra.mxu1 %v5067_v14  ;;  %v4479_v14 = vpack.c.bf16 %v347_v5, %v347_v5  ;;  %987 = vst [vmem:[#allocation2 + $0x90] sm:$0xf] %v986_v22  ;;  %991 = vst [vmem:[#allocation2 + $0x98] sm:$0x1] %v990_v23  ;;  %v340_v30 = vadd.f32 %v5391_v20, %v301_v17  ;;  %v595_v40 = vshrl.u32 %v4480_v26, 16 }
  0x22   : > { %4523 = vmatprep.subr.bf16.mxu0 %v5068_v21  ;;  %5037 = vmatprep.subr.bf16.mxu1 %v5068_v21  ;;  %v788_v21 = vsel %vm5439_vm8, %v780_v8, %v787_v9  ;;  %v598_v41 = vshll.u32 %v4480_v26, 16  ;;  %v912_v44 = vld [vmem:[#allocation2 + $0x14] sm:$0x1]  ;;  %v4503_v52 = vpack.c.bf16 %v371_v43, %v371_v43  ;;  %461 = vst [vmem:[#allocation2 + $0x20] sm:$0x1] %v460_v56 }
  0x23   : > { %988 = vst [vmem:[#allocation2 + $0x94] sm:$0xf] %v788_v21  ;;  %v587_v27 = vshrl.u32 %v4479_v14, 16  ;;  %v372_v45 = vmax.f32 %v340_v30, 0.0  ;;  %v597_v51 = vrot.slane %v595_v40, 7  ;;  %v5093_v26 = vld [vmem:[%s6970_s1 + $0x130] sm:$0xff]  }
  0x24   : > { %v791_v61 = vshrl.u32 %v4503_v52, 16  ;;  %v794_v8 = vshll.u32 %v4503_v52, 16  ;;  %v5078_v30 = vld [vmem:[%s6970_s1 + $0xb8] sm:$0xff]  }
  0x25   : > { %4524 = vmatpush3.bf16.msra.mxu0 %v5069_v36  ;;  %5045 = vmatpush3.bf16.msra.mxu1 %v5069_v36  ;;  %v409_v36 = vld [vmem:[#allocation2 + $0x18] sm:$0x1]  ;;  %v4504_v53 = vpack.c.bf16 %v372_v45, %v372_v45  ;;  %v602_v59 = vrot.slane %v597_v51, 4  ;;  %v992_v11 = vld [vmem:[#allocation2 + $0x9c] sm:$0xf] }
  0x26   : > { %4525 = vmatprep.subr.bf16.mxu0 %v5070_v39  ;;  %5038 = vmatprep.subr.bf16.mxu1 %v5070_v39  ;;  %v589_v39 = vrot.slane %v587_v27, 7  ;;  %v410_v48 = vsel %vm5402_vm3, 0, %v409_v36  ;;  %v793_v7 = vrot.slane %v791_v61, 7  ;;  %v445_v45 = vld [vmem:[#allocation2 + $0xa8] sm:$0x1] }
  0x27   : > { %411 = vst [vmem:[#allocation2 + $0x18] sm:$0x1] %v410_v48  ;;  %v913_v6 = vsel %vm5402_vm3, %v602_v59, %v912_v44  ;;  %v799_v9 = vshrl.u32 %v4504_v53, 16  ;;  %v802_v10 = vshll.u32 %v4504_v53, 16  ;;  %v996_v18 = vld [vmem:[#allocation2 + $0xa4] sm:$0x1] }
  0x28   : > { %v593_v50 = vrot.slane %v589_v39, 4  ;;  %v1044_v62 = vld [vmem:[#allocation2 + $0x90] sm:$0xf]  ;;  %v5075_v4 = vld [vmem:[#allocation2 + $0x98] ss:$0 sps:$4 sm:$0x11]   ;;  %v796_v21 = vor.u32 %v794_v8, %v793_v7 }
  0x29   : > { %4526 = vmatpush3.bf16.msra.mxu0 %v5071_v42  ;;  %5046 = vmatpush3.bf16.msra.mxu1 %v5071_v42  ;;  %v908_v42 = vld [vmem:[#allocation2 + $0xc] sm:$0xf]  ;;  %914 = vst [vmem:[#allocation2 + $0x14] sm:$0x1] %v913_v6  ;;  %v1510_v16 = vshll.u32 %v5075_v4, 16  ;;  %v797_v17 = vrot.slane %v793_v7, 4 }
  0x2a   : > { %4623 = vmatprep.subr.bf16.mxu1 %v5076_v46  ;;  %4735 = vmatprep.subr.bf16.mxu0 %v5077_v47  ;;  %v317_v46 = vadd.f32 %v5391_v20, %v278_v33  ;;  %v318_v47 = vadd.f32 %v5391_v20, %v279_v34  ;;  %v1045_v63 = vld [vmem:[#allocation2 + $0x94] sm:$0xf]  ;;  %v801_v22 = vrot.slane %v799_v9, 7  ;;  %v993_v34 = vsel %vm5454_vm9, %v796_v21, %v992_v11  ;;  %v919_v37 = vld [vmem:[#allocation2 + $0x20] sm:$0x1]  ;;  %v242_v9 = vld [vmem:[%s5371_s20 + $0x28] sm:$0xff] }
  0x2b   : > { %v5491_v3 = vcombine.low %v1044_v62, %v1045_v63  ;;  %994 = vst [vmem:[#allocation2 + $0x9c] sm:$0xf] %v993_v34  ;;  %v5082_v53 = vld [vmem:[%s6970_s1 + $0xf0] sm:$0xff]   ;;  %v446_v61 = vsel %vm5402_vm3, 0, %v445_v45  ;;  %v241_v4 = vld [vmem:[%s5371_s20 + $0x20] sm:$0xff]  ;;  %v5087_v21 = vld [vmem:[%s6970_s1 + $0xa8] sm:$0xff]  }
  0x2c   : > { %3216 = vmatmul.mubr.bf16.vlgmr.msra.gmra.mxu0 %v5379_v15  ;;  %v590_v15 = vshll.u32 %v4479_v14, 16  ;;  %v349_v54 = vmax.f32 %v317_v46, 0.0  ;;  %v350_v55 = vmax.f32 %v318_v47, 0.0  ;;  %v804_v32 = vor.u32 %v802_v10, %v801_v22  ;;  %447 = vst [vmem:[#allocation2 + $0xa8] sm:$0x1] %v446_v61  ;;  %v5083_v8 = vld [vmem:[%s6970_s1 + $0xb0] sm:$0xff]  }
  0x2d   : > { %4736 = vmatpush3.bf16.msra.mxu0 %v5079_v58  ;;  %v600_v58 = vor.u32 %v598_v41, %v597_v51  ;;  %v1503_v13 = vshrl.u32 %v5491_v3, 16  ;;  %v1505_v14 = vshll.u32 %v5491_v3, 16  ;;  %v806_v33 = vrot.slane %v801_v22, 4  ;;  %v5086_v10 = vld [vmem:[%s6970_s1 + $0xe8] sm:$0xff]  }
  0x2e   : > { %4737 = vmatprep.subr.bf16.mxu0 %v5091_v38  ;;  %v592_v49 = vor.u32 %v590_v15, %v589_v39  ;;  %v4481_v0 = vpack.c.bf16 %v349_v54, %v349_v54  ;;  %v4482_v2 = vpack.c.bf16 %v350_v55, %v350_v55  ;;  %v915_v25 = vld [vmem:[#allocation2 + $0x18] sm:$0xf]  ;;  %v1512_v15 = vrot.slane %v1510_v16, 1  ;;  %v263_v38 = vld [vmem:[%s5371_s20 + $0xd0] sm:$0xff] }
  0x2f   : > { %v601_v5 = vsel %vm5439_vm8, %v593_v50, %v600_v58  ;;  %v1507_v27 = vrot.slane %v1505_v14, 1  ;;  %v264_v39 = vld [vmem:[%s5371_s20 + $0xd8] sm:$0xff]  ;;  %v302_v44 = vmul.f32 %v5386_v19, %v263_v38  ;;  %v805_v46 = vsel %vm5439_vm8, %v797_v17, %v804_v32  ;;  %v495_v50 = vld [vmem:[#allocation2 + $0xb0] sm:$0x1]  ;;  %v412_v14 = vld [vmem:[#allocation2 + $0x24] sm:$0x1] }
  0x30   : > { %v909_v60 = vsel %vm5454_vm9, %v592_v49, %v908_v42  ;;  %911 = vst [vmem:[#allocation2 + $0x10] sm:$0xf] %v601_v5  ;;  %v604_v12 = vshrl.u32 %v4481_v0, 16  ;;  %v607_v24 = vshll.u32 %v4481_v0, 16  ;;  %v612_v28 = vshrl.u32 %v4482_v2, 16 }
  0x31   : > { %910 = vst [vmem:[#allocation2 + $0xc] sm:$0xf] %v909_v60  ;;  %v615_v29 = vshll.u32 %v4482_v2, 16  ;;  %4738 = vmatpush3.bf16.msra.mxu0 %v5093_v26  ;;  %v1508_v40 = vor.u32 %v1507_v27, %v1503_v13  ;;  %v997_v47 = vsel %vm5402_vm3, %v806_v33, %v996_v18  ;;  %v303_v49 = vmul.f32 %v5386_v19, %v264_v39  ;;  %v5525_v59 = vld [vmem:[#allocation2 + $0x14] ss:$0 sps:$4 sm:$0x11]  }
  0x32   : > { %v606_v23 = vrot.slane %v604_v12, 7  ;;  %v614_v43 = vrot.slane %v612_v28, 7  ;;  %995 = vst [vmem:[#allocation2 + $0xa0] sm:$0xf] %v805_v46  ;;  %998 = vst [vmem:[#allocation2 + $0xa4] sm:$0x1] %v997_v47  ;;  %v341_v56 = vadd.f32 %v5391_v20, %v302_v44  ;;  %v280_v12 = vmul.f32 %v5386_v19, %v241_v4 }
  0x33   : > { %v1513_v51 = vsel %vm1357_vm4, %v1508_v40, %v1512_v15  ;;  %v342_v60 = vadd.f32 %v5391_v20, %v303_v49  ;;  %v496_v62 = vsel %vm5412_vm5, 0, %v495_v50  ;;  %v1378_v7 = vshll.u32 %v5525_v59, 16  ;;  %v1046_v18 = vld [vmem:[#allocation2 + $0x9c] sm:$0xf]  ;;  %v5090_v33 = vld [vmem:[%s6970_s1 + $0xe0] sm:$0xff]  }
  0x34   : > { %v609_v36 = vor.u32 %v607_v24, %v606_v23  ;;  %v610_v42 = vrot.slane %v606_v23, 4  ;;  %v617_v54 = vor.u32 %v615_v29, %v614_v43  ;;  %v619_v55 = vrot.slane %v614_v43, 4  ;;  %3311 = vmatprep.mubr.bf16.mxu1 %v1513_v51  ;;  %497 = vst [vmem:[#allocation2 + $0xb0] sm:$0x1] %v496_v62  ;;  %v999_v40 = vld [vmem:[#allocation2 + $0xa8] sm:$0xf] }
  0x35   : > { %3312 = vmatmul.mubr.bf16.vlgmr.msra.gmra.mxu1 %v5491_v3  ;;  %v373_v2 = vmax.f32 %v341_v56, 0.0  ;;  %v374_v3 = vmax.f32 %v342_v60, 0.0  ;;  %v281_v13 = vmul.f32 %v5386_v19, %v242_v9  ;;  %v1380_v17 = vrot.slane %v1378_v7, 1  ;;  %v5092_v47 = vld [vmem:[%s6970_s1 + $0xa0] sm:$0xff]   ;;  %v5097_v4 = vld [vmem:[%s6970_s1 + $0x98] sm:$0xff]  }
  0x36   : > { %v916_v48 = vsel %vm5454_vm9, %v609_v36, %v915_v25  ;;  %v618_v63 = vsel %vm5439_vm8, %v610_v42, %v617_v54  ;;  %v920_v0 = vsel %vm5402_vm3, %v619_v55, %v919_v37  ;;  %4624 = vmatpush3.bf16.msra.mxu1 %v5078_v30  ;;  %v413_v23 = vsel %vm5402_vm3, 0, %v412_v14  ;;  %v462_v37 = vld [vmem:[#allocation2 + $0x2c] sm:$0x1]  ;;  %v265_v9 = vld [vmem:[%s5371_s20 + $0xe0] sm:$0xff] }
  0x37   : > { %v5518_v52 = vld [vmem:[#allocation2 + $0x10] sm:$0xf]  ;;  %917 = vst [vmem:[#allocation2 + $0x18] sm:$0xf] %v916_v48  ;;  %918 = vst [vmem:[#allocation2 + $0x1c] sm:$0xf] %v618_v63  ;;  %4625 = vmatprep.subr.bf16.mxu1 %v5082_v53  ;;  %v4505_v11 = vpack.c.bf16 %v373_v2, %v373_v2  ;;  %v4506_v22 = vpack.c.bf16 %v374_v3, %v374_v3  ;;  %v319_v26 = vadd.f32 %v5391_v20, %v280_v12 }
  0x38   : > { %v1022_v41 = vld [vmem:[#allocation2 + $0xc] sm:$0xf]  ;;  %921 = vst [vmem:[#allocation2 + $0x20] sm:$0x1] %v920_v0  ;;  %v320_v27 = vadd.f32 %v5391_v20, %v281_v13  ;;  %414 = vst [vmem:[#allocation2 + $0x24] sm:$0x1] %v413_v23 }
  0x39   : > { %v4260_v58 = vcombine.low %v1022_v41, %v5518_v52  ;;  %v808_v24 = vshrl.u32 %v4505_v11, 16  ;;  %v811_v25 = vshll.u32 %v4505_v11, 16  ;;  %v1047_v28 = vld [vmem:[#allocation2 + $0xa0] sm:$0xf]  ;;  %v816_v36 = vshrl.u32 %v4506_v22, 16 }
  0x3a   : > { %4626 = vmatpush3.bf16.msra.mxu1 %v5083_v8  ;;  %v5555_v30 = vcombine.low %v1046_v18, %v1047_v28  ;;  %v5085_v32 = vld [vmem:[#allocation2 + $0xa4] ss:$0 sps:$4 sm:$0x11]   ;;  %v819_v39 = vshll.u32 %v4506_v22, 16  ;;  %v351_v41 = vmax.f32 %v319_v26, 0.0  ;;  %v352_v42 = vmax.f32 %v320_v27, 0.0 }
  0x3b   : > { %v1371_v5 = vshrl.u32 %v4260_v58, 16  ;;  %v1373_v6 = vshll.u32 %v4260_v58, 16  ;;  %4627 = vmatprep.subr.bf16.mxu1 %v5086_v10  ;;  %v810_v34 = vrot.slane %v808_v24, 7  ;;  %v1522_v45 = vshll.u32 %v5085_v32, 16  ;;  %v1003_v2 = vld [vmem:[#allocation2 + $0xb0] sm:$0x1] }
  0x3c   : > { %v1515_v43 = vshrl.u32 %v5555_v30, 16  ;;  %v1517_v44 = vshll.u32 %v5555_v30, 16  ;;  %v4483_v53 = vpack.c.bf16 %v351_v41, %v351_v41  ;;  %v4484_v54 = vpack.c.bf16 %v352_v42, %v352_v42  ;;  %v266_v10 = vld [vmem:[%s5371_s20 + $0xe8] sm:$0xff]  ;;  %v448_v11 = vld [vmem:[#allocation2 + $0xb4] sm:$0x1] }
  0x3d   : > { %v1375_v16 = vrot.slane %v1373_v6, 1  ;;  %v813_v48 = vor.u32 %v811_v25, %v810_v34  ;;  %v814_v51 = vrot.slane %v810_v34, 4  ;;  %v1524_v56 = vrot.slane %v1522_v45, 1  ;;  %v498_v18 = vld [vmem:[#allocation2 + $0xbc] sm:$0x1]  ;;  %v5100_v25 = vld [vmem:[%s6970_s1 + $0xd0] sm:$0xff]  }
  0x3e   : > { %v1024_v29 = vld [vmem:[#allocation2 + $0x18] sm:$0xf]  ;;  %v5563_v46 = vld [vmem:[#allocation2 + $0x1c] sm:$0xf]  ;;  %4628 = vmatpush3.bf16.msra.mxu1 %v5087_v21  ;;  %v1519_v55 = vrot.slane %v1517_v44, 1  ;;  %v818_v60 = vrot.slane %v816_v36, 7  ;;  %v305_v36 = vmul.f32 %v5386_v19, %v266_v10 }
  0x3f   : > { %v1376_v15 = vor.u32 %v1375_v16, %v1371_v5  ;;  %v5569_v49 = vcombine.low %v1024_v29, %v5563_v46  ;;  %v5571_v50 = vld [vmem:[#allocation2 + $0x20] ss:$0 sps:$4 sm:$0x11]   ;;  %4629 = vmatprep.subr.bf16.mxu1 %v5090_v33  ;;  %v1000_v61 = vsel %vm5454_vm9, %v813_v48, %v999_v40  ;;  %v463_v5 = vsel %vm5412_vm5, 0, %v462_v37  ;;  %v5101_v28 = vld [vmem:[%s6970_s1 + $0x90] sm:$0xff]   ;;  %v5105_v32 = vld [vmem:[%s6970_s1 + $0x168] sm:$0xff]  }
  0x40   : > { %v1390_v0 = vshll.u32 %v5571_v50, 16  ;;  %1001 = vst [vmem:[#allocation2 + $0xa8] sm:$0xf] %v1000_v61  ;;  %v1520_v6 = vor.u32 %v1519_v55, %v1515_v43  ;;  %v821_v7 = vor.u32 %v819_v39, %v818_v60  ;;  %v823_v8 = vrot.slane %v818_v60, 4  ;;  %464 = vst [vmem:[#allocation2 + $0x2c] sm:$0x1] %v463_v5  ;;  %4739 = vmatprep.subr.bf16.mxu0 %v5105_v32 }
  0x41   : > { %v1381_v38 = vsel %vm1357_vm4, %v1376_v15, %v1380_v17  ;;  %v1383_v62 = vshrl.u32 %v5569_v49, 16  ;;  %v1385_v63 = vshll.u32 %v5569_v49, 16  ;;  %v621_v3 = vshrl.u32 %v4483_v53, 16  ;;  %v922_v17 = vld [vmem:[#allocation2 + $0x24] sm:$0xf]  ;;  %v5107_v42 = vld [vmem:[%s6970_s1 + $0x128] sm:$0xff]  }
  0x42   : > { %3223 = vmatprep.mubr.bf16.mxu0 %v1381_v38  ;;  %v1392_v13 = vrot.slane %v1390_v0, 1  ;;  %4630 = vmatpush3.bf16.msra.mxu1 %v5092_v47  ;;  %v624_v14 = vshll.u32 %v4483_v53, 16  ;;  %v629_v16 = vshrl.u32 %v4484_v54, 16  ;;  %v1525_v21 = vsel %vm1357_vm4, %v1520_v6, %v1524_v56  ;;  %v5104_v38 = vld [vmem:[%s6970_s1 + $0xc8] sm:$0xff]   ;;  %v243_v48 = vld [vmem:[%s5371_s20 + $0x30] sm:$0xff]  ;;  %v5114_v32 = vld [vmem:[%s6970_s1 + $0x1f8] sm:$0xff]  }
  0x43   : > { %3224 = vmatmul.mubr.bf16.gmra.mxu0 %v4260_v58  ;;  %v5096_v58 = vld [vmem:[%s6970_s1 + $0xd8] sm:$0xff]   ;;  %v1387_v12 = vrot.slane %v1385_v63, 1  ;;  %v822_v22 = vsel %vm5439_vm8, %v814_v51, %v821_v7  ;;  %v1004_v23 = vsel %vm5402_vm3, %v823_v8, %v1003_v2  ;;  %v623_v24 = vrot.slane %v621_v3, 7  ;;  %3319 = vmatprep.mubr.bf16.mxu1 %v1525_v21  ;;  %v5106_v56 = vld [vmem:[%s6970_s1 + $0x88] sm:$0xff]   ;;  %v5110_v7 = vld [vmem:[%s6970_s1 + $0xc0] sm:$0xff]  }
  0x44   : > { %4631 = vmatprep.subr.bf16.mxu1 %v5096_v58  ;;  %1002 = vst [vmem:[#allocation2 + $0xac] sm:$0xf] %v822_v22  ;;  %1005 = vst [vmem:[#allocation2 + $0xb0] sm:$0x1] %v1004_v23  ;;  %v631_v27 = vrot.slane %v629_v16, 7  ;;  %v632_v15 = vshll.u32 %v4484_v54, 16  ;;  %v304_v29 = vmul.f32 %v5386_v19, %v265_v9  ;;  %3320 = vmatmul.mubr.bf16.gmra.mxu1 %v5555_v30 }
  0x45   : > { %v1388_v26 = vor.u32 %v1387_v12, %v1383_v62  ;;  %v626_v33 = vor.u32 %v624_v14, %v623_v24  ;;  %v627_v34 = vrot.slane %v623_v24, 4  ;;  %v449_v37 = vsel %vm5402_vm3, 0, %v448_v11  ;;  %v244_v51 = vld [vmem:[%s5371_s20 + $0x38] sm:$0xff]  ;;  %v415_v58 = vld [vmem:[#allocation2 + $0x30] sm:$0x1]  ;;  %4740 = vmatpush3.bf16.msra.mxu0 %v5107_v42 }
  0x46   : > { %4632 = vmatpush3.bf16.msra.mxu1 %v5097_v4  ;;  %v634_v40 = vor.u32 %v632_v15, %v631_v27  ;;  %v636_v41 = vrot.slane %v631_v27, 4  ;;  %v343_v30 = vadd.f32 %v5391_v20, %v304_v29  ;;  %450 = vst [vmem:[#allocation2 + $0xb4] sm:$0x1] %v449_v37  ;;  %v344_v45 = vadd.f32 %v5391_v20, %v305_v36  ;;  %v465_v0 = vld [vmem:[#allocation2 + $0x38] sm:$0x1] }
  0x47   : > { %v1393_v39 = vsel %vm1357_vm4, %v1388_v26, %v1392_v13  ;;  %v1048_v43 = vld [vmem:[#allocation2 + $0xa8] sm:$0xf]  ;;  %v923_v44 = vsel %vm5454_vm9, %v626_v33, %v922_v17  ;;  %4633 = vmatprep.subr.bf16.mxu1 %v5100_v25  ;;  %v499_v47 = vsel %vm5412_vm5, 0, %v498_v18  ;;  %v926_v54 = vld [vmem:[#allocation2 + $0x2c] sm:$0x1]  ;;  %v282_v60 = vmul.f32 %v5386_v19, %v243_v48  ;;  %v5111_v18 = vld [vmem:[%s6970_s1 + $0x80] sm:$0xff]  }
  0x48   : > { %3231 = vmatprep.mubr.bf16.mxu0 %v1393_v39  ;;  %v635_v53 = vsel %vm5439_vm8, %v627_v34, %v634_v40  ;;  %924 = vst [vmem:[#allocation2 + $0x24] sm:$0xf] %v923_v44  ;;  %v375_v55 = vmax.f32 %v343_v30, 0.0  ;;  %500 = vst [vmem:[#allocation2 + $0xbc] sm:$0x1] %v499_v47  ;;  %v283_v61 = vmul.f32 %v5386_v19, %v244_v51  ;;  %v376_v62 = vmax.f32 %v344_v45, 0.0 }
  0x49   : > { %925 = vst [vmem:[#allocation2 + $0x28] sm:$0xf] %v635_v53  ;;  %v416_v63 = vsel %vm5402_vm3, 0, %v415_v58  ;;  %v321_v4 = vadd.f32 %v5391_v20, %v282_v60  ;;  %v466_v6 = vsel %vm5412_vm5, 0, %v465_v0  ;;  %v245_v47 = vld [vmem:[%s5371_s20 + $0x40] sm:$0xff] }
  0x4a   : > { %4634 = vmatpush3.bf16.msra.mxu1 %v5101_v28  ;;  %v4507_v2 = vpack.c.bf16 %v375_v55, %v375_v55  ;;  %v322_v5 = vadd.f32 %v5391_v20, %v283_v61  ;;  %417 = vst [vmem:[#allocation2 + $0x30] sm:$0x1] %v416_v63  ;;  %v4508_v3 = vpack.c.bf16 %v376_v62, %v376_v62  ;;  %467 = vst [vmem:[#allocation2 + $0x38] sm:$0x1] %v466_v6 }
  0x4b   : > { %3232 = vmatmul.mubr.bf16.gmra.mxu0 %v5569_v49  ;;  %v927_v49 = vsel %vm5402_vm3, %v636_v41, %v926_v54  ;;  %v1049_v8 = vld [vmem:[#allocation2 + $0xac] sm:$0xf]  ;;  %4635 = vmatprep.subr.bf16.mxu1 %v5104_v38  ;;  %v5095_v10 = vld [vmem:[#allocation2 + $0xb0] ss:$0 sps:$4 sm:$0x11]   ;;  %v353_v13 = vmax.f32 %v321_v4, 0.0 }
  0x4c   : > { %928 = vst [vmem:[#allocation2 + $0x2c] sm:$0x1] %v927_v49  ;;  %v4273_v9 = vcombine.low %v1048_v43, %v1049_v8  ;;  %v825_v11 = vshrl.u32 %v4507_v2, 16  ;;  %v828_v12 = vshll.u32 %v4507_v2, 16  ;;  %v833_v14 = vshrl.u32 %v4508_v3, 16  ;;  %v246_v49 = vld [vmem:[%s5371_s20 + $0x48] sm:$0xff] }
  0x4d   : > { %v836_v16 = vshll.u32 %v4508_v3, 16  ;;  %v354_v17 = vmax.f32 %v322_v5, 0.0  ;;  %v1534_v23 = vshll.u32 %v5095_v10, 16  ;;  %v1006_v25 = vld [vmem:[#allocation2 + $0xb4] sm:$0xf]  ;;  %v4485_v28 = vpack.c.bf16 %v353_v13, %v353_v13  ;;  %v5119_v4 = vld [vmem:[%s6970_s1 + $0x160] sm:$0xff]  }
  0x4e   : > { %v1527_v21 = vshrl.u32 %v4273_v9, 16  ;;  %v1529_v22 = vshll.u32 %v4273_v9, 16  ;;  %v827_v24 = vrot.slane %v825_v11, 7  ;;  %4636 = vmatpush3.bf16.msra.mxu1 %v5106_v56  ;;  %v835_v27 = vrot.slane %v833_v14, 7  ;;  %v418_v10 = vld [vmem:[#allocation2 + $0x3c] sm:$0x1]  ;;  %4741 = vmatprep.subr.bf16.mxu0 %v5119_v4 }
  0x4f   : > { %v1026_v26 = vld [vmem:[#allocation2 + $0x24] sm:$0xf]  ;;  %v1010_v15 = vld [vmem:[#allocation2 + $0xbc] sm:$0x1]  ;;  %v4486_v29 = vpack.c.bf16 %v354_v17, %v354_v17  ;;  %4637 = vmatprep.subr.bf16.mxu1 %v5110_v7  ;;  %v1536_v34 = vrot.slane %v1534_v23, 1  ;;  %v638_v44 = vshrl.u32 %v4485_v28, 16  ;;  %v284_v2 = vmul.f32 %v5386_v19, %v245_v47 }
  0x50   : > { %v1531_v33 = vrot.slane %v1529_v22, 1  ;;  %v5647_v36 = vld [vmem:[#allocation2 + $0x28] sm:$0xf]  ;;  %v830_v37 = vor.u32 %v828_v12, %v827_v24  ;;  %v831_v38 = vrot.slane %v827_v24, 4  ;;  %v838_v41 = vor.u32 %v836_v16, %v835_v27  ;;  %v468_v16 = vld [vmem:[#allocation2 + $0x44] sm:$0x1] }
  0x51   : > { %v4262_v39 = vcombine.low %v1026_v26, %v5647_v36  ;;  %v840_v30 = vrot.slane %v835_v27, 4  ;;  %v641_v45 = vshll.u32 %v4485_v28, 16  ;;  %v929_v55 = vld [vmem:[#allocation2 + $0x30] sm:$0xf]  ;;  %v640_v61 = vrot.slane %v638_v44, 7  ;;  %v248_v44 = vld [vmem:[%s5371_s20 + $0x58] sm:$0xff] }
  0x52   : > { %v1532_v42 = vor.u32 %v1531_v33, %v1527_v21  ;;  %v1007_v43 = vsel %vm5454_vm9, %v830_v37, %v1006_v25  ;;  %4638 = vmatpush3.bf16.msra.mxu1 %v5111_v18  ;;  %v839_v54 = vsel %vm5439_vm8, %v831_v38, %v838_v41  ;;  %v646_v58 = vshrl.u32 %v4486_v29, 16  ;;  %v933_v3 = vld [vmem:[#allocation2 + $0x38] sm:$0x1]  ;;  %v1068_v18 = vld [vmem:[#allocation2] sm:$0xe]  ;;  %v247_v27 = vld [vmem:[%s5371_s20 + $0x50] sm:$0xff] }
  0x53   : > { %v5650_v40 = vld [vmem:[#allocation2 + $0x2c] ss:$0 sps:$4 sm:$0x11]   ;;  %v1395_v48 = vshrl.u32 %v4262_v39, 16  ;;  %v1397_v51 = vshll.u32 %v4262_v39, 16  ;;  %4847 = vmatprep.subr.bf16.mxu1 %v5114_v32  ;;  %v1011_v60 = vsel %vm5402_vm3, %v840_v30, %v1010_v15  ;;  %v649_v0 = vshll.u32 %v4486_v29, 16 }
  0x54   : > { %v1402_v53 = vshll.u32 %v5650_v40, 16  ;;  %1008 = vst [vmem:[#allocation2 + $0xb4] sm:$0xf] %v1007_v43  ;;  %v1537_v56 = vsel %vm1357_vm4, %v1532_v42, %v1536_v34  ;;  %1009 = vst [vmem:[#allocation2 + $0xb8] sm:$0xf] %v839_v54  ;;  %v643_v5 = vor.u32 %v641_v45, %v640_v61  ;;  %v644_v6 = vrot.slane %v640_v61, 4 }
  0x55   : > { %3327 = vmatprep.mubr.bf16.mxu1 %v1537_v56  ;;  %v1399_v62 = vrot.slane %v1397_v51, 1  ;;  %1012 = vst [vmem:[#allocation2 + $0xbc] sm:$0x1] %v1011_v60  ;;  %v648_v7 = vrot.slane %v646_v58, 7  ;;  %v285_v14 = vmul.f32 %v5386_v19, %v246_v49  ;;  %v323_v21 = vadd.f32 %v5391_v20, %v284_v2  ;;  %v5272_v37 = vld [vmem:[#allocation2 + $0x4] sm:$0xf] }
  0x56   : > { %v1404_v63 = vrot.slane %v1402_v53, 1  ;;  %3328 = vmatmul.mubr.bf16.gmra.mxu1 %v4273_v9  ;;  %v930_v13 = vsel %vm5454_vm9, %v643_v5, %v929_v55  ;;  %v5120_v9 = vld [vmem:[%s6970_s1 + $0x120] sm:$0xff]   ;;  %v419_v26 = vsel %vm5402_vm3, 0, %v418_v10  ;;  %v469_v29 = vsel %vm5412_vm5, 0, %v468_v16  ;;  %v1084_v45 = vld [vmem:[#allocation2 + $0xc] sm:$0xf] }
  0x57   : > { %v1400_v8 = vor.u32 %v1399_v62, %v1395_v48  ;;  %v651_v11 = vor.u32 %v649_v0, %v648_v7  ;;  %v653_v12 = vrot.slane %v648_v7, 4  ;;  %931 = vst [vmem:[#allocation2 + $0x30] sm:$0xf] %v930_v13  ;;  %v324_v25 = vadd.f32 %v5391_v20, %v285_v14  ;;  %4742 = vmatpush3.bf16.msra.mxu0 %v5120_v9  ;;  %v5686_v47 = vld [vmem:[#allocation2 + $0x10] sm:$0xf] }
  0x58   : > { %v355_v28 = vmax.f32 %v323_v21, 0.0  ;;  %420 = vst [vmem:[#allocation2 + $0x3c] sm:$0x1] %v419_v26  ;;  %v286_v32 = vmul.f32 %v5386_v19, %v247_v27  ;;  %470 = vst [vmem:[#allocation2 + $0x44] sm:$0x1] %v469_v29  ;;  %v4291_v38 = vcombine.low %v1068_v18, %v5272_v37  ;;  %v5128_v29 = vld [vmem:[%s6970_s1 + $0x158] sm:$0xff]  }
  0x59   : > { %v1405_v17 = vsel %vm1357_vm4, %v1400_v8, %v1404_v63  ;;  %v652_v23 = vsel %vm5439_vm8, %v644_v6, %v651_v11  ;;  %v934_v24 = vsel %vm5402_vm3, %v653_v12, %v933_v3  ;;  %v356_v20 = vmax.f32 %v324_v25, 0.0  ;;  %v5691_v19 = vld [vmem:[%s6972_s3] ss:$0 sm:$0xff]  ;;  %v5274_v58 = vld [vmem:[#allocation2 + $0x8] ss:$0 sps:$4 sm:$0x11]   ;;  %4743 = vmatprep.subr.bf16.mxu0 %v5128_v29 }
  0x5a   : > { %3239 = vmatprep.mubr.bf16.mxu0 %v1405_v17  ;;  %932 = vst [vmem:[#allocation2 + $0x34] sm:$0xf] %v652_v23  ;;  %935 = vst [vmem:[#allocation2 + $0x38] sm:$0x1] %v934_v24  ;;  %v4487_v41 = vpack.c.bf16 %v355_v28, %v355_v28  ;;  %v325_v53 = vadd.f32 %v5691_v19, %v286_v32  ;;  %v1616_v49 = vrot.slane %v5274_v58, 1  ;;  %v1615_v7 = vrot.slane %v4291_v38, 1 }
  0x5b   : > { %v1050_v22 = vld [vmem:[#allocation2 + $0xb4] sm:$0xf]  ;;  %3240 = vmatmul.mubr.bf16.gmra.mxu0 %v4262_v39  ;;  %v1051_v15 = vld [vmem:[#allocation2 + $0xb8] sm:$0xf]  ;;  %v4488_v43 = vpack.c.bf16 %v356_v20, %v356_v20  ;;  %v5694_v63 = vld [vmem:[#allocation2 + $0xc] sm:$0xe]  ;;  %v5705_v6 = vcombine.low %v1084_v45, %v5686_v47 }
  0x5c   : > { %v4274_v33 = vcombine.low %v1050_v22, %v1051_v15  ;;  %v5103_v34 = vld [vmem:[#allocation2 + $0xbc] ss:$0 sps:$4 sm:$0x11]   ;;  %v655_v48 = vshrl.u32 %v4487_v41, 16  ;;  %v658_v51 = vshll.u32 %v4487_v41, 16  ;;  %v357_v25 = vmax.f32 %v325_v53, 0.0 }
  0x5d   : > { %v1546_v42 = vshll.u32 %v5103_v34, 16  ;;  %v663_v60 = vshrl.u32 %v4488_v43, 16  ;;  %v666_v61 = vshll.u32 %v4488_v43, 16  ;;  %v5699_v0 = vld [vmem:[%s6971_s2] ss:$0 sm:$0xff]  ;;  %v4292_v20 = vcombine.low %v5694_v63, %v5518_v52  ;;  %v250_v58 = vld [vmem:[%s5371_s20 + $0x68] sm:$0xff] }
  0x5e   : > { %v1539_v30 = vshrl.u32 %v4274_v33, 16  ;;  %v1541_v39 = vshll.u32 %v4274_v33, 16  ;;  %v1028_v56 = vld [vmem:[#allocation2 + $0x30] sm:$0xf]  ;;  %v657_v62 = vrot.slane %v655_v48, 7  ;;  %v287_v2 = vmul.f32 %v5699_v0, %v248_v44  ;;  %v5131_v44 = vld [vmem:[%s6970_s1 + $0x118] sm:$0xff]  }
  0x5f   : > { %v1548_v55 = vrot.slane %v1546_v42, 1  ;;  %v665_v8 = vrot.slane %v663_v60, 7  ;;  %v421_v3 = vld [vmem:[#allocation2 + $0x48] sm:$0x1]  ;;  %v471_v10 = vld [vmem:[#allocation2 + $0x50] sm:$0x1]  ;;  %v4489_v52 = vpack.c.bf16 %v357_v25, %v357_v25  ;;  %v1617_v48 = vsel %vm1614_vm10, %v1615_v7, %v1616_v49  ;;  %4744 = vmatpush3.bf16.msra.mxu0 %v5131_v44 }
  0x60   : > { %v1543_v54 = vrot.slane %v1541_v39, 1  ;;  %v660_v13 = vor.u32 %v658_v51, %v657_v62  ;;  %v661_v14 = vrot.slane %v657_v62, 4  ;;  %v936_v16 = vld [vmem:[#allocation2 + $0x3c] sm:$0xf]  ;;  %v326_v9 = vadd.f32 %v5691_v19, %v287_v2  ;;  %v940_v22 = vld [vmem:[#allocation2 + $0x44] sm:$0x1] }
  0x61   : > { %v5702_v5 = vld [vmem:[#allocation2 + $0x34] sm:$0xf]  ;;  %v5710_v12 = vld [vmem:[#allocation2 + $0x38] ss:$0 sps:$4 sm:$0x11]   ;;  %v668_v18 = vor.u32 %v666_v61, %v665_v8  ;;  %v670_v21 = vrot.slane %v665_v8, 4  ;;  %v289_v7 = vmul.f32 %v5699_v0, %v250_v58 }
  0x62   : > { %v1544_v4 = vor.u32 %v1543_v54, %v1539_v30  ;;  %v5708_v11 = vcombine.low %v1028_v56, %v5702_v5  ;;  %v1086_v23 = vld [vmem:[#allocation2 + $0x18] sm:$0xf]  ;;  %v5714_v24 = vld [vmem:[#allocation2 + $0x1c] sm:$0xf]  ;;  %v1414_v15 = vshll.u32 %v5710_v12, 16  ;;  %v937_v28 = vsel %vm5454_vm9, %v660_v13, %v936_v16  ;;  %v249_v61 = vld [vmem:[%s5371_s20 + $0x60] sm:$0xff] }
  0x63   : > { %v669_v32 = vsel %vm5439_vm8, %v661_v14, %v668_v18  ;;  %938 = vst [vmem:[#allocation2 + $0x3c] sm:$0xf] %v937_v28  ;;  %v941_v34 = vsel %vm5402_vm3, %v670_v21, %v940_v22  ;;  %v358_v37 = vmax.f32 %v326_v9, 0.0  ;;  %v472_v30 = vsel %vm5412_vm5, 0, %v471_v10  ;;  %v1070_v39 = vld [vmem:[#allocation2 + $0x18] sm:$0xe] }
  0x64   : > { %v1549_v17 = vsel %vm1357_vm4, %v1544_v4, %v1548_v55  ;;  %v1407_v26 = vshrl.u32 %v5708_v11, 16  ;;  %v1409_v27 = vshll.u32 %v5708_v11, 16  ;;  %v1416_v41 = vrot.slane %v1414_v15, 1  ;;  %939 = vst [vmem:[#allocation2 + $0x40] sm:$0xf] %v669_v32  ;;  %v5116_v63 = vld [vmem:[%s6970_s1 + $0x1b8] sm:$0xff]  }
  0x65   : > { %3335 = vmatprep.mubr.bf16.mxu1 %v1549_v17  ;;  %942 = vst [vmem:[#allocation2 + $0x44] sm:$0x1] %v941_v34  ;;  %v1619_v42 = vrot.slane %v5525_v59, 1  ;;  %473 = vst [vmem:[#allocation2 + $0x50] sm:$0x1] %v472_v30  ;;  %v4490_v43 = vpack.c.bf16 %v358_v37, %v358_v37  ;;  %v5741_v51 = vcombine.low %v1086_v23, %v5714_v24  ;;  %v672_v54 = vshrl.u32 %v4489_v52, 16 }
  0x66   : > { %3336 = vmatmul.mubr.bf16.gmra.mxu1 %v4274_v33  ;;  %v1411_v38 = vrot.slane %v1409_v27, 1  ;;  %v422_v33 = vsel %vm5402_vm3, 0, %v421_v3  ;;  %v4293_v53 = vcombine.low %v1070_v39, %v5563_v46  ;;  %v675_v55 = vshll.u32 %v4489_v52, 16  ;;  %v1088_v2 = vld [vmem:[#allocation2 + $0x24] sm:$0xf]  ;;  %v5129_v14 = vld [vmem:[%s6970_s1 + $0x1f0] sm:$0xff]  }
  0x67   : > { %3376 = vmatprep.mubr.bf16.mxu1 %v5705_v6  ;;  %423 = vst [vmem:[#allocation2 + $0x48] sm:$0x1] %v422_v33  ;;  %v680_v56 = vshrl.u32 %v4490_v43, 16  ;;  %v683_v60 = vshll.u32 %v4490_v43, 16  ;;  %v1618_v49 = vrot.slane %v4292_v20, 1  ;;  %v288_v46 = vmul.f32 %v5699_v0, %v249_v61  ;;  %v251_v17 = vld [vmem:[%s5371_s20 + $0x70] sm:$0xff] }
  0x68   : > { %v1412_v45 = vor.u32 %v1411_v38, %v1407_v26  ;;  %v5750_v4 = vld [vmem:[#allocation2 + $0x28] sm:$0xf]  ;;  %v424_v8 = vld [vmem:[#allocation2 + $0x54] sm:$0x1]  ;;  %v474_v3 = vld [vmem:[#allocation2 + $0x5c] sm:$0x1]  ;;  %v328_v26 = vadd.f32 %v5691_v19, %v289_v7  ;;  %v290_v37 = vmul.f32 %v5699_v0, %v251_v17 }
  0x69   : > { %v674_v10 = vrot.slane %v672_v54, 7  ;;  %v682_v13 = vrot.slane %v680_v56, 7  ;;  %v425_v16 = vsel %vm5402_vm3, 0, %v424_v8  ;;  %v475_v9 = vsel %vm5412_vm5, 0, %v474_v3  ;;  %v5132_v23 = vld [vmem:[%s6970_s1 + $0x1b0] sm:$0xff]  }
  0x6a   : > { %v1417_v62 = vsel %vm1357_vm4, %v1412_v45, %v1416_v41  ;;  %v1030_v18 = vld [vmem:[#allocation2 + $0x3c] sm:$0xf]  ;;  %v1621_v21 = vrot.slane %v4293_v53, 1  ;;  %v1622_v22 = vrot.slane %v5571_v50, 1  ;;  %v327_v25 = vadd.f32 %v5691_v19, %v288_v46  ;;  %426 = vst [vmem:[#allocation2 + $0x54] sm:$0x1] %v425_v16 }
  0x6b   : > { %3247 = vmatprep.mubr.bf16.mxu0 %v1417_v62  ;;  %476 = vst [vmem:[#allocation2 + $0x5c] sm:$0x1] %v475_v9  ;;  %v5769_v27 = vld [vmem:[#allocation2 + $0x40] sm:$0xf]  ;;  %v677_v15 = vor.u32 %v675_v55, %v674_v10  ;;  %v678_v28 = vrot.slane %v674_v10, 4  ;;  %v687_v29 = vrot.slane %v682_v13, 4  ;;  %v5783_v30 = vcombine.low %v1088_v2, %v5750_v4 }
  0x6c   : > { %3248 = vmatmul.mubr.bf16.gmra.mxu0 %v5708_v11  ;;  %v685_v11 = vor.u32 %v683_v60, %v682_v13  ;;  %v5772_v50 = vcombine.low %v1030_v18, %v5769_v27  ;;  %v5774_v32 = vld [vmem:[#allocation2 + $0x44] ss:$0 sps:$4 sm:$0x11]   ;;  %v359_v20 = vmax.f32 %v327_v25, 0.0  ;;  %v947_v33 = vld [vmem:[#allocation2 + $0x50] sm:$0x1]  ;;  %v1620_v54 = vsel %vm1614_vm10, %v1618_v49, %v1619_v42 }
  0x6d   : > { %v360_v39 = vmax.f32 %v328_v26, 0.0  ;;  %v1426_v44 = vshll.u32 %v5774_v32, 16  ;;  %v948_v45 = vsel %vm5402_vm3, %v687_v29, %v947_v33  ;;  %v427_v53 = vld [vmem:[#allocation2 + $0x60] sm:$0x1]  ;;  %v5795_v55 = vsel %vm1614_vm10, %v1621_v21, %v1622_v22  ;;  %v477_v61 = vld [vmem:[#allocation2 + $0x68] sm:$0x1] }
  0x6e   : > { %3377 = vmatmul.mubr.bf16.vlgmr.msra.gmra.mxu1 %v1617_v48  ;;  %v943_v34 = vld [vmem:[#allocation2 + $0x48] sm:$0xf]  ;;  %v686_v38 = vsel %vm5439_vm8, %v678_v28, %v685_v11  ;;  %v1419_v52 = vshrl.u32 %v5772_v50, 16  ;;  %v1421_v43 = vshll.u32 %v5772_v50, 16  ;;  %v252_v48 = vld [vmem:[%s5371_s20 + $0x78] sm:$0xff]  ;;  %v4491_v56 = vpack.c.bf16 %v359_v20, %v359_v20  ;;  %v5140_v58 = vld [vmem:[%s6970_s1 + $0x150] sm:$0xff]  }
  0x6f   : > { %4848 = vmatpush3.bf16.msra.mxu1 %v5116_v63  ;;  %3384 = vmatprep.mubr.bf16.mxu1 %v5741_v51  ;;  %v944_v41 = vsel %vm5454_vm9, %v677_v15, %v943_v34  ;;  %946 = vst [vmem:[#allocation2 + $0x4c] sm:$0xf] %v686_v38  ;;  %949 = vst [vmem:[#allocation2 + $0x50] sm:$0x1] %v948_v45  ;;  %v4492_v60 = vpack.c.bf16 %v360_v39, %v360_v39  ;;  %v1428_v63 = vrot.slane %v1426_v44, 1  ;;  %v5144_v25 = vld [vmem:[%s6970_s1 + $0x1e8] sm:$0xff]  }
  0x70   : > { %4849 = vmatprep.subr.bf16.mxu1 %v5129_v14  ;;  %945 = vst [vmem:[#allocation2 + $0x48] sm:$0xf] %v944_v41  ;;  %v1423_v62 = vrot.slane %v1421_v43, 1  ;;  %v291_v2 = vmul.f32 %v5699_v0, %v252_v48  ;;  %v329_v59 = vadd.f32 %v5691_v19, %v290_v37  ;;  %v689_v46 = vshrl.u32 %v4491_v56, 16  ;;  %v1090_v8 = vld [vmem:[#allocation2 + $0x30] sm:$0xf]  ;;  %4745 = vmatprep.subr.bf16.mxu0 %v5140_v58 }
  0x71   : > { %v692_v42 = vshll.u32 %v4491_v56, 16  ;;  %v697_v49 = vshrl.u32 %v4492_v60, 16  ;;  %v700_v7 = vshll.u32 %v4492_v60, 16  ;;  %v1071_v3 = vld [vmem:[#allocation2 + $0x24] sm:$0xe]  ;;  %v1625_v14 = vrot.slane %v5650_v40, 1 }
  0x72   : > { %v1424_v10 = vor.u32 %v1423_v62, %v1419_v52  ;;  %v5802_v13 = vld [vmem:[#allocation2 + $0x34] sm:$0xf]  ;;  %v330_v16 = vadd.f32 %v5691_v19, %v291_v2  ;;  %v361_v9 = vmax.f32 %v329_v59, 0.0  ;;  %v691_v17 = vrot.slane %v689_v46, 7  ;;  %v954_v28 = vld [vmem:[#allocation2 + $0x5c] sm:$0x1] }
  0x73   : > { %4850 = vmatpush3.bf16.msra.mxu1 %v5132_v23  ;;  %v699_v18 = vrot.slane %v697_v49, 7  ;;  %v428_v21 = vsel %vm5402_vm3, 0, %v427_v53  ;;  %v478_v22 = vsel %vm5412_vm5, 0, %v477_v61  ;;  %v5141_v23 = vld [vmem:[%s6970_s1 + $0x110] sm:$0xff]   ;;  %v4294_v11 = vcombine.low %v1071_v3, %v5647_v36  ;;  %v5146_v20 = vld [vmem:[%s6970_s1 + $0x1a8] sm:$0xff]   ;;  %v253_v60 = vld [vmem:[%s5371_s20 + $0x80] sm:$0xff] }
  0x74   : > { %v1429_v26 = vsel %vm1357_vm4, %v1424_v10, %v1428_v63  ;;  %v950_v15 = vld [vmem:[#allocation2 + $0x54] sm:$0xf]  ;;  %v362_v29 = vmax.f32 %v330_v16, 0.0  ;;  %429 = vst [vmem:[#allocation2 + $0x60] sm:$0x1] %v428_v21  ;;  %v4493_v34 = vpack.c.bf16 %v361_v9, %v361_v9  ;;  %v694_v41 = vor.u32 %v692_v42, %v691_v17  ;;  %4746 = vmatpush3.bf16.msra.mxu0 %v5141_v23  ;;  %v254_v49 = vld [vmem:[%s5371_s20 + $0x88] sm:$0xff] }
  0x75   : > { %479 = vst [vmem:[#allocation2 + $0x68] sm:$0x1] %v478_v22  ;;  %3255 = vmatprep.mubr.bf16.mxu0 %v1429_v26  ;;  %v695_v33 = vrot.slane %v691_v17, 4  ;;  %v702_v39 = vor.u32 %v700_v7, %v699_v18  ;;  %v704_v52 = vrot.slane %v699_v18, 4  ;;  %v5829_v44 = vcombine.low %v1090_v8, %v5802_v13  ;;  %4851 = vmatprep.subr.bf16.mxu1 %v5144_v25  ;;  %v1072_v42 = vld [vmem:[#allocation2 + $0x30] sm:$0xe] }
  0x76   : > { %3385 = vmatmul.mubr.bf16.gmra.mxu1 %v1620_v54  ;;  %v5822_v38 = vld [vmem:[#allocation2 + $0x4c] sm:$0xf]  ;;  %3256 = vmatmul.mubr.bf16.gmra.mxu0 %v5772_v50  ;;  %v5826_v43 = vld [vmem:[#allocation2 + $0x50] ss:$0 sps:$4 sm:$0x11]   ;;  %v4494_v45 = vpack.c.bf16 %v362_v29, %v362_v29  ;;  %v706_v48 = vshrl.u32 %v4493_v34, 16  ;;  %v951_v54 = vsel %vm5454_vm9, %v694_v41, %v950_v15  ;;  %v4295_v21 = vcombine.low %v1072_v42, %v5702_v5 }
  0x77   : > { %3392 = vmatprep.mubr.bf16.mxu1 %v5783_v30  ;;  %v1032_v37 = vld [vmem:[#allocation2 + $0x48] sm:$0xf]  ;;  %v703_v53 = vsel %vm5439_vm8, %v695_v33, %v702_v39  ;;  %v955_v50 = vsel %vm5402_vm3, %v704_v52, %v954_v28  ;;  %v709_v56 = vshll.u32 %v4493_v34, 16  ;;  %4852 = vmatpush3.bf16.msra.mxu1 %v5146_v20  ;;  %v1438_v62 = vshll.u32 %v5826_v43, 16  ;;  %952 = vst [vmem:[#allocation2 + $0x54] sm:$0xf] %v951_v54 }
  0x78   : > { %v4265_v36 = vcombine.low %v1032_v37, %v5822_v38  ;;  %953 = vst [vmem:[#allocation2 + $0x58] sm:$0xf] %v703_v53  ;;  %956 = vst [vmem:[#allocation2 + $0x5c] sm:$0x1] %v955_v50  ;;  %v708_v63 = vrot.slane %v706_v48, 7  ;;  %v1624_v2 = vrot.slane %v4294_v11, 1  ;;  %v292_v23 = vmul.f32 %v5699_v0, %v253_v60 }
  0x79   : > { %v714_v59 = vshrl.u32 %v4494_v45, 16  ;;  %v717_v46 = vshll.u32 %v4494_v45, 16  ;;  %v1440_v8 = vrot.slane %v1438_v62, 1  ;;  %v5151_v16 = vld [vmem:[%s6970_s1 + $0x148] sm:$0xff]   ;;  %v1628_v22 = vrot.slane %v5710_v12, 1 }
  0x7a   : > { %v1431_v61 = vshrl.u32 %v4265_v36, 16  ;;  %v1433_v58 = vshll.u32 %v4265_v36, 16  ;;  %v711_v3 = vor.u32 %v709_v56, %v708_v63  ;;  %v712_v10 = vrot.slane %v708_v63, 4  ;;  %v430_v28 = vld [vmem:[#allocation2 + $0x6c] sm:$0x1]  ;;  %4747 = vmatprep.subr.bf16.mxu0 %v5151_v16 }
  0x7b   : > { %v716_v9 = vrot.slane %v714_v59, 7  ;;  %v957_v17 = vld [vmem:[#allocation2 + $0x60] sm:$0xf]  ;;  %v293_v15 = vmul.f32 %v5699_v0, %v254_v49  ;;  %v480_v11 = vld [vmem:[#allocation2 + $0x74] sm:$0x1]  ;;  %v1627_v12 = vrot.slane %v4295_v21, 1  ;;  %v331_v20 = vadd.f32 %v5691_v19, %v292_v23 }
  0x7c   : > { %v1435_v7 = vrot.slane %v1433_v58, 1  ;;  %v961_v18 = vld [vmem:[#allocation2 + $0x68] sm:$0x1]  ;;  %v958_v26 = vsel %vm5454_vm9, %v711_v3, %v957_v17  ;;  %v1092_v34 = vld [vmem:[#allocation2 + $0x3c] sm:$0xf]  ;;  %v431_v33 = vsel %vm5402_vm3, 0, %v430_v28  ;;  %v1626_v48 = vsel %vm1614_vm10, %v1624_v2, %v1625_v14 }
  0x7d   : > { %v721_v29 = vrot.slane %v716_v9, 4  ;;  %959 = vst [vmem:[#allocation2 + $0x60] sm:$0xf] %v958_v26  ;;  %v5851_v5 = vld [vmem:[#allocation2 + $0x40] sm:$0xf]  ;;  %v332_v41 = vadd.f32 %v5691_v19, %v293_v15  ;;  %v481_v39 = vsel %vm5412_vm5, 0, %v480_v11  ;;  %v1629_v58 = vsel %vm1614_vm10, %v1627_v12, %v1628_v22 }
  0x7e   : > { %3393 = vmatmul.mubr.bf16.gmra.mxu1 %v5795_v55  ;;  %v1436_v25 = vor.u32 %v1435_v7, %v1431_v61  ;;  %v719_v55 = vor.u32 %v717_v46, %v716_v9  ;;  %v1034_v52 = vld [vmem:[#allocation2 + $0x54] sm:$0xf]  ;;  %432 = vst [vmem:[#allocation2 + $0x6c] sm:$0x1] %v431_v33  ;;  %482 = vst [vmem:[#allocation2 + $0x74] sm:$0x1] %v481_v39  ;;  %v5873_v40 = vcombine.low %v1092_v34, %v5851_v5 }
  0x7f   : > { %3400 = vmatprep.mubr.bf16.mxu1 %v5829_v44  ;;  %v5860_v45 = vld [vmem:[#allocation2 + $0x58] sm:$0xf]  ;;  %v962_v54 = vsel %vm5402_vm3, %v721_v29, %v961_v18  ;;  %v5870_v56 = vld [vmem:[#allocation2 + $0x5c] ss:$0 sps:$4 sm:$0x11]   ;;  %v363_v14 = vmax.f32 %v331_v20, 0.0 }
  0x80   : > { %v1441_v37 = vsel %vm1357_vm4, %v1436_v25, %v1440_v8  ;;  %v720_v53 = vsel %vm5439_vm8, %v712_v10, %v719_v55  ;;  %v4266_v50 = vcombine.low %v1034_v52, %v5860_v45  ;;  %963 = vst [vmem:[#allocation2 + $0x68] sm:$0x1] %v962_v54  ;;  %v364_v60 = vmax.f32 %v332_v41, 0.0  ;;  %v5153_v61 = vld [vmem:[%s6970_s1 + $0x108] sm:$0xff]   ;;  %v255_v7 = vld [vmem:[%s5371_s20 + $0x90] sm:$0xff]  ;;  %v256_v10 = vld [vmem:[%s5371_s20 + $0x98] sm:$0xff] }
  0x81   : > { %3263 = vmatprep.mubr.bf16.mxu0 %v1441_v37  ;;  %960 = vst [vmem:[#allocation2 + $0x64] sm:$0xf] %v720_v53  ;;  %v1631_v62 = vrot.slane %v5774_v32, 1  ;;  %v1450_v59 = vshll.u32 %v5870_v56, 16  ;;  %v4495_v46 = vpack.c.bf16 %v363_v14, %v363_v14  ;;  %v1094_v42 = vld [vmem:[#allocation2 + $0x48] sm:$0xf]  ;;  %4748 = vmatpush3.bf16.msra.mxu0 %v5153_v61  ;;  %v294_v16 = vmul.f32 %v5699_v0, %v255_v7 }
  0x82   : > { %3264 = vmatmul.mubr.bf16.gmra.mxu0 %v4265_v36  ;;  %v1073_v36 = vld [vmem:[#allocation2 + $0x3c] sm:$0xe]  ;;  %v1443_v63 = vshrl.u32 %v4266_v50, 16  ;;  %v1445_v2 = vshll.u32 %v4266_v50, 16  ;;  %v5881_v49 = vld [vmem:[#allocation2 + $0x4c] sm:$0xf]  ;;  %v4496_v8 = vpack.c.bf16 %v364_v60, %v364_v60  ;;  %v295_v11 = vmul.f32 %v5699_v0, %v256_v10 }
  0x83   : > { %v4296_v3 = vcombine.low %v1073_v36, %v5769_v27  ;;  %v433_v9 = vld [vmem:[#allocation2 + $0x78] sm:$0x1]  ;;  %v1634_v17 = vrot.slane %v5826_v43, 1  ;;  %v1452_v21 = vrot.slane %v1450_v59, 1  ;;  %v723_v23 = vshrl.u32 %v4495_v46, 16  ;;  %v5158_v27 = vld [vmem:[%s6970_s1 + $0x1e0] sm:$0xff]  }
  0x84   : > { %v1447_v18 = vrot.slane %v1445_v2, 1  ;;  %v1036_v22 = vld [vmem:[#allocation2 + $0x60] sm:$0xf]  ;;  %v726_v25 = vshll.u32 %v4495_v46, 16  ;;  %v731_v26 = vshrl.u32 %v4496_v8, 16  ;;  %v734_v15 = vshll.u32 %v4496_v8, 16  ;;  %4853 = vmatprep.subr.bf16.mxu1 %v5158_v27 }
  0x85   : > { %v1630_v28 = vrot.slane %v4296_v3, 1  ;;  %v483_v55 = vld [vmem:[#allocation2 + $0x80] sm:$0x1]  ;;  %v725_v34 = vrot.slane %v723_v23, 7  ;;  %v964_v12 = vld [vmem:[#allocation2 + $0x6c] sm:$0xf]  ;;  %v333_v20 = vadd.f32 %v5691_v19, %v294_v16  ;;  %v5899_v39 = vcombine.low %v1094_v42, %v5881_v49 }
  0x86   : > { %3401 = vmatmul.mubr.bf16.gmra.mxu1 %v1626_v48  ;;  %v1448_v29 = vor.u32 %v1447_v18, %v1443_v63  ;;  %v434_v37 = vsel %vm5402_vm3, 0, %v433_v9  ;;  %v733_v33 = vrot.slane %v731_v26, 7  ;;  %v334_v52 = vadd.f32 %v5691_v19, %v295_v11  ;;  %v968_v36 = vld [vmem:[#allocation2 + $0x74] sm:$0x1]  ;;  %v5160_v42 = vld [vmem:[%s6970_s1 + $0x1a0] sm:$0xff]  }
  0x87   : > { %3408 = vmatprep.mubr.bf16.mxu1 %v5873_v40  ;;  %435 = vst [vmem:[#allocation2 + $0x78] sm:$0x1] %v434_v37  ;;  %v484_v48 = vsel %vm5412_vm5, 0, %v483_v55  ;;  %v5908_v14 = vld [vmem:[#allocation2 + $0x68] ss:$0 sps:$4 sm:$0x11]   ;;  %v728_v60 = vor.u32 %v726_v25, %v725_v34  ;;  %4854 = vmatpush3.bf16.msra.mxu1 %v5160_v42 }
  0x88   : > { %v5896_v41 = vld [vmem:[#allocation2 + $0x64] sm:$0xf]  ;;  %v1453_v53 = vsel %vm1357_vm4, %v1448_v29, %v1452_v21  ;;  %v729_v61 = vrot.slane %v725_v34, 4  ;;  %485 = vst [vmem:[#allocation2 + $0x80] sm:$0x1] %v484_v48  ;;  %v736_v63 = vor.u32 %v734_v15, %v733_v33  ;;  %v738_v2 = vrot.slane %v733_v33, 4 }
  0x89   : > { %v5906_v54 = vcombine.low %v1036_v22, %v5896_v41  ;;  %3271 = vmatprep.mubr.bf16.mxu0 %v1453_v53  ;;  %v365_v59 = vmax.f32 %v333_v20, 0.0  ;;  %v366_v46 = vmax.f32 %v334_v52, 0.0  ;;  %v1462_v3 = vshll.u32 %v5908_v14, 16  ;;  %v257_v16 = vld [vmem:[%s5371_s20 + $0xa0] sm:$0xff]  ;;  %v1096_v22 = vld [vmem:[#allocation2 + $0x54] sm:$0xf] }
  0x8a   : > { %3272 = vmatmul.mubr.bf16.gmra.mxu0 %v4266_v50  ;;  %v965_v10 = vsel %vm5454_vm9, %v728_v60, %v964_v12  ;;  %v737_v9 = vsel %vm5439_vm8, %v729_v61, %v736_v63  ;;  %v969_v18 = vsel %vm5402_vm3, %v738_v2, %v968_v36  ;;  %v5923_v23 = vld [vmem:[#allocation2 + $0x58] sm:$0xf]  ;;  %v1074_v25 = vld [vmem:[#allocation2 + $0x48] sm:$0xe]  ;;  %v5163_v34 = vld [vmem:[%s6970_s1 + $0x140] sm:$0xff]   ;;  %v1632_v20 = vsel %vm1614_vm10, %v1630_v28, %v1631_v62 }
  0x8b   : > { %v1455_v7 = vshrl.u32 %v5906_v54, 16  ;;  %v1457_v8 = vshll.u32 %v5906_v54, 16  ;;  %966 = vst [vmem:[#allocation2 + $0x6c] sm:$0xf] %v965_v10  ;;  %v4497_v50 = vpack.c.bf16 %v365_v59, %v365_v59  ;;  %v4498_v21 = vpack.c.bf16 %v366_v46, %v366_v46  ;;  %967 = vst [vmem:[#allocation2 + $0x70] sm:$0xf] %v737_v9  ;;  %4749 = vmatprep.subr.bf16.mxu0 %v5163_v34 }
  0x8c   : > { %v1464_v15 = vrot.slane %v1462_v3, 1  ;;  %970 = vst [vmem:[#allocation2 + $0x74] sm:$0x1] %v969_v18  ;;  %v258_v29 = vld [vmem:[%s5371_s20 + $0xa8] sm:$0xff]  ;;  %v4297_v33 = vcombine.low %v1074_v25, %v5822_v38  ;;  %v296_v52 = vmul.f32 %v5699_v0, %v257_v16  ;;  %v436_v48 = vld [vmem:[#allocation2 + $0x84] sm:$0x1]  ;;  %v5946_v28 = vcombine.low %v1096_v22, %v5923_v23 }
  0x8d   : > { %v1459_v26 = vrot.slane %v1457_v8, 1  ;;  %v743_v11 = vshll.u32 %v4497_v50, 16  ;;  %v748_v55 = vshrl.u32 %v4498_v21, 16  ;;  %v751_v27 = vshll.u32 %v4498_v21, 16  ;;  %v5164_v53 = vld [vmem:[%s6970_s1 + $0x100] sm:$0xff]   ;;  %v5171_v38 = vld [vmem:[%s6970_s1 + $0x1d8] sm:$0xff]  }
  0x8e   : > { %3409 = vmatmul.mubr.bf16.gmra.mxu1 %v1629_v58  ;;  %v740_v58 = vshrl.u32 %v4497_v50, 16  ;;  %v971_v37 = vld [vmem:[#allocation2 + $0x78] sm:$0xf]  ;;  %v297_v63 = vmul.f32 %v5699_v0, %v258_v29  ;;  %v437_v32 = vsel %vm5402_vm3, 0, %v436_v48  ;;  %v1633_v2 = vrot.slane %v4297_v33, 1  ;;  %4750 = vmatpush3.bf16.msra.mxu0 %v5164_v53 }
  0x8f   : > { %3416 = vmatprep.mubr.bf16.mxu1 %v5899_v39  ;;  %v1460_v12 = vor.u32 %v1459_v26, %v1455_v7  ;;  %v750_v61 = vrot.slane %v748_v55, 7  ;;  %v975_v36 = vld [vmem:[#allocation2 + $0x80] sm:$0x1]  ;;  %v335_v59 = vadd.f32 %v5691_v19, %v296_v52  ;;  %438 = vst [vmem:[#allocation2 + $0x84] sm:$0x1] %v437_v32  ;;  %4855 = vmatprep.subr.bf16.mxu1 %v5171_v38  ;;  %v5977_v52 = vld [vmem:[%s6970_s1 + $0x238] sm:$0xff]  }
  0x90   : > { %v742_v60 = vrot.slane %v740_v58, 7  ;;  %v486_v46 = vld [vmem:[#allocation2 + $0x8c] sm:$0x1]  ;;  %v336_v10 = vadd.f32 %v5691_v19, %v297_v63  ;;  %v5965_v58 = vld [vmem:[#allocation2 + $0x64] sm:$0xf]  ;;  %4983 = vmatprep.subr.bf16.mxu0 %v5977_v52 }
  0x91   : > { %v1465_v62 = vsel %vm1357_vm4, %v1460_v12, %v1464_v15  ;;  %v753_v7 = vor.u32 %v751_v27, %v750_v61  ;;  %v755_v8 = vrot.slane %v750_v61, 4  ;;  %v367_v16 = vmax.f32 %v335_v59, 0.0  ;;  %v1075_v34 = vld [vmem:[#allocation2 + $0x54] sm:$0xe] }
  0x92   : > { %3279 = vmatprep.mubr.bf16.mxu0 %v1465_v62  ;;  %v745_v0 = vor.u32 %v743_v11, %v742_v60  ;;  %v746_v42 = vrot.slane %v742_v60, 4  ;;  %v1038_v3 = vld [vmem:[#allocation2 + $0x6c] sm:$0xf]  ;;  %v487_v9 = vsel %vm5412_vm5, 0, %v486_v46  ;;  %v5953_v18 = vld [vmem:[#allocation2 + $0x70] sm:$0xf]  ;;  %v1635_v12 = vsel %vm1614_vm10, %v1633_v2, %v1634_v17 }
  0x93   : > { %3280 = vmatmul.mubr.bf16.gmra.mxu0 %v5906_v54  ;;  %v976_v22 = vsel %vm5402_vm3, %v755_v8, %v975_v36  ;;  %488 = vst [vmem:[#allocation2 + $0x8c] sm:$0x1] %v487_v9  ;;  %v1098_v54 = vld [vmem:[#allocation2 + $0x60] sm:$0xf]  ;;  %v4268_v19 = vcombine.low %v1038_v3, %v5953_v18  ;;  %v368_v26 = vmax.f32 %v336_v10, 0.0  ;;  %v4499_v15 = vpack.c.bf16 %v367_v16, %v367_v16  ;;  %v5174_v17 = vld [vmem:[%s6970_s1 + $0x198] sm:$0xff]  }
  0x94   : > { %v754_v50 = vsel %vm5439_vm8, %v746_v42, %v753_v7  ;;  %v972_v21 = vsel %vm5454_vm9, %v745_v0, %v971_v37  ;;  %v5962_v25 = vld [vmem:[#allocation2 + $0x74] ss:$0 sps:$4 sm:$0x11]   ;;  %977 = vst [vmem:[#allocation2 + $0x80] sm:$0x1] %v976_v22  ;;  %v5972_v33 = vcombine.low %v1098_v54, %v5965_v58  ;;  %v4298_v43 = vcombine.low %v1075_v34, %v5860_v45 }
  0x95   : > { %973 = vst [vmem:[#allocation2 + $0x78] sm:$0xf] %v972_v21  ;;  %974 = vst [vmem:[#allocation2 + $0x7c] sm:$0xf] %v754_v50  ;;  %v1467_v11 = vshrl.u32 %v4268_v19, 16  ;;  %v1469_v55 = vshll.u32 %v4268_v19, 16  ;;  %v4500_v29 = vpack.c.bf16 %v368_v26, %v368_v26  ;;  %4856 = vmatpush3.bf16.msra.mxu1 %v5174_v17 }
  0x96   : > { %3417 = vmatmul.mubr.bf16.gmra.mxu1 %v1632_v20  ;;  %v1474_v27 = vshll.u32 %v5962_v25, 16  ;;  %v757_v20 = vshrl.u32 %v4499_v15, 16  ;;  %v760_v37 = vshll.u32 %v4499_v15, 16  ;;  %v978_v63 = vld [vmem:[#allocation2 + $0x84] sm:$0xf]  ;;  %v1637_v2 = vrot.slane %v5870_v56, 1 }
  0x97   : > { %3424 = vmatprep.mubr.bf16.mxu1 %v5946_v28  ;;  %v1471_v48 = vrot.slane %v1469_v55, 1  ;;  %v765_v60 = vshrl.u32 %v4500_v29, 16  ;;  %v768_v61 = vshll.u32 %v4500_v29, 16  ;;  %v1100_v59 = vld [vmem:[#allocation2 + $0x6c] sm:$0xf]  ;;  %v1636_v50 = vrot.slane %v4298_v43, 1 }
  0x98   : > { %v1476_v53 = vrot.slane %v1474_v27, 1  ;;  %v759_v36 = vrot.slane %v757_v20, 7  ;;  %v5985_v46 = vld [vmem:[#allocation2 + $0x70] sm:$0xf] }
  0x99   : > { %v1472_v32 = vor.u32 %v1471_v48, %v1467_v11  ;;  %v767_v38 = vrot.slane %v765_v60, 7  ;;  %v5182_v15 = vld [vmem:[%s6970_s1 + $0x1d0] sm:$0xff]   ;;  %v6005_v55 = vcombine.low %v1100_v59, %v5985_v46  ;;  %v1638_v34 = vsel %vm1614_vm10, %v1636_v50, %v1637_v2  ;;  %v1132_v48 = vld [vmem:[#allocation2 + $0xc] sm:$0xe] }
  0x9a   : > { %v982_v62 = vld [vmem:[#allocation2 + $0x8c] sm:$0x1]  ;;  %v762_v7 = vor.u32 %v760_v37, %v759_v36  ;;  %v763_v10 = vrot.slane %v759_v36, 4  ;;  %4857 = vmatprep.subr.bf16.mxu1 %v5182_v15  ;;  %v5185_v37 = vld [vmem:[%s6970_s1 + $0x190] sm:$0xff]  }
  0x9b   : > { %v1477_v45 = vsel %vm1357_vm4, %v1472_v32, %v1476_v53  ;;  %v5991_v3 = vld [vmem:[#allocation2 + $0x80] ss:$0 sps:$4 sm:$0x11]   ;;  %v770_v16 = vor.u32 %v768_v61, %v767_v38  ;;  %v772_v56 = vrot.slane %v767_v38, 4  ;;  %v1826_v53 = vshll.u32 %v5705_v6, 16  ;;  %4858 = vmatpush3.bf16.msra.mxu1 %v5185_v37 }
  0x9c   : > { %v1040_v0 = vld [vmem:[#allocation2 + $0x78] sm:$0xf]  ;;  %v5987_v42 = vld [vmem:[#allocation2 + $0x7c] sm:$0xf]  ;;  %3287 = vmatprep.mubr.bf16.mxu0 %v1477_v45  ;;  %v979_v9 = vsel %vm5454_vm9, %v762_v7, %v978_v63  ;;  %v1486_v54 = vshll.u32 %v5991_v3, 16  ;;  %v1640_v61 = vrot.slane %v5908_v14, 1  ;;  %v4339_v32 = vcombine.low %v1132_v48, %v5686_v47 }
  0x9d   : > { %v4269_v8 = vcombine.low %v1040_v0, %v5987_v42  ;;  %3288 = vmatmul.mubr.bf16.gmra.mxu0 %v4268_v19  ;;  %v771_v26 = vsel %vm5439_vm8, %v763_v10, %v770_v16  ;;  %980 = vst [vmem:[#allocation2 + $0x84] sm:$0xf] %v979_v9  ;;  %v983_v11 = vsel %vm5402_vm3, %v772_v56, %v982_v62  ;;  %v1076_v19 = vld [vmem:[#allocation2 + $0x60] sm:$0xe]  ;;  %v1077_v63 = vld [vmem:[#allocation2 + $0x6c] sm:$0xe] }
  0x9e   : > { %3425 = vmatmul.mubr.bf16.gmra.mxu1 %v1635_v12  ;;  %981 = vst [vmem:[#allocation2 + $0x88] sm:$0xf] %v771_v26  ;;  %v1488_v29 = vrot.slane %v1486_v54, 1  ;;  %984 = vst [vmem:[#allocation2 + $0x8c] sm:$0x1] %v983_v11  ;;  %v4299_v12 = vcombine.low %v1076_v19, %v5896_v41  ;;  %v4300_v2 = vcombine.low %v1077_v63, %v5953_v18  ;;  %v1824_v0 = vshrl.u32 %v5705_v6, 16 }
  0x9f   : > { %3432 = vmatprep.mubr.bf16.mxu1 %v5972_v33  ;;  %v1479_v21 = vshrl.u32 %v4269_v8, 16  ;;  %v1481_v22 = vshll.u32 %v4269_v8, 16  ;;  %v1102_v43 = vld [vmem:[#allocation2 + $0x78] sm:$0xf]  ;;  %v6016_v17 = vld [vmem:[#allocation2 + $0x7c] sm:$0xf] }
  0xa0   : > { %v1639_v60 = vrot.slane %v4299_v12, 1  ;;  %v5168_v62 = vld [vmem:[#allocation2 + $0x14] ss:$0 sps:$4 sm:$0x11]   ;;  %v1828_v7 = vrot.slane %v1826_v53, 1  ;;  %v6028_v10 = vcombine.low %v1102_v43, %v6016_v17  ;;  %v5193_v18 = vld [vmem:[%s6970_s1 + $0x1c8] sm:$0xff]  }
  0xa1   : > { %v1483_v27 = vrot.slane %v1481_v22, 1  ;;  %v1133_v16 = vld [vmem:[#allocation2 + $0x18] sm:$0xe]  ;;  %v2079_v9 = vrot.slane %v4339_v32, 1  ;;  %v2080_v50 = vrot.slane %v5168_v62, 1  ;;  %v1643_v6 = vrot.slane %v5962_v25, 1  ;;  %4859 = vmatprep.subr.bf16.mxu1 %v5193_v18 }
  0xa2   : > { %v1641_v45 = vsel %vm1614_vm10, %v1639_v60, %v1640_v61  ;;  %v1078_v15 = vld [vmem:[#allocation2 + $0x78] sm:$0xe]  ;;  %v1838_v53 = vshll.u32 %v5741_v51, 16  ;;  %v1829_v60 = vor.u32 %v1828_v7, %v1824_v0  ;;  %v1134_v61 = vld [vmem:[#allocation2 + $0x24] sm:$0xe] }
  0xa3   : > { %v1484_v20 = vor.u32 %v1483_v27, %v1479_v21  ;;  %v1642_v21 = vrot.slane %v4300_v2, 1  ;;  %v4340_v27 = vcombine.low %v1133_v16, %v5714_v24  ;;  %v2081_v12 = vsel %vm1614_vm10, %v2079_v9, %v2080_v50  ;;  %v5196_v24 = vld [vmem:[%s6970_s1 + $0x188] sm:$0xff]   ;;  %v1106_v2 = vld [vmem:[#allocation2 + $0x90] sm:$0xf]  ;;  %v6057_v0 = vld [vmem:[#allocation2 + $0x94] sm:$0xf] }
  0xa4   : > { %v1042_v41 = vld [vmem:[#allocation2 + $0x84] sm:$0xf]  ;;  %v4301_v25 = vcombine.low %v1078_v15, %v5987_v42  ;;  %4860 = vmatpush3.bf16.msra.mxu1 %v5196_v24  ;;  %v1840_v16 = vrot.slane %v1838_v53, 1  ;;  %v6067_v9 = vcombine.low %v1106_v2, %v6057_v0  ;;  %v5186_v53 = vld [vmem:[#allocation2 + $0x38] ss:$0 sps:$4 sm:$0x11]  }
  0xa5   : > { %v1489_v36 = vsel %vm1357_vm4, %v1484_v20, %v1488_v29  ;;  %v6019_v38 = vld [vmem:[#allocation2 + $0x88] sm:$0xf]  ;;  %v6023_v59 = vld [vmem:[#allocation2 + $0x8c] ss:$0 sps:$4 sm:$0x11]   ;;  %v1831_v29 = vshll.u32 %v5168_v62, 16  ;;  %v1644_v37 = vsel %vm1614_vm10, %v1642_v21, %v1643_v6 }
  0xa6   : > { %3433 = vmatmul.mubr.bf16.gmra.mxu1 %v1638_v34  ;;  %3295 = vmatprep.mubr.bf16.mxu0 %v1489_v36  ;;  %v4270_v14 = vcombine.low %v1042_v41, %v6019_v38  ;;  %v1498_v56 = vshll.u32 %v6023_v59, 16  ;;  %v1104_v26 = vld [vmem:[#allocation2 + $0x84] sm:$0xf]  ;;  %v6036_v19 = vld [vmem:[#allocation2 + $0x88] sm:$0xf]  ;;  %v1850_v36 = vshll.u32 %v5783_v30, 16 }
  0xa7   : > { %3440 = vmatprep.mubr.bf16.mxu1 %v6005_v55  ;;  %3296 = vmatmul.mubr.bf16.gmra.mxu0 %v4269_v8  ;;  %v5175_v20 = vld [vmem:[#allocation2 + $0x20] ss:$0 sps:$4 sm:$0x11]   ;;  %v6044_v48 = vcombine.low %v1104_v26, %v6036_v19  ;;  %v1833_v63 = vrot.slane %v1831_v29, 1  ;;  %v2082_v42 = vrot.slane %v4340_v27, 1  ;;  %v1836_v41 = vshrl.u32 %v5741_v51, 16 }
  0xa8   : > { %v1491_v47 = vshrl.u32 %v4270_v14, 16  ;;  %v1493_v8 = vshll.u32 %v4270_v14, 16  ;;  %v1500_v54 = vrot.slane %v1498_v56, 1  ;;  %v2083_v43 = vrot.slane %v5175_v20, 1  ;;  %v1079_v7 = vld [vmem:[#allocation2 + $0x84] sm:$0xe] }
  0xa9   : > { %v1645_v32 = vrot.slane %v4301_v25, 1  ;;  %v1646_v62 = vrot.slane %v5991_v3, 1  ;;  %v1834_v51 = vsel %vm1357_vm4, %v1829_v60, %v1833_v63  ;;  %v5183_v56 = vld [vmem:[%s6970_s1 + $0x230] sm:$0xff]   ;;  %v4302_v50 = vcombine.low %v1079_v7, %v6019_v38  ;;  %v5194_v27 = vld [vmem:[%s6970_s1 + $0x228] sm:$0xff]   ;;  %v1108_v29 = vld [vmem:[#allocation2 + $0x9c] sm:$0xf] }
  0xaa   : > { %v1495_v22 = vrot.slane %v1493_v8, 1  ;;  %v2084_v3 = vsel %vm1614_vm10, %v2082_v42, %v2083_v43  ;;  %v5179_v8 = vld [vmem:[#allocation2 + $0x2c] ss:$0 sps:$4 sm:$0x11]   ;;  %v1841_v21 = vor.u32 %v1840_v16, %v1836_v41  ;;  %v1848_v26 = vshrl.u32 %v5783_v30, 16  ;;  %v268_v7 = vld [vmem:[%s5371_s20 + $0xf8] sm:$0xff] }
  0xab   : > { %v1647_v18 = vsel %vm1614_vm10, %v1645_v32, %v1646_v62  ;;  %v1852_v15 = vrot.slane %v1850_v36, 1  ;;  %v1648_v38 = vrot.slane %v4302_v50, 1  ;;  %v5207_v36 = vld [vmem:[%s6970_s1 + $0x180] sm:$0xff]   ;;  %v1136_v63 = vld [vmem:[#allocation2 + $0x3c] sm:$0xe]  ;;  %v1874_v42 = vshll.u32 %v5873_v40, 16 }
  0xac   : > { %v1496_v11 = vor.u32 %v1495_v22, %v1491_v47  ;;  %v1843_v47 = vshll.u32 %v5175_v20, 16  ;;  %v1862_v20 = vshll.u32 %v5829_v44, 16  ;;  %v267_v32 = vld [vmem:[%s5371_s20 + $0xf0] sm:$0xff]  ;;  %v1860_v2 = vshrl.u32 %v5829_v44, 16  ;;  %v451_v16 = vld [vmem:[#allocation2 + $0xc0] sm:$0x1] }
  0xad   : > { %v1853_v41 = vor.u32 %v1852_v15, %v1848_v26  ;;  %v1110_v44 = vld [vmem:[#allocation2 + $0xa8] sm:$0xf]  ;;  %v1081_v26 = vld [vmem:[#allocation2 + $0x9c] sm:$0xe] }
  0xae   : > { %3441 = vmatmul.mubr.bf16.gmra.mxu1 %v1641_v45  ;;  %v1501_v34 = vsel %vm1357_vm4, %v1496_v11, %v1500_v54  ;;  %v4341_v45 = vcombine.low %v1134_v61, %v5750_v4  ;;  %v1135_v4 = vld [vmem:[#allocation2 + $0x30] sm:$0xe]  ;;  %v1845_v6 = vrot.slane %v1843_v47, 1  ;;  %v2086_v54 = vrot.slane %v5179_v8, 1  ;;  %v5276_v61 = vld [vmem:[#allocation2 + $0x94] sm:$0xf] }
  0xaf   : > { %3448 = vmatprep.mubr.bf16.mxu1 %v6028_v10  ;;  %3303 = vmatprep.mubr.bf16.mxu0 %v1501_v34  ;;  %v1855_v11 = vshll.u32 %v5179_v8, 16  ;;  %v6077_v34 = vld [vmem:[#allocation2 + $0xa0] sm:$0xf]  ;;  %v4342_v30 = vcombine.low %v1135_v4, %v5802_v13  ;;  %v2089_v47 = vrot.slane %v5186_v53, 1  ;;  %v6101_v4 = vld [vmem:[#allocation2 + $0xac] sm:$0xf] }
  0xb0   : > { %3304 = vmatmul.mubr.bf16.gmra.mxu0 %v4270_v14  ;;  %v5204_v14 = vld [vmem:[%s6970_s1 + $0x1c0] sm:$0xff]   ;;  %v2085_v22 = vrot.slane %v4341_v45, 1  ;;  %v1846_v25 = vsel %vm1357_vm4, %v1841_v21, %v1845_v6  ;;  %v6088_v24 = vcombine.low %v1108_v29, %v6077_v34  ;;  %v5278_v8 = vld [vmem:[#allocation2 + $0x98] ss:$0 sps:$4 sm:$0x11]  }
  0xb1   : > { %3537 = vmatprep.mubr.bf16.mxu0 %v2081_v12  ;;  %4861 = vmatprep.subr.bf16.mxu1 %v5204_v14  ;;  %v1080_v12 = vld [vmem:[#allocation2 + $0x90] sm:$0xe]  ;;  %v1857_v43 = vrot.slane %v1855_v11, 1  ;;  %v2088_v62 = vrot.slane %v4342_v30, 1  ;;  %v1864_v14 = vrot.slane %v1862_v20, 1  ;;  %v6115_v30 = vcombine.low %v1110_v44, %v6101_v4 }
  0xb2   : > { %v4303_v13 = vcombine.low %v1080_v12, %v5276_v61  ;;  %v5277_v45 = vld [vmem:[%s6971_s2] ss:$0 sm:$0xff]  ;;  %4862 = vmatpush3.bf16.msra.mxu1 %v5207_v36  ;;  %v1876_v61 = vrot.slane %v1874_v42, 1  ;;  %v1137_v36 = vld [vmem:[#allocation2 + $0x48] sm:$0xe] }
  0xb3   : > { %v5279_v21 = vld [vmem:[%s6972_s3] ss:$0 sm:$0xff]  ;;  %v1858_v11 = vsel %vm1357_vm4, %v1853_v41, %v1857_v43  ;;  %v1865_v29 = vor.u32 %v1864_v14, %v1860_v2  ;;  %v6123_v42 = vld [vmem:[#allocation2 + $0xb8] sm:$0xf] }
  0xb4   : > { %v1651_v50 = vrot.slane %v4303_v13, 1 }
  0xb6   : > { %3449 = vmatmul.mubr.bf16.gmra.mxu1 %v1644_v37  ;;  %v2087_v37 = vsel %vm1614_vm10, %v2085_v22, %v2086_v54  ;;  %v452_v22 = vsel %vm5402_vm3, 0, %v451_v16  ;;  %v4343_v54 = vcombine.low %v1136_v63, %v5851_v5  ;;  %v5222_v16 = vld [vmem:[%s6970_s1 + $0x210] sm:$0xff]  }
  0xb7   : > { %3456 = vmatprep.mubr.bf16.mxu1 %v6044_v48  ;;  %453 = vst [vmem:[#allocation2 + $0xc0] sm:$0x1] %v452_v22  ;;  %v5229_v22 = vld [vmem:[%s6970_s1 + $0x208] sm:$0xff]  }
  0xb8   : > { %3538 = vmatmul.mubr.bf16.vlgmr.msra.gmra.mxu0 %v1834_v51  ;;  %v306_v51 = vmul.f32 %v5277_v45, %v267_v32 }
  0xb9   : > { %4984 = vmatpush3.bf16.msra.mxu0 %v5977_v52  ;;  %3545 = vmatprep.mubr.bf16.mxu0 %v2084_v3  ;;  %v1649_v52 = vrot.slane %v6023_v59, 1  ;;  %v5205_v59 = vld [vmem:[%s6970_s1 + $0x220] sm:$0xff]   ;;  %v1867_v3 = vshll.u32 %v5186_v53, 16  ;;  %v5215_v53 = vld [vmem:[%s6970_s1 + $0x218] sm:$0xff]  }
  0xba   : > { %4985 = vmatprep.subr.bf16.mxu0 %v5183_v56  ;;  %v345_v6 = vadd.f32 %v5279_v21, %v306_v51 }
  0xbb   : > { %v1650_v60 = vsel %vm1614_vm10, %v1648_v38, %v1649_v52  ;;  %v2090_v52 = vsel %vm1614_vm10, %v2088_v62, %v2089_v47  ;;  %v1869_v63 = vrot.slane %v1867_v3, 1  ;;  %v1112_v62 = vld [vmem:[#allocation2 + $0xb4] sm:$0xf]  ;;  %v1082_v3 = vld [vmem:[#allocation2 + $0xa8] sm:$0xe] }
  0xbc   : > { %v377_v38 = vmax.f32 %v345_v6, 0.0  ;;  %v6132_v6 = vld [vmem:[#allocation2 + $0x1c] sm:$0xf] }
  0xbd   : > { %4986 = vmatpush3.bf16.msra.mxu0 %v5183_v56  ;;  %v1652_v56 = vrot.slane %v5278_v8, 1 }
  0xbe   : > { %3457 = vmatmul.mubr.bf16.gmra.mxu1 %v1647_v18  ;;  %4987 = vmatprep.subr.bf16.mxu0 %v5194_v27  ;;  %v307_v18 = vmul.f32 %v5277_v45, %v268_v7  ;;  %v5281_v45 = vld [vmem:[#allocation2 + $0xa4] ss:$0 sps:$4 sm:$0x11]  }
  0xbf   : > { %3464 = vmatprep.mubr.bf16.mxu1 %v6067_v9  ;;  %v1653_v20 = vsel %vm1614_vm10, %v1651_v50, %v1652_v56  ;;  %v1013_v56 = vld [vmem:[#allocation2 + $0xc0] sm:$0xf] }
  0xc0   : > { %3546 = vmatmul.mubr.bf16.gmra.mxu0 %v1846_v25  ;;  %v346_v15 = vadd.f32 %v5279_v21, %v307_v18  ;;  %v5280_v25 = vld [vmem:[#allocation2 + $0xa0] sm:$0xf]  ;;  %v1870_v18 = vsel %vm1357_vm4, %v1865_v29, %v1869_v63  ;;  %v1149_v21 = vld [vmem:[#allocation2 + $0x18] sm:$0xf]  ;;  %v5282_v29 = vld [vmem:[#allocation2 + $0xac] sm:$0xf] }
  0xc1   : > { %3553 = vmatprep.mubr.bf16.mxu0 %v2087_v37  ;;  %4988 = vmatpush3.bf16.msra.mxu0 %v5194_v27  ;;  %v6110_v27 = vld [vmem:[#allocation2 + $0x44] ss:$0 sps:$4 sm:$0x11]   ;;  %v4304_v5 = vcombine.low %v1081_v26, %v5280_v25  ;;  %v4509_v37 = vpack.c.bf16 %v377_v38, %v377_v38  ;;  %v4344_v26 = vcombine.low %v1137_v36, %v5881_v49  ;;  %v1884_v36 = vshrl.u32 %v5899_v39, 16 }
  0xc2   : > { %4989 = vmatprep.subr.bf16.mxu0 %v5205_v59  ;;  %v378_v12 = vmax.f32 %v346_v15, 0.0  ;;  %v2092_v41 = vrot.slane %v6110_v27, 1  ;;  %v1879_v47 = vshll.u32 %v6110_v27, 16  ;;  %v6150_v25 = vcombine.low %v1149_v21, %v6132_v6 }
  0xc3   : > { %v842_v43 = vshrl.u32 %v4509_v37, 16  ;;  %v845_v32 = vshll.u32 %v4509_v37, 16  ;;  %v1654_v7 = vrot.slane %v4304_v5, 1  ;;  %v5236_v5 = vld [vmem:[%s6970_s1 + $0x200] sm:$0xff]   ;;  %v1138_v37 = vld [vmem:[#allocation2 + $0x54] sm:$0xe] }
  0xc4   : > { %v4510_v13 = vpack.c.bf16 %v378_v12, %v378_v12  ;;  %v4305_v12 = vcombine.low %v1082_v3, %v5282_v29  ;;  %v2094_v1 = vrot.slane %v4344_v26, 1  ;;  %v5284_v3 = vld [vmem:[#allocation2 + $0xb8] sm:$0xf]  ;;  %v1896_v29 = vshrl.u32 %v5946_v28, 16 }
  0xc5   : > { %4990 = vmatpush3.bf16.msra.mxu0 %v5205_v59  ;;  %v1872_v59 = vshrl.u32 %v5873_v40, 16  ;;  %v1655_v40 = vrot.slane %v5281_v45, 1  ;;  %v844_v51 = vrot.slane %v842_v43, 7  ;;  %v5283_v43 = vld [vmem:[#allocation2 + $0xb0] ss:$0 sps:$4 sm:$0x11]  }
  0xc6   : > { %3465 = vmatmul.mubr.bf16.gmra.mxu1 %v1650_v60  ;;  %v2091_v60 = vrot.slane %v4343_v54, 1  ;;  %4991 = vmatprep.subr.bf16.mxu0 %v5215_v53  ;;  %v850_v2 = vshrl.u32 %v4510_v13, 16  ;;  %v853_v14 = vshll.u32 %v4510_v13, 16  ;;  %v1886_v54 = vshll.u32 %v5899_v39, 16  ;;  %v6162_v45 = vld [vmem:[#allocation2 + $0x28] sm:$0xf] }
  0xc7   : > { %3472 = vmatprep.mubr.bf16.mxu1 %v6088_v24  ;;  %v847_v50 = vor.u32 %v845_v32, %v844_v51  ;;  %v848_v44 = vrot.slane %v844_v51, 4  ;;  %v1656_v38 = vsel %vm1614_vm10, %v1654_v7, %v1655_v40  ;;  %v1658_v32 = vrot.slane %v5283_v43, 1  ;;  %v1151_v7 = vld [vmem:[#allocation2 + $0x24] sm:$0xf] }
  0xc8   : > { %3554 = vmatmul.mubr.bf16.gmra.mxu0 %v1858_v11  ;;  %v6129_v8 = vrot.slane %v850_v2, 7  ;;  %v2093_v15 = vsel %vm1614_vm10, %v2091_v60, %v2092_v41  ;;  %v5197_v11 = vld [vmem:[#allocation2 + $0x50] ss:$0 sps:$4 sm:$0x11]   ;;  %v1881_v60 = vrot.slane %v1879_v47, 1  ;;  %v1888_v63 = vrot.slane %v1886_v54, 1 }
  0xc9   : > { %3561 = vmatprep.mubr.bf16.mxu0 %v2090_v52  ;;  %4992 = vmatpush3.bf16.msra.mxu0 %v5215_v53  ;;  %v6143_v52 = vcombine.low %v1112_v62, %v6123_v42  ;;  %v1877_v53 = vor.u32 %v1876_v61, %v1872_v59  ;;  %v2095_v13 = vrot.slane %v5197_v11, 1  ;;  %v1891_v57 = vshll.u32 %v5197_v11, 16  ;;  %v6157_v62 = vld [vmem:[#allocation2 + $0x20] ss:$0 sps:$4 sm:$0x11]  }
  0xca   : > { %4993 = vmatprep.subr.bf16.mxu0 %v5222_v16  ;;  %v855_v27 = vor.u32 %v853_v14, %v6129_v8  ;;  %v1657_v41 = vrot.slane %v4305_v12, 1  ;;  %v5201_v2 = vld [vmem:[#allocation2 + $0x5c] ss:$0 sps:$4 sm:$0x11]   ;;  %v1083_v59 = vld [vmem:[#allocation2 + $0xb4] sm:$0xe]  ;;  %v4345_v14 = vcombine.low %v1138_v37, %v5923_v23 }
  0xcb   : > { %v2290_v61 = vshll.u32 %v6150_v25, 16  ;;  %v1882_v39 = vsel %vm1357_vm4, %v1877_v53, %v1881_v60  ;;  %v1898_v40 = vshll.u32 %v5946_v28, 16  ;;  %v2096_v51 = vsel %vm1614_vm10, %v2094_v1, %v2095_v13  ;;  %v1139_v54 = vld [vmem:[#allocation2 + $0x60] sm:$0xe] }
  0xcc   : > { %v856_v49 = vsel %vm5439_vm8, %v848_v44, %v855_v27  ;;  %v2288_v44 = vshrl.u32 %v6150_v25, 16  ;;  %v1893_v26 = vrot.slane %v1891_v57, 1  ;;  %v2098_v11 = vrot.slane %v5201_v2, 1  ;;  %v6179_v53 = vld [vmem:[#allocation2 + $0x2c] ss:$0 sps:$4 sm:$0x11]  }
  0xcd   : > { %4994 = vmatpush3.bf16.msra.mxu0 %v5222_v16  ;;  %1016 = vst [vmem:[#allocation2 + $0xc4] sm:$0xf] %v856_v49  ;;  %v1659_v16 = vsel %vm1614_vm10, %v1657_v41, %v1658_v32  ;;  %v2292_v21 = vrot.slane %v2290_v61, 1  ;;  %v1900_v12 = vrot.slane %v1898_v40, 1  ;;  %v4346_v57 = vcombine.low %v1139_v54, %v5965_v58 }
  0xce   : > { %3473 = vmatmul.mubr.bf16.gmra.mxu1 %v1653_v20  ;;  %v1014_v20 = vsel %vm5454_vm9, %v847_v50, %v1013_v56  ;;  %4995 = vmatprep.subr.bf16.mxu0 %v5229_v22  ;;  %v4306_v56 = vcombine.low %v1083_v59, %v5284_v3  ;;  %v1889_v50 = vor.u32 %v1888_v63, %v1884_v36  ;;  %v5285_v49 = vld [vmem:[#allocation2 + $0xbc] ss:$0 sps:$4 sm:$0x11]   ;;  %v1153_v36 = vld [vmem:[#allocation2 + $0x30] sm:$0xf]  ;;  %v1910_v41 = vshll.u32 %v5972_v33, 16 }
  0xcf   : > { %3480 = vmatprep.mubr.bf16.mxu1 %v6115_v30  ;;  %1015 = vst [vmem:[#allocation2 + $0xc0] sm:$0xf] %v1014_v20  ;;  %v1903_v20 = vshll.u32 %v5201_v2, 16  ;;  %v2293_v60 = vor.u32 %v2292_v21, %v2288_v44  ;;  %v6182_v63 = vld [vmem:[#allocation2 + $0x34] sm:$0xf]  ;;  %v1922_v59 = vshll.u32 %v6005_v55, 16 }
  0xd0   : > { %3562 = vmatmul.mubr.bf16.gmra.mxu0 %v1870_v18  ;;  %v2295_v18 = vshll.u32 %v6157_v62, 16  ;;  %v1660_v37 = vrot.slane %v4306_v56, 1  ;;  %v1894_v28 = vsel %vm1357_vm4, %v1889_v50, %v1893_v26  ;;  %v5208_v32 = vld [vmem:[#allocation2 + $0x68] ss:$0 sps:$4 sm:$0x11]   ;;  %v2100_v56 = vrot.slane %v4346_v57, 1 }
  0xd1   : > { %3569 = vmatprep.mubr.bf16.mxu0 %v2093_v15  ;;  %4996 = vmatpush3.bf16.msra.mxu0 %v5229_v22  ;;  %v6172_v22 = vcombine.low %v1151_v7, %v6162_v45  ;;  %v2097_v15 = vrot.slane %v4345_v14, 1  ;;  %v1905_v3 = vrot.slane %v1903_v20, 1  ;;  %v1908_v50 = vshrl.u32 %v5972_v33, 16  ;;  %v5212_v54 = vld [vmem:[#allocation2 + $0x74] ss:$0 sps:$4 sm:$0x11]  }
  0xd2   : > { %4997 = vmatprep.subr.bf16.mxu0 %v5236_v5  ;;  %v2297_v1 = vrot.slane %v2295_v18, 1  ;;  %v1912_v44 = vrot.slane %v1910_v41, 1  ;;  %v1915_v21 = vshll.u32 %v5208_v32, 16  ;;  %v6200_v26 = vld [vmem:[#allocation2 + $0x38] ss:$0 sps:$4 sm:$0x11]  }
  0xd3   : > { %v2302_v13 = vshll.u32 %v6172_v22, 16  ;;  %v2099_v43 = vsel %vm1614_vm10, %v2097_v15, %v2098_v11  ;;  %v2300_v58 = vshrl.u32 %v6172_v22, 16  ;;  %v1924_v41 = vrot.slane %v1922_v59, 1  ;;  %v1197_v59 = vld [vmem:[#allocation2 + $0x18] sm:$0xe] }
  0xd4   : > { %v6168_v23 = vld [vmem:[#allocation2 + $0xc4] sm:$0xf]  ;;  %v2298_v7 = vsel %vm1357_vm4, %v2293_v60, %v2297_v1  ;;  %v1913_v33 = vor.u32 %v1912_v44, %v1908_v50  ;;  %v2104_v1 = vrot.slane %v5212_v54, 1  ;;  %v2544_v35 = vrot.slane %v6157_v62, 1  ;;  %v1157_v44 = vld [vmem:[#allocation2 + $0x48] sm:$0xf] }
  0xd5   : > { %4998 = vmatpush3.bf16.msra.mxu0 %v5236_v5  ;;  %v1661_v5 = vrot.slane %v5285_v49, 1  ;;  %v2304_v40 = vrot.slane %v2302_v13, 1  ;;  %v1155_v49 = vld [vmem:[#allocation2 + $0x3c] sm:$0xf]  ;;  %v1920_v13 = vshrl.u32 %v6005_v55, 16 }
  0xd6   : > { %3481 = vmatmul.mubr.bf16.gmra.mxu1 %v1656_v38  ;;  %v1114_v47 = vld [vmem:[#allocation2 + $0xc0] sm:$0xf]  ;;  %v1140_v38 = vld [vmem:[#allocation2 + $0x6c] sm:$0xe] }
  0xd7   : > { %3488 = vmatprep.mubr.bf16.mxu1 %v6143_v52  ;;  %v6175_v27 = vcombine.low %v1114_v47, %v6168_v23  ;;  %v4347_v61 = vcombine.low %v1140_v38, %v5985_v46  ;;  %v1662_v14 = vsel %vm1614_vm10, %v1660_v37, %v1661_v5  ;;  %v1901_v47 = vor.u32 %v1900_v12, %v1896_v29  ;;  %v6203_v29 = vld [vmem:[#allocation2 + $0x40] sm:$0xf]  ;;  %v1141_v12 = vld [vmem:[#allocation2 + $0x78] sm:$0xe] }
  0xd8   : > { %3570 = vmatmul.mubr.bf16.gmra.mxu0 %v1882_v39  ;;  %v2307_v39 = vshll.u32 %v6179_v53, 16  ;;  %v2101_v46 = vrot.slane %v5208_v32, 1  ;;  %v2305_v15 = vor.u32 %v2304_v40, %v2300_v58  ;;  %v1917_v37 = vrot.slane %v1915_v21, 1  ;;  %v6220_v58 = vld [vmem:[#allocation2 + $0x44] ss:$0 sps:$4 sm:$0x11]  }
  0xd9   : > { %3577 = vmatprep.mubr.bf16.mxu0 %v2096_v51  ;;  %v6195_v51 = vcombine.low %v1153_v36, %v6182_v63  ;;  %v1906_v20 = vsel %vm1357_vm4, %v1901_v47, %v1905_v3  ;;  %v2103_v60 = vrot.slane %v4347_v61, 1  ;;  %v2319_v36 = vshll.u32 %v6200_v26, 16  ;;  %v6222_v40 = vld [vmem:[#allocation2 + $0x80] ss:$0 sps:$4 sm:$0x11]  }
  0xda   : > { %v2309_v11 = vrot.slane %v2307_v39, 1  ;;  %v2102_v5 = vsel %vm1614_vm10, %v2100_v56, %v2101_v46  ;;  %v6210_v57 = vcombine.low %v1155_v49, %v6203_v29  ;;  %v1927_v61 = vshll.u32 %v5212_v54, 16  ;;  %v1198_v56 = vld [vmem:[#allocation2 + $0x24] sm:$0xe]  ;;  %v1158_v21 = vld [vmem:[#allocation2 + $0x4c] sm:$0xf] }
  0xdb   : > { %v2314_v38 = vshll.u32 %v6195_v51, 16  ;;  %v2312_v32 = vshrl.u32 %v6195_v51, 16  ;;  %v4348_v39 = vcombine.low %v1141_v12, %v6016_v17  ;;  %v4387_v3 = vcombine.low %v1197_v59, %v6132_v6  ;;  %v1199_v49 = vld [vmem:[#allocation2 + $0x30] sm:$0xe] }
  0xdc   : > { %v2326_v47 = vshll.u32 %v6210_v57, 16  ;;  %v1918_v17 = vsel %vm1357_vm4, %v1913_v33, %v1917_v37  ;;  %v2105_v46 = vsel %vm1614_vm10, %v2103_v60, %v2104_v1  ;;  %v1929_v54 = vrot.slane %v1927_v61, 1  ;;  %v6235_v33 = vld [vmem:[#allocation2 + $0x84] sm:$0xe]  ;;  %v1201_v61 = vld [vmem:[#allocation2 + $0x48] sm:$0xe] }
  0xdd   : > { %v857_v6 = vrot.slane %v6129_v8, 4  ;;  %v2324_v62 = vshrl.u32 %v6210_v57, 16  ;;  %v2331_v12 = vshll.u32 %v6220_v58, 16  ;;  %v6237_v60 = vcombine.low %v1157_v44, %v1158_v21  ;;  %v5228_v59 = vld [vmem:[#allocation2 + $0x50] ss:$0 sps:$4 sm:$0x11]  }
  0xde   : > { %3489 = vmatmul.mubr.bf16.gmra.mxu1 %v1659_v16  ;;  %v2328_v37 = vrot.slane %v2326_v47, 1  ;;  %v2556_v31 = vrot.slane %v5228_v59, 1 }
  0xdf   : > { %3496 = vmatprep.mubr.bf16.mxu1 %v6175_v27 }
  0xe0   : > { %3578 = vmatmul.mubr.bf16.gmra.mxu0 %v1894_v28  ;;  %v501_v28 = vld [vmem:[#allocation2 + $0xc8] sm:$0x1] }
  0xe1   : > { %3585 = vmatprep.mubr.bf16.mxu0 %v2099_v43  ;;  %v2310_v43 = vsel %vm1357_vm4, %v2305_v15, %v2309_v11  ;;  %v502_v55 = vsel %vm5412_vm5, 0, %v501_v28  ;;  %v2547_v15 = vrot.slane %v6179_v53, 1  ;;  %v2543_v11 = vrot.slane %v4387_v3, 1  ;;  %v1202_v3 = vld [vmem:[#allocation2 + $0x54] sm:$0xe] }
  0xe2   : > { %503 = vst [vmem:[#allocation2 + $0xc8] sm:$0x1] %v502_v55  ;;  %v4349_v55 = vcombine.low %v6235_v33, %v6036_v19 }
  0xe3   : > { %v6240_v53 = vsel %vm1614_vm10, %v2543_v11, %v2544_v35 }
  0xe6   : > { %3497 = vmatmul.mubr.bf16.gmra.mxu1 %v1662_v14  ;;  %v1934_v14 = vshll.u32 %v6028_v10, 16 }
  0xe7   : > { %3698 = vmatprep.mubr.bf16.mxu1 %v2298_v7  ;;  %v1946_v7 = vshll.u32 %v6044_v48, 16 }
  0xe8   : > { %3586 = vmatmul.mubr.bf16.gmra.mxu0 %v1906_v20  ;;  %v4389_v20 = vcombine.low %v1199_v49, %v6182_v63  ;;  %v2107_v63 = vrot.slane %v6222_v40, 1  ;;  %v1936_v11 = vrot.slane %v1934_v14, 1 }
  0xe9   : > { %3593 = vmatprep.mubr.bf16.mxu0 %v2102_v5  ;;  %v1200_v5 = vld [vmem:[#allocation2 + $0x3c] sm:$0xe] }
  0xec   : > { %v4527_v2 = vpop.f32.mrf.mxu0 }
  0xee   : > { %v4528_v16 = vpop.f32.mrf.mxu0  ;;  %3699 = vmatmul.mubr.bf16.vlgmr.msra.gmra.mxu1 %v6150_v25  ;;  %v1925_v25 = vor.u32 %v1924_v41, %v1920_v13  ;;  %v2549_v13 = vrot.slane %v4389_v20, 1  ;;  %v1017_v41 = vld [vmem:[#allocation2 + $0xc8] sm:$0x1] }
  0xef   : > { %v6197_v18 = vadd.f32 %v4528_v16, %v4527_v2  ;;  %v2316_v2 = vrot.slane %v2314_v38, 1  ;;  %3706 = vmatprep.mubr.bf16.mxu1 %v2310_v43  ;;  %v2321_v16 = vrot.slane %v2319_v36, 1  ;;  %v4388_v38 = vcombine.low %v1198_v56, %v6162_v45  ;;  %v1160_v56 = vld [vmem:[#allocation2 + $0x58] sm:$0xf] }
  0xf0   : > { %3594 = vmatmul.mubr.bf16.gmra.mxu0 %v1918_v17  ;;  %v2106_v45 = vrot.slane %v4348_v39, 1  ;;  %v2550_v36 = vrot.slane %v6200_v26, 1  ;;  %v2333_v39 = vrot.slane %v2331_v12, 1  ;;  %v6253_v26 = vpop.f32.mrf.mxu0  ;;  %v1930_v17 = vsel %vm1357_vm4, %v1925_v25, %v1929_v54 }
  0xf1   : > { %v2317_v50 = vor.u32 %v2316_v2, %v2312_v32  ;;  %v2546_v1 = vrot.slane %v4388_v38, 1  ;;  %3601 = vmatprep.mubr.bf16.mxu0 %v2105_v46  ;;  %v4390_v32 = vcombine.low %v1200_v5, %v6203_v29  ;;  %v2553_v2 = vrot.slane %v6220_v58, 1 }
  0xf2   : > { %v6258_v47 = vsel %vm1614_vm10, %v2549_v13, %v2550_v36  ;;  %v2329_v29 = vor.u32 %v2328_v37, %v2324_v62  ;;  %v2338_v58 = vshll.u32 %v6237_v60, 16  ;;  %v4392_v44 = vcombine.low %v1202_v3, %v1160_v56  ;;  %v6274_v54 = vpop.f32.mrf.mxu0 }
  0xf3   : > { %v2322_v8 = vsel %vm1357_vm4, %v2317_v50, %v2321_v16  ;;  %v6246_v43 = vsel %vm1614_vm10, %v2546_v1, %v2547_v15  ;;  %v1018_v16 = vsel %vm5402_vm3, %v857_v6, %v1017_v41  ;;  %v2552_v19 = vrot.slane %v4390_v32, 1  ;;  %v6264_v50 = vld [vmem:[#allocation2 + $0x5c] ss:$0 sps:$4 sm:$0x11]   ;;  %v1159_v6 = vld [vmem:[#allocation2 + $0x54] sm:$0xf] }
  0xf4   : > { %1019 = vst [vmem:[#allocation2 + $0xc8] sm:$0x1] %v1018_v16  ;;  %v1932_v15 = vshrl.u32 %v6028_v10, 16  ;;  %v1939_v38 = vshll.u32 %v6222_v40, 16  ;;  %v2108_v25 = vsel %vm1614_vm10, %v2106_v45, %v2107_v63  ;;  %v2558_v20 = vrot.slane %v4392_v44, 1 }
  0xf5   : > { %v4599_v28 = vpop.f32.mrf.mxu1  ;;  %v6271_v62 = vsel %vm1614_vm10, %v2552_v19, %v2553_v2  ;;  %v2559_v5 = vrot.slane %v6264_v50, 1  ;;  %v2334_v33 = vsel %vm1357_vm4, %v2329_v29, %v2333_v39  ;;  %v2336_v10 = vshrl.u32 %v6237_v60, 16  ;;  %v1143_v2 = vld [vmem:[#allocation2 + $0x90] sm:$0xe] }
  0xf6   : > { %3707 = vmatmul.mubr.bf16.gmra.mxu1 %v6172_v22  ;;  %v4391_v22 = vcombine.low %v1201_v61, %v1158_v21  ;;  %v5219_v21 = vld [vmem:[#allocation2 + $0x8c] ss:$0 sps:$4 sm:$0x11]   ;;  %v2340_v14 = vrot.slane %v2338_v58, 1  ;;  %v2343_v40 = vshll.u32 %v5228_v59, 16  ;;  %v1937_v36 = vor.u32 %v1936_v11, %v1932_v15 }
  0xf7   : > { %3714 = vmatprep.mubr.bf16.mxu1 %v2322_v8  ;;  %v4600_v35 = vpop.f32.mrf.mxu1  ;;  %v6281_v8 = vcombine.low %v1159_v6, %v1160_v56  ;;  %v6287_v13 = vsel %vm1614_vm10, %v2558_v20, %v2559_v5  ;;  %v1941_v63 = vrot.slane %v1939_v38, 1  ;;  %v2110_v41 = vrot.slane %v5219_v21, 1  ;;  %v1161_v56 = vld [vmem:[#allocation2 + $0x60] sm:$0xf] }
  0xf8   : > { %v6262_v46 = vadd.f32 %v4600_v35, %v4599_v28  ;;  %v2555_v12 = vrot.slane %v4391_v22, 1  ;;  %3602 = vmatmul.mubr.bf16.gmra.mxu0 %v1930_v17  ;;  %v2109_v28 = vrot.slane %v4349_v55, 1  ;;  %v1944_v61 = vshrl.u32 %v6044_v48, 16  ;;  %v5223_v48 = vld [vmem:[#allocation2 + $0x98] ss:$0 sps:$4 sm:$0x11]  }
  0xf9   : > { %v4602_v49 = vpop.f32.mrf.mxu1  ;;  %3609 = vmatprep.mubr.bf16.mxu0 %v2108_v25  ;;  %v1948_v39 = vrot.slane %v1946_v7, 1  ;;  %v1951_v59 = vshll.u32 %v5219_v21, 16  ;;  %v2341_v16 = vor.u32 %v2340_v14, %v2336_v10  ;;  %v2345_v3 = vrot.slane %v2343_v40, 1  ;;  %v6312_v40 = vld [vmem:[#allocation2 + $0x68] ss:$0 sps:$4 sm:$0x11]  }
  0xfa   : > { %v6284_v45 = vsel %vm1614_vm10, %v2555_v12, %v2556_v31  ;;  %v2350_v58 = vshll.u32 %v6281_v8, 16  ;;  %v1942_v35 = vsel %vm1357_vm4, %v1937_v36, %v1941_v63  ;;  %v4350_v19 = vcombine.low %v1143_v2, %v6057_v0  ;;  %v1144_v12 = vld [vmem:[#allocation2 + $0x9c] sm:$0xe] }
  0xfb   : > { %v4603_v37 = vpop.f32.mrf.mxu1  ;;  %v2111_v22 = vsel %vm1614_vm10, %v2109_v28, %v2110_v41  ;;  %v1958_v17 = vshll.u32 %v6067_v9, 16  ;;  %v2355_v31 = vshll.u32 %v6264_v50, 16  ;;  %v2346_v44 = vsel %vm1357_vm4, %v2341_v16, %v2345_v3 }
  0xfc   : > { %v6279_v1 = vadd.f32 %v4603_v37, %v4602_v49  ;;  %v2348_v15 = vshrl.u32 %v6281_v8, 16  ;;  %v2352_v11 = vrot.slane %v2350_v58, 1  ;;  %v1949_v0 = vor.u32 %v1948_v39, %v1944_v61  ;;  %v1163_v61 = vld [vmem:[#allocation2 + $0x6c] sm:$0xf] }
  0xfd   : > { %v1953_v6 = vrot.slane %v1951_v59, 1  ;;  %v2112_v20 = vrot.slane %v4350_v19, 1  ;;  %v2113_v5 = vrot.slane %v5223_v48, 1  ;;  %v1956_v50 = vshrl.u32 %v6067_v9, 16 }
  0xfe   : > { %3715 = vmatmul.mubr.bf16.gmra.mxu1 %v6195_v51  ;;  %v6297_v51 = vld [vmem:[#allocation2 + $0x64] sm:$0xf]  ;;  %v1963_v10 = vshll.u32 %v5223_v48, 16  ;;  %v2353_v37 = vor.u32 %v2352_v11, %v2348_v15  ;;  %v2357_v36 = vrot.slane %v2355_v31, 1  ;;  %v4351_v9 = vcombine.low %v1144_v12, %v6077_v34 }
  0xff   : > { %3722 = vmatprep.mubr.bf16.mxu1 %v2334_v33  ;;  %v6306_v49 = vcombine.low %v1161_v56, %v6297_v51  ;;  %v1960_v33 = vrot.slane %v1958_v17, 1  ;;  %v2114_v39 = vsel %vm1614_vm10, %v2112_v20, %v2113_v5  ;;  %v5226_v59 = vld [vmem:[#allocation2 + $0xa4] ss:$0 sps:$4 sm:$0x11]  }
 0x100   : > { %3610 = vmatmul.mubr.bf16.gmra.mxu0 %v1942_v35  ;;  %v2367_v35 = vshll.u32 %v6312_v40, 16  ;;  %v2358_v56 = vsel %vm1357_vm4, %v2353_v37, %v2357_v36  ;;  %v1965_v31 = vrot.slane %v1963_v10, 1  ;;  %v2116_v15 = vrot.slane %v5226_v59, 1  ;;  %v6337_v20 = vld [vmem:[#allocation2 + $0x74] ss:$0 sps:$4 sm:$0x11]  }
 0x101   : > { %3617 = vmatprep.mubr.bf16.mxu0 %v2111_v22  ;;  %v2362_v41 = vshll.u32 %v6306_v49, 16  ;;  %v2360_v58 = vshrl.u32 %v6306_v49, 16  ;;  %v1961_v17 = vor.u32 %v1960_v33, %v1956_v50  ;;  %v1975_v10 = vshll.u32 %v5226_v59, 16  ;;  %v6341_v37 = vld [vmem:[#allocation2 + $0x7c] sm:$0xf] }
 0x102   : > { %v2369_v12 = vrot.slane %v2367_v35, 1  ;;  %v1980_v35 = vshrl.u32 %v6115_v30, 16 }
 0x103   : > { %v4533_v32 = vpop.f32.mrf.mxu0  ;;  %v2364_v48 = vrot.slane %v2362_v41, 1  ;;  %v1966_v50 = vsel %vm1357_vm4, %v1961_v17, %v1965_v31  ;;  %v1977_v59 = vrot.slane %v1975_v10, 1 }
 0x104   : > { %v4605_v25 = vpop.f32.mrf.mxu1 }
 0x105   : > { %v4534_v29 = vpop.f32.mrf.mxu0 }
 0x106   : > { %v6295_v55 = vadd.f32 %v4534_v29, %v4533_v32  ;;  %3723 = vmatmul.mubr.bf16.gmra.mxu1 %v6210_v57  ;;  %v4606_v14 = vpop.f32.mrf.mxu1  ;;  %v1954_v32 = vsel %vm1357_vm4, %v1949_v0, %v1953_v6  ;;  %v6318_v57 = vld [vmem:[#allocation2 + $0x70] sm:$0xf]  ;;  %v1968_v6 = vshrl.u32 %v6088_v24, 16 }
 0x107   : > { %v4536_v7 = vpop.f32.mrf.mxu0  ;;  %3730 = vmatprep.mubr.bf16.mxu1 %v2346_v44  ;;  %v6314_v63 = vadd.f32 %v4606_v14, %v4605_v25  ;;  %v6330_v34 = vcombine.low %v1163_v61, %v6318_v57  ;;  %v2115_v44 = vrot.slane %v4351_v9, 1  ;;  %v2365_v25 = vor.u32 %v2364_v48, %v2360_v58  ;;  %v1165_v14 = vld [vmem:[#allocation2 + $0x78] sm:$0xf]  ;;  %v1146_v58 = vld [vmem:[#allocation2 + $0xb4] sm:$0xe] }
 0x108   : > { %v4608_v2 = vpop.f32.mrf.mxu1  ;;  %3618 = vmatmul.mubr.bf16.gmra.mxu0 %v1954_v32  ;;  %v6349_v61 = vcombine.low %v1165_v14, %v6341_v37  ;;  %v1982_v9 = vshll.u32 %v6115_v30, 16 }
 0x109   : > { %v4537_v38 = vpop.f32.mrf.mxu0  ;;  %3625 = vmatprep.mubr.bf16.mxu0 %v2114_v39  ;;  %v2374_v5 = vshll.u32 %v6330_v34, 16  ;;  %v2117_v36 = vsel %vm1614_vm10, %v2115_v44, %v2116_v15  ;;  %v2370_v41 = vsel %vm1357_vm4, %v2365_v25, %v2369_v12  ;;  %v5233_v25 = vld [vmem:[#allocation2 + $0xbc] ss:$0 sps:$4 sm:$0x11]  }
 0x10a   : > { %v6308_v21 = vadd.f32 %v4537_v38, %v4536_v7  ;;  %v4609_v29 = vpop.f32.mrf.mxu1  ;;  %v1970_v7 = vshll.u32 %v6088_v24, 16  ;;  %v1145_v38 = vld [vmem:[#allocation2 + $0xa8] sm:$0xe]  ;;  %v2372_v24 = vshrl.u32 %v6330_v34, 16  ;;  %v2386_v17 = vshll.u32 %v6349_v61, 16 }
 0x10b   : > { %v4539_v28 = vpop.f32.mrf.mxu0  ;;  %v6327_v19 = vadd.f32 %v4609_v29, %v4608_v2  ;;  %v2376_v32 = vrot.slane %v2374_v5, 1  ;;  %v2379_v2 = vshll.u32 %v6337_v20, 16  ;;  %v1984_v44 = vrot.slane %v1982_v9, 1 }
 0x10c   : > { %v1972_v33 = vrot.slane %v1970_v7, 1  ;;  %v6354_v7 = vld [vmem:[#allocation2 + $0x80] ss:$0 sps:$4 sm:$0x11]   ;;  %v2388_v14 = vrot.slane %v2386_v17, 1  ;;  %v2122_v9 = vrot.slane %v5233_v25, 1 }
 0x10d   : > { %v4540_v16 = vpop.f32.mrf.mxu0  ;;  %v2381_v48 = vrot.slane %v2379_v2, 1  ;;  %v1999_v17 = vshll.u32 %v5233_v25, 16 }
 0x10e   : > { %v6322_v3 = vadd.f32 %v4540_v16, %v4539_v28  ;;  %3731 = vmatmul.mubr.bf16.gmra.mxu1 %v6237_v60  ;;  %v4352_v60 = vcombine.low %v1145_v38, %v6101_v4  ;;  %v5230_v28 = vld [vmem:[#allocation2 + $0xb0] ss:$0 sps:$4 sm:$0x11]   ;;  %v1973_v39 = vor.u32 %v1972_v33, %v1968_v6  ;;  %v1167_v38 = vld [vmem:[#allocation2 + $0x84] sm:$0xf]  ;;  %v4353_v6 = vcombine.low %v1146_v58, %v6123_v42 }
 0x10f   : > { %v4542_v22 = vpop.f32.mrf.mxu0  ;;  %3738 = vmatprep.mubr.bf16.mxu1 %v2358_v56  ;;  %v2119_v16 = vrot.slane %v5230_v28, 1  ;;  %v1987_v15 = vshll.u32 %v5230_v28, 16  ;;  %v1994_v28 = vshll.u32 %v6143_v52, 16  ;;  %v1985_v42 = vor.u32 %v1984_v44, %v1980_v35  ;;  %v1169_v44 = vld [vmem:[#allocation2 + $0x90] sm:$0xf] }
 0x110   : > { %3626 = vmatmul.mubr.bf16.gmra.mxu0 %v1966_v50  ;;  %v2118_v4 = vrot.slane %v4352_v60, 1  ;;  %v1978_v31 = vsel %vm1357_vm4, %v1973_v39, %v1977_v59  ;;  %v2384_v50 = vshrl.u32 %v6349_v61, 16  ;;  %v2391_v60 = vshll.u32 %v6354_v7, 16  ;;  %v1147_v59 = vld [vmem:[#allocation2 + $0xc0] sm:$0xe] }
 0x111   : > { %v4543_v11 = vpop.f32.mrf.mxu0  ;;  %3633 = vmatprep.mubr.bf16.mxu0 %v2117_v36  ;;  %v2121_v2 = vrot.slane %v4353_v6, 1  ;;  %v5237_v6 = vld [vmem:[#allocation2 + $0xc8] ss:$0 sps:$4 sm:$0x11]  }
 0x112   : > { %v6334_v0 = vadd.f32 %v4543_v11, %v4542_v22  ;;  %v2377_v22 = vor.u32 %v2376_v32, %v2372_v24  ;;  %v2120_v30 = vsel %vm1614_vm10, %v2118_v4, %v2119_v16  ;;  %v1989_v24 = vrot.slane %v1987_v15, 1  ;;  %v6376_v16 = vld [vmem:[#allocation2 + $0x8c] ss:$0 sps:$4 sm:$0x11]  }
 0x113   : > { %v2389_v58 = vor.u32 %v2388_v14, %v2384_v50  ;;  %v4354_v15 = vcombine.low %v1147_v59, %v6168_v23 }
 0x114   : > { %v2382_v10 = vsel %vm1357_vm4, %v2377_v22, %v2381_v48  ;;  %v1990_v22 = vsel %vm1357_vm4, %v1985_v42, %v1989_v24  ;;  %v1996_v48 = vrot.slane %v1994_v28, 1  ;;  %v6395_v42 = vld [vmem:[#allocation2 + $0x98] ss:$0 sps:$4 sm:$0x11]   ;;  %v2004_v24 = vshrl.u32 %v6175_v27, 16 }
 0x115   : > { %v2124_v14 = vrot.slane %v4354_v15, 1 }
 0x116   : > { %3739 = vmatmul.mubr.bf16.gmra.mxu1 %v6281_v8  ;;  %v4611_v29 = vpop.f32.mrf.mxu1  ;;  %v6360_v8 = vld [vmem:[#allocation2 + $0x88] sm:$0xf] }
 0x117   : > { %3746 = vmatprep.mubr.bf16.mxu1 %v2370_v41  ;;  %v6368_v36 = vcombine.low %v1167_v38, %v6360_v8  ;;  %v2123_v38 = vsel %vm1614_vm10, %v2121_v2, %v2122_v9 }
 0x118   : > { %v4612_v56 = vpop.f32.mrf.mxu1  ;;  %3634 = vmatmul.mubr.bf16.gmra.mxu0 %v1978_v31 }
 0x119   : > { %v6358_v11 = vadd.f32 %v4612_v56, %v4611_v29  ;;  %3641 = vmatprep.mubr.bf16.mxu0 %v2120_v30  ;;  %v1992_v29 = vshrl.u32 %v6143_v52, 16  ;;  %v2393_v56 = vrot.slane %v2391_v60, 1  ;;  %v2398_v35 = vshll.u32 %v6368_v36, 16 }
 0x11a   : > { %v4614_v12 = vpop.f32.mrf.mxu1  ;;  %v2403_v52 = vshll.u32 %v6376_v16, 16  ;;  %v2125_v60 = vrot.slane %v5237_v6, 1 }
 0x11b   : > { %v4545_v5 = vpop.f32.mrf.mxu0  ;;  %v2400_v50 = vrot.slane %v2398_v35, 1  ;;  %v1997_v23 = vor.u32 %v1996_v48, %v1992_v29  ;;  %v2011_v29 = vshll.u32 %v5237_v6, 16  ;;  %v1171_v35 = vld [vmem:[#allocation2 + $0x9c] sm:$0xf] }
 0x11c   : > { %v4615_v33 = vpop.f32.mrf.mxu1  ;;  %v2405_v9 = vrot.slane %v2403_v52, 1 }
 0x11d   : > { %v4546_v41 = vpop.f32.mrf.mxu0  ;;  %v6371_v32 = vadd.f32 %v4615_v33, %v4614_v12  ;;  %v2394_v12 = vsel %vm1357_vm4, %v2389_v58, %v2393_v56  ;;  %v2006_v33 = vshll.u32 %v6175_v27, 16  ;;  %v2013_v52 = vrot.slane %v2011_v29, 1 }
 0x11e   : > { %3747 = vmatmul.mubr.bf16.gmra.mxu1 %v6306_v49  ;;  %v6374_v39 = vadd.f32 %v4546_v41, %v4545_v5  ;;  %v6381_v49 = vld [vmem:[#allocation2 + $0x94] sm:$0xf]  ;;  %v2396_v5 = vshrl.u32 %v6368_v36, 16 }
 0x11f   : > { %v4548_v4 = vpop.f32.mrf.mxu0  ;;  %3754 = vmatprep.mubr.bf16.mxu1 %v2382_v10  ;;  %v6391_v25 = vcombine.low %v1169_v44, %v6381_v49  ;;  %v2001_v10 = vrot.slane %v1999_v17, 1  ;;  %v2008_v58 = vrot.slane %v2006_v33, 1  ;;  %v2415_v17 = vshll.u32 %v6395_v42, 16 }
 0x120   : > { %3642 = vmatmul.mubr.bf16.gmra.mxu0 %v1990_v22  ;;  %v2401_v2 = vor.u32 %v2400_v50, %v2396_v5  ;;  %v6402_v22 = vld [vmem:[#allocation2 + $0xa0] sm:$0xf] }
 0x121   : > { %v4549_v31 = vpop.f32.mrf.mxu0  ;;  %3649 = vmatprep.mubr.bf16.mxu0 %v2123_v38  ;;  %v2410_v59 = vshll.u32 %v6391_v25, 16  ;;  %v2408_v44 = vshrl.u32 %v6391_v25, 16  ;;  %v6409_v38 = vcombine.low %v1171_v35, %v6402_v22  ;;  %v2009_v6 = vor.u32 %v2008_v58, %v2004_v24 }
 0x122   : > { %v6385_v30 = vadd.f32 %v4549_v31, %v4548_v4  ;;  %v2002_v4 = vsel %vm1357_vm4, %v1997_v23, %v2001_v10  ;;  %v2406_v31 = vsel %vm1357_vm4, %v2401_v2, %v2405_v9  ;;  %v6414_v23 = vld [vmem:[#allocation2 + $0xa4] ss:$0 sps:$4 sm:$0x11]  }
 0x123   : > { %v2412_v15 = vrot.slane %v2410_v59, 1  ;;  %v2014_v24 = vsel %vm1357_vm4, %v2009_v6, %v2013_v52  ;;  %v1173_v59 = vld [vmem:[#allocation2 + $0xa8] sm:$0xf]  ;;  %v2420_v35 = vshrl.u32 %v6409_v38, 16 }
 0x126   : > { %v4617_v28 = vpop.f32.mrf.mxu1  ;;  %3755 = vmatmul.mubr.bf16.gmra.mxu1 %v6330_v34  ;;  %v2126_v34 = vsel %vm1614_vm10, %v2124_v14, %v2125_v60  ;;  %v2413_v60 = vor.u32 %v2412_v15, %v2408_v44  ;;  %v4532_v15 = vadd.f32 %v6274_v54, %v6253_v26  ;;  %v6442_v26 = vld [vmem:[#allocation2 + $0xb8] sm:$0xf] }
 0x127   : > { %3762 = vmatprep.mubr.bf16.mxu1 %v2394_v12 }
 0x128   : > { %v4618_v41 = vpop.f32.mrf.mxu1  ;;  %3650 = vmatmul.mubr.bf16.gmra.mxu0 %v2002_v4  ;;  %v6420_v4 = vld [vmem:[#allocation2 + $0xac] sm:$0xf] }
 0x129   : > { %v6400_v56 = vadd.f32 %v4618_v41, %v4617_v28  ;;  %3657 = vmatprep.mubr.bf16.mxu0 %v2126_v34  ;;  %v2417_v28 = vrot.slane %v2415_v17, 1  ;;  %v2422_v41 = vshll.u32 %v6409_v38, 16  ;;  %v2427_v34 = vshll.u32 %v6414_v23, 16 }
 0x12a   : > { %v4620_v48 = vpop.f32.mrf.mxu1  ;;  %v6431_v44 = vcombine.low %v1173_v59, %v6420_v4 }
 0x12c   : > { %v4621_v27 = vpop.f32.mrf.mxu1  ;;  %v4551_v12 = vpop.f32.mrf.mxu0 }
 0x12d   : > { %v6411_v5 = vadd.f32 %v4621_v27, %v4620_v48  ;;  %v2418_v27 = vsel %vm1357_vm4, %v2413_v60, %v2417_v28  ;;  %v2434_v60 = vshll.u32 %v6431_v44, 16 }
 0x12e   : > { %v4639_v50 = vpop.f32.mrf.mxu1  ;;  %3763 = vmatmul.mubr.bf16.gmra.mxu1 %v6349_v61  ;;  %v4552_v33 = vpop.f32.mrf.mxu0 }
 0x12f   : > { %3770 = vmatprep.mubr.bf16.mxu1 %v2406_v31  ;;  %v6416_v10 = vadd.f32 %v4552_v33, %v4551_v12  ;;  %v2424_v31 = vrot.slane %v2422_v41, 1  ;;  %v6439_v12 = vld [vmem:[#allocation2 + $0xb0] ss:$0 sps:$4 sm:$0x11]  }
 0x130   : > { %v4640_v14 = vpop.f32.mrf.mxu1  ;;  %v4554_v2 = vpop.f32.mrf.mxu0  ;;  %3658 = vmatmul.mubr.bf16.gmra.mxu0 %v2014_v24  ;;  %v1175_v24 = vld [vmem:[#allocation2 + $0xb4] sm:$0xf] }
 0x131   : > { %v4641_v9 = vadd.f32 %v4640_v14, %v4639_v50  ;;  %4999 = vmatprep.mubr.bf16.mxu0 %v6240_v53  ;;  %v2425_v33 = vor.u32 %v2424_v31, %v2420_v35  ;;  %v2429_v14 = vrot.slane %v2427_v34, 1  ;;  %v2436_v35 = vrot.slane %v2434_v60, 1 }
 0x132   : > { %v4642_v58 = vpop.f32.mrf.mxu1  ;;  %v4555_v61 = vpop.f32.mrf.mxu0  ;;  %v6454_v34 = vcombine.low %v1175_v24, %v6442_v26 }
 0x133   : > { %v6423_v29 = vadd.f32 %v4641_v9, %v6197_v18  ;;  %v6427_v48 = vadd.f32 %v4555_v61, %v4554_v2  ;;  %v2439_v9 = vshll.u32 %v6439_v12, 16  ;;  %v2430_v61 = vsel %vm1357_vm4, %v2425_v33, %v2429_v14 }
 0x134   : > { %v4643_v17 = vpop.f32.mrf.mxu1 }
 0x135   : > { %v4644_v18 = vadd.f32 %v4643_v17, %v4642_v58  ;;  %v2441_v14 = vrot.slane %v2439_v9, 1  ;;  %v2444_v9 = vshrl.u32 %v6454_v34, 16 }
 0x136   : > { %v4645_v6 = vpop.f32.mrf.mxu1  ;;  %3771 = vmatmul.mubr.bf16.gmra.mxu1 %v6368_v36  ;;  %v4557_v28 = vpop.f32.mrf.mxu0  ;;  %v2432_v36 = vshrl.u32 %v6431_v44, 16 }
 0x137   : > { %v6437_v52 = vadd.f32 %v4644_v18, %v4532_v15  ;;  %3778 = vmatprep.mubr.bf16.mxu1 %v2418_v27  ;;  %v6461_v18 = vld [vmem:[#allocation2 + $0xbc] ss:$0 sps:$4 sm:$0x11]  }
 0x138   : > { %v4646_v50 = vpop.f32.mrf.mxu1  ;;  %v4558_v54 = vpop.f32.mrf.mxu0  ;;  %5000 = vmatmul.mubr.bf16.vlgmr.msra.gmra.mxu0 %v6246_v43  ;;  %v1203_v43 = vld [vmem:[#allocation2 + $0x60] sm:$0xe]  ;;  %v2437_v33 = vor.u32 %v2436_v35, %v2432_v36 }
 0x139   : > { %v4647_v41 = vadd.f32 %v4646_v50, %v4645_v6  ;;  %v6450_v59 = vadd.f32 %v4558_v54, %v4557_v28  ;;  %5003 = vmatprep.mubr.bf16.mxu0 %v6258_v47  ;;  %v2446_v47 = vshll.u32 %v6454_v34, 16  ;;  %v1177_v28 = vld [vmem:[#allocation2 + $0xc0] sm:$0xf]  ;;  %v2451_v54 = vshll.u32 %v6461_v18, 16 }
 0x13a   : > { %v4648_v53 = vpop.f32.mrf.mxu1  ;;  %v4560_v17 = vpop.f32.mrf.mxu0  ;;  %v2442_v36 = vsel %vm1357_vm4, %v2437_v33, %v2441_v14  ;;  %v1205_v33 = vld [vmem:[#allocation2 + $0x78] sm:$0xe]  ;;  %v6487_v14 = vld [vmem:[#allocation2 + $0xc8] ss:$0 sps:$4 sm:$0x11]  }
 0x13b   : > { %v6445_v2 = vadd.f32 %v4647_v41, %v6295_v55  ;;  %v6466_v41 = vld [vmem:[#allocation2 + $0xc4] sm:$0xf] }
 0x13c   : > { %v4649_v58 = vpop.f32.mrf.mxu1  ;;  %v4561_v31 = vpop.f32.mrf.mxu0  ;;  %v6477_v35 = vcombine.low %v1177_v28, %v6466_v41 }
 0x13d   : > { %v4650_v55 = vadd.f32 %v4649_v58, %v4648_v53  ;;  %v6463_v6 = vadd.f32 %v4561_v31, %v4560_v17  ;;  %v1204_v31 = vld [vmem:[#allocation2 + $0x6c] sm:$0xe] }
 0x13e   : > { %v4651_v27 = vpop.f32.mrf.mxu1  ;;  %3779 = vmatmul.mubr.bf16.gmra.mxu1 %v6391_v25  ;;  %v4393_v25 = vcombine.low %v1203_v43, %v6297_v51  ;;  %v2458_v28 = vshll.u32 %v6477_v35, 16 }
 0x13f   : > { %v6459_v15 = vadd.f32 %v4650_v55, %v6308_v21  ;;  %3786 = vmatprep.mubr.bf16.mxu1 %v2430_v61  ;;  %v2448_v61 = vrot.slane %v2446_v47, 1 }
 0x140   : > { %v4652_v50 = vpop.f32.mrf.mxu1  ;;  %5004 = vmatmul.mubr.bf16.gmra.mxu0 %v6271_v62 }
 0x141   : > { %v4653_v60 = vadd.f32 %v4652_v50, %v4651_v27  ;;  %5007 = vmatprep.mubr.bf16.mxu0 %v6284_v45  ;;  %v2562_v27 = vrot.slane %v6312_v40, 1  ;;  %v2449_v47 = vor.u32 %v2448_v61, %v2444_v9  ;;  %v4394_v40 = vcombine.low %v1204_v31, %v6318_v57 }
 0x142   : > { %v4654_v24 = vpop.f32.mrf.mxu1  ;;  %v4563_v21 = vpop.f32.mrf.mxu0  ;;  %v2456_v61 = vshrl.u32 %v6477_v35, 16  ;;  %v2460_v31 = vrot.slane %v2458_v28, 1  ;;  %v1207_v28 = vld [vmem:[#allocation2 + $0x90] sm:$0xe] }
 0x143   : > { %v6470_v53 = vadd.f32 %v4653_v60, %v6322_v3  ;;  %v2561_v3 = vrot.slane %v4393_v25, 1  ;;  %v2453_v60 = vrot.slane %v2451_v54, 1  ;;  %v2463_v54 = vshll.u32 %v6487_v14, 16 }
 0x144   : > { %v4655_v58 = vpop.f32.mrf.mxu1  ;;  %v4564_v51 = vpop.f32.mrf.mxu0 }
 0x145   : > { %v4656_v17 = vadd.f32 %v4655_v58, %v4654_v24  ;;  %v6480_v55 = vadd.f32 %v4564_v51, %v4563_v21  ;;  %v1179_v21 = vld [vmem:[#allocation2 + $0xcc] sm:$0xf]  ;;  %v6491_v58 = vld [vmem:[#allocation2 + $0xd0] sm:$0xf]  ;;  %v2454_v57 = vsel %vm1357_vm4, %v2449_v47, %v2453_v60 }
 0x146   : > { %v4657_v62 = vpop.f32.mrf.mxu1  ;;  %3787 = vmatmul.mubr.bf16.gmra.mxu1 %v6409_v38  ;;  %v4566_v43 = vpop.f32.mrf.mxu0 }
 0x147   : > { %v6485_v50 = vadd.f32 %v4656_v17, %v6334_v0  ;;  %3794 = vmatprep.mubr.bf16.mxu1 %v2442_v36  ;;  %v2563_v0 = vsel %vm1614_vm10, %v2561_v3, %v2562_v27  ;;  %v4395_v36 = vcombine.low %v1205_v33, %v6341_v37  ;;  %v2564_v37 = vrot.slane %v4394_v40, 1 }
 0x148   : > { %v4658_v45 = vpop.f32.mrf.mxu1  ;;  %v4567_v25 = vpop.f32.mrf.mxu0  ;;  %5008 = vmatmul.mubr.bf16.gmra.mxu0 %v6287_v13  ;;  %v2565_v27 = vrot.slane %v6337_v20, 1  ;;  %v2568_v33 = vrot.slane %v6354_v7, 1  ;;  %v2461_v40 = vor.u32 %v2460_v31, %v2456_v61 }
 0x149   : > { %v4659_v24 = vadd.f32 %v4658_v45, %v4657_v62  ;;  %v6493_v38 = vadd.f32 %v4567_v25, %v4566_v43  ;;  %v6505_v62 = vcombine.low %v1179_v21, %v6491_v58  ;;  %5011 = vmatprep.mubr.bf16.mxu0 %v2563_v0  ;;  %v2567_v43 = vrot.slane %v4395_v36, 1  ;;  %v1206_v45 = vld [vmem:[#allocation2 + $0x84] sm:$0xe] }
 0x14a   : > { %v4660_v51 = vpop.f32.mrf.mxu1  ;;  %v4569_v3 = vpop.f32.mrf.mxu0  ;;  %v2465_v21 = vrot.slane %v2463_v54, 1  ;;  %v2566_v0 = vsel %vm1614_vm10, %v2564_v37, %v2565_v27  ;;  %v4396_v36 = vcombine.low %v1206_v45, %v6360_v8 }
 0x14b   : > { %v6498_v17 = vadd.f32 %v4659_v24, %v6374_v39  ;;  %v2470_v20 = vshll.u32 %v6505_v62, 16  ;;  %v2468_v54 = vshrl.u32 %v6505_v62, 16 }
 0x14c   : > { %v4661_v9 = vpop.f32.mrf.mxu1  ;;  %v4570_v47 = vpop.f32.mrf.mxu0  ;;  %v2466_v8 = vsel %vm1357_vm4, %v2461_v40, %v2465_v21  ;;  %v1209_v40 = vld [vmem:[#allocation2 + $0xa8] sm:$0xe] }
 0x14d   : > { %v4662_v39 = vadd.f32 %v4661_v9, %v4660_v51  ;;  %v6513_v25 = vadd.f32 %v4570_v47, %v4569_v3  ;;  %v2472_v37 = vrot.slane %v2470_v20, 1  ;;  %v1208_v47 = vld [vmem:[#allocation2 + $0x9c] sm:$0xe] }
 0x14e   : > { %v4663_v13 = vpop.f32.mrf.mxu1  ;;  %3795 = vmatmul.mubr.bf16.gmra.mxu1 %v6431_v44  ;;  %v4572_v7 = vpop.f32.mrf.mxu0  ;;  %v2569_v44 = vsel %vm1614_vm10, %v2567_v43, %v2568_v33  ;;  %v2570_v43 = vrot.slane %v4396_v36, 1  ;;  %v2571_v33 = vrot.slane %v6376_v16, 1 }
 0x14f   : > { %v6511_v60 = vadd.f32 %v4662_v39, %v6385_v30  ;;  %3802 = vmatprep.mubr.bf16.mxu1 %v2454_v57  ;;  %v4397_v30 = vcombine.low %v1207_v28, %v6381_v49  ;;  %v6520_v39 = vld [vmem:[#allocation2 + $0xd4] ss:$0 sps:$4 sm:$0x11]  }
 0x150   : > { %v4664_v24 = vpop.f32.mrf.mxu1  ;;  %v4573_v57 = vpop.f32.mrf.mxu0  ;;  %5012 = vmatmul.mubr.bf16.gmra.mxu0 %v2566_v0  ;;  %v2475_v27 = vshll.u32 %v6520_v39, 16  ;;  %v2572_v16 = vsel %vm1614_vm10, %v2570_v43, %v2571_v33  ;;  %v2580_v43 = vrot.slane %v6439_v12, 1 }
 0x151   : > { %v4665_v51 = vadd.f32 %v4664_v24, %v4663_v13  ;;  %v6526_v61 = vadd.f32 %v4573_v57, %v4572_v7  ;;  %5015 = vmatprep.mubr.bf16.mxu0 %v2569_v44  ;;  %v2573_v13 = vrot.slane %v4397_v30, 1  ;;  %v2473_v7 = vor.u32 %v2472_v37, %v2468_v54 }
 0x152   : > { %v4666_v9 = vpop.f32.mrf.mxu1  ;;  %v2477_v36 = vrot.slane %v2475_v27, 1 }
 0x153   : > { %v6523_v3 = vadd.f32 %v4665_v51, %v6416_v10  ;;  %v4575_v49 = vpop.f32.mrf.mxu0  ;;  %v2574_v10 = vrot.slane %v6395_v42, 1  ;;  %v4398_v42 = vcombine.low %v1208_v47, %v6402_v22  ;;  %v2577_v22 = vrot.slane %v6414_v23, 1 }
 0x154   : > { %v4667_v31 = vpop.f32.mrf.mxu1 }
 0x155   : > { %v4668_v45 = vadd.f32 %v4667_v31, %v4666_v9  ;;  %v4576_v24 = vpop.f32.mrf.mxu0  ;;  %v2575_v30 = vsel %vm1614_vm10, %v2573_v13, %v2574_v10  ;;  %v2576_v37 = vrot.slane %v4398_v42, 1 }
 0x156   : > { %v4669_v28 = vpop.f32.mrf.mxu1  ;;  %3803 = vmatmul.mubr.bf16.gmra.mxu1 %v6454_v34  ;;  %v6536_v21 = vadd.f32 %v4576_v24, %v4575_v49  ;;  %v4399_v34 = vcombine.low %v1209_v40, %v6420_v4  ;;  %v1210_v4 = vld [vmem:[#allocation2 + $0xb4] sm:$0xe] }
 0x157   : > { %v6534_v0 = vadd.f32 %v4668_v45, %v6427_v48  ;;  %3810 = vmatprep.mubr.bf16.mxu1 %v2466_v8  ;;  %v4578_v51 = vpop.f32.mrf.mxu0  ;;  %v2478_v8 = vsel %vm1357_vm4, %v2473_v7, %v2477_v36  ;;  %v1211_v45 = vld [vmem:[#allocation2 + $0xc0] sm:$0xe]  ;;  %v2578_v47 = vsel %vm1614_vm10, %v2576_v37, %v2577_v22 }
 0x158   : > { %v4670_v20 = vpop.f32.mrf.mxu1  ;;  %5016 = vmatmul.mubr.bf16.gmra.mxu0 %v2572_v16  ;;  %v2579_v49 = vrot.slane %v4399_v34, 1  ;;  %v4401_v12 = vcombine.low %v1211_v45, %v6466_v41 }
 0x159   : > { %v4671_v44 = vadd.f32 %v4670_v20, %v4669_v28  ;;  %v4579_v48 = vpop.f32.mrf.mxu0  ;;  %5019 = vmatprep.mubr.bf16.mxu0 %v2575_v30  ;;  %v4400_v28 = vcombine.low %v1210_v4, %v6442_v26  ;;  %v1212_v30 = vld [vmem:[#allocation2 + $0xcc] sm:$0xe] }
 0x15a   : > { %v4672_v9 = vpop.f32.mrf.mxu1  ;;  %v6545_v31 = vadd.f32 %v4579_v48, %v4578_v51  ;;  %v2581_v24 = vsel %vm1614_vm10, %v2579_v49, %v2580_v43  ;;  %v2583_v51 = vrot.slane %v6461_v18, 1  ;;  %v2585_v26 = vrot.slane %v4401_v12, 1 }
 0x15b   : > { %v6543_v57 = vadd.f32 %v4671_v44, %v6450_v59  ;;  %v2582_v16 = vrot.slane %v4400_v28, 1  ;;  %v2586_v44 = vrot.slane %v6487_v14, 1  ;;  %v4402_v37 = vcombine.low %v1212_v30, %v6491_v58 }
 0x15c   : > { %v4673_v54 = vpop.f32.mrf.mxu1 }
 0x15d   : > { %v4674_v27 = vadd.f32 %v4673_v54, %v4672_v9  ;;  %v4581_v10 = vpop.f32.mrf.mxu0  ;;  %v2587_v22 = vsel %vm1614_vm10, %v2585_v26, %v2586_v44  ;;  %v2588_v4 = vrot.slane %v4402_v37, 1 }
 0x15e   : > { %v4675_v33 = vpop.f32.mrf.mxu1  ;;  %3811 = vmatmul.mubr.bf16.gmra.mxu1 %v6477_v35 }
 0x15f   : > { %v6552_v59 = vadd.f32 %v4674_v27, %v6463_v6  ;;  %3818 = vmatprep.mubr.bf16.mxu1 %v2478_v8  ;;  %v4582_v20 = vpop.f32.mrf.mxu0  ;;  %v2584_v8 = vsel %vm1614_vm10, %v2582_v16, %v2583_v51 }
 0x160   : > { %v4676_v13 = vpop.f32.mrf.mxu1  ;;  %5020 = vmatmul.mubr.bf16.gmra.mxu0 %v2578_v47  ;;  %v4583_v6 = vadd.f32 %v4582_v20, %v4581_v10 }
 0x161   : > { %v4677_v23 = vadd.f32 %v4676_v13, %v4675_v33  ;;  %v4584_v36 = vpop.f32.mrf.mxu0  ;;  %5023 = vmatprep.mubr.bf16.mxu0 %v2581_v24  ;;  %v2589_v33 = vrot.slane %v6520_v39, 1 }
 0x162   : > { %v4678_v40 = vpop.f32.mrf.mxu1 }
 0x163   : > { %v6559_v35 = vadd.f32 %v4677_v23, %v6480_v55  ;;  %v4585_v41 = vpop.f32.mrf.mxu0  ;;  %v2590_v23 = vsel %vm1614_vm10, %v2588_v4, %v2589_v33 }
 0x164   : > { %v4679_v7 = vpop.f32.mrf.mxu1  ;;  %v4586_v9 = vadd.f32 %v4585_v41, %v4584_v36 }
 0x165   : > { %v4680_v42 = vadd.f32 %v4679_v7, %v4678_v40 }
 0x166   : > { %v4681_v34 = vpop.f32.mrf.mxu1  ;;  %3819 = vmatmul.mubr.bf16.gmra.mxu1 %v6505_v62 }
 0x167   : > { %v6565_v55 = vadd.f32 %v4680_v42, %v6493_v38  ;;  %v4587_v54 = vpop.f32.mrf.mxu0 }
 0x168   : > { %v4682_v48 = vpop.f32.mrf.mxu1  ;;  %5024 = vmatmul.mubr.bf16.gmra.mxu0 %v2584_v8 }
 0x169   : > { %v4683_v18 = vadd.f32 %v4682_v48, %v4681_v34  ;;  %v4588_v14 = vpop.f32.mrf.mxu0  ;;  %5027 = vmatprep.mubr.bf16.mxu0 %v2587_v22 }
 0x16a   : > { %v4684_v27 = vpop.f32.mrf.mxu1  ;;  %v4589_v62 = vadd.f32 %v4588_v14, %v4587_v54 }
 0x16b   : > { %v6571_v49 = vadd.f32 %v4683_v18, %v6513_v25  ;;  %v4590_v38 = vpop.f32.mrf.mxu0 }
 0x16c   : > { %v4685_v43 = vpop.f32.mrf.mxu1 }
 0x16d   : > { %v4686_v45 = vadd.f32 %v4685_v43, %v4684_v27  ;;  %v4591_v10 = vpop.f32.mrf.mxu0 }
 0x16e   : > { %v4687_v13 = vpop.f32.mrf.mxu1  ;;  %v4592_v47 = vadd.f32 %v4591_v10, %v4590_v38 }
 0x16f   : > { %v6575_v58 = vadd.f32 %v4686_v45, %v6526_v61 }
 0x170   : > { %v4688_v28 = vpop.f32.mrf.mxu1  ;;  %v4593_v40 = vpop.f32.mrf.mxu0  ;;  %5028 = vmatmul.mubr.bf16.gmra.mxu0 %v2590_v23 }
 0x171   : > { %v4689_v25 = vadd.f32 %v4688_v28, %v4687_v13 }
 0x172   : > { %v4690_v24 = vpop.f32.mrf.mxu1  ;;  %v4594_v39 = vpop.f32.mrf.mxu0 }
 0x173   : > { %v6579_v12 = vadd.f32 %v4689_v25, %v6536_v21  ;;  %v4595_v16 = vadd.f32 %v4594_v39, %v4593_v40 }
 0x174   : > { %v4691_v20 = vpop.f32.mrf.mxu1  ;;  %v4596_v61 = vpop.f32.mrf.mxu0 }
 0x175   : > { %v4692_v7 = vadd.f32 %v4691_v20, %v4690_v24 }
 0x176   : > { %v4693_v36 = vpop.f32.mrf.mxu1  ;;  %v4597_v44 = vpop.f32.mrf.mxu0 }
 0x177   : > { %v6582_v51 = vadd.f32 %v4692_v7, %v6545_v31  ;;  %v4598_v34 = vadd.f32 %v4597_v44, %v4596_v61 }
 0x178   : > { %v4694_v42 = vpop.f32.mrf.mxu1  ;;  %v4751_v21 = vpop.f32.mrf.mxu0 }
 0x179   : > { %v4695_v26 = vadd.f32 %v4694_v42, %v4693_v36 }
 0x17a   : > { %v4696_v30 = vpop.f32.mrf.mxu1  ;;  %v4752_v8 = vpop.f32.mrf.mxu0 }
 0x17b   : > { %v6584_v41 = vadd.f32 %v4695_v26, %v4583_v6  ;;  %v4753_v18 = vadd.f32 %v4752_v8, %v4751_v21 }
 0x17c   : > { %v4697_v48 = vpop.f32.mrf.mxu1  ;;  %v4754_v27 = vpop.f32.mrf.mxu0 }
 0x17d   : > { %v4698_v54 = vadd.f32 %v4697_v48, %v4696_v30  ;;  %v6589_v31 = vadd.f32 %v4753_v18, %v6423_v29 }
 0x17e   : > { %v4699_v37 = vpop.f32.mrf.mxu1  ;;  %v4755_v38 = vpop.f32.mrf.mxu0 }
 0x17f   : > { %v6586_v22 = vadd.f32 %v4698_v54, %v4586_v9  ;;  %v4756_v33 = vadd.f32 %v4755_v38, %v4754_v27 }
 0x180   : > { %v4700_v14 = vpop.f32.mrf.mxu1  ;;  %v4757_v6 = vpop.f32.mrf.mxu0 }
 0x181   : > { %v4701_v43 = vadd.f32 %v4700_v14, %v4699_v37  ;;  %v6594_v10 = vadd.f32 %v4756_v33, %v6437_v52 }
 0x182   : > { %v4702_v4 = vpop.f32.mrf.mxu1  ;;  %v4758_v23 = vpop.f32.mrf.mxu0 }
 0x183   : > { %v6591_v45 = vadd.f32 %v4701_v43, %v4589_v62  ;;  %v4759_v25 = vadd.f32 %v4758_v23, %v4757_v6 }
 0x184   : > { %v4703_v13 = vpop.f32.mrf.mxu1  ;;  %v4760_v40 = vpop.f32.mrf.mxu0 }
 0x185   : > { %v4704_v28 = vadd.f32 %v4703_v13, %v4702_v4  ;;  %v6599_v20 = vadd.f32 %v4759_v25, %v6445_v2 }
 0x186   : > { %v4705_v9 = vpop.f32.mrf.mxu1  ;;  %v4761_v39 = vpop.f32.mrf.mxu0 }
 0x187   : > { %v6596_v24 = vadd.f32 %v4704_v28, %v4592_v47  ;;  %v4762_v36 = vadd.f32 %v4761_v39, %v4760_v40 }
 0x188   : > { %v4706_v29 = vpop.f32.mrf.mxu1  ;;  %v4763_v42 = vpop.f32.mrf.mxu0 }
 0x189   : > { %v4707_v7 = vadd.f32 %v4706_v29, %v4705_v9  ;;  %v6604_v26 = vadd.f32 %v4762_v36, %v6459_v15 }
 0x18a   : > { %v4708_v62 = vpop.f32.mrf.mxu1  ;;  %v4764_v30 = vpop.f32.mrf.mxu0 }
 0x18b   : > { %v6601_v61 = vadd.f32 %v4707_v7, %v4595_v16  ;;  %v4765_v21 = vadd.f32 %v4764_v30, %v4763_v42 }
 0x18c   : > { %v4709_v52 = vpop.f32.mrf.mxu1  ;;  %v4766_v54 = vpop.f32.mrf.mxu0 }
 0x18d   : > { %v4710_v44 = vadd.f32 %v4709_v52, %v4708_v62  ;;  %v6609_v8 = vadd.f32 %v4765_v21, %v6470_v53 }
 0x18e   : > { %v4711_v47 = vpop.f32.mrf.mxu1  ;;  %v4767_v18 = vpop.f32.mrf.mxu0 }
 0x18f   : > { %v6606_v48 = vadd.f32 %v4710_v44, %v4598_v34  ;;  %v4768_v27 = vadd.f32 %v4767_v18, %v4766_v54 }
 0x190   : > { %v4712_v2 = vpop.f32.mrf.mxu1  ;;  %v4769_v15 = vpop.f32.mrf.mxu0 }
 0x191   : > { %v4713_v37 = vadd.f32 %v4712_v2, %v4711_v47  ;;  %v6615_v38 = vadd.f32 %v4768_v27, %v6485_v50 }
 0x192   : > { %v4714_v16 = vpop.f32.mrf.mxu1  ;;  %v4770_v34 = vpop.f32.mrf.mxu0 }
 0x193   : > { %v6612_v14 = vadd.f32 %v4713_v37, %v6262_v46  ;;  %v4771_v6 = vadd.f32 %v4770_v34, %v4769_v15 }
 0x194   : > { %v4715_v43 = vpop.f32.mrf.mxu1  ;;  %v4772_v53 = vpop.f32.mrf.mxu0 }
 0x195   : > { %v4716_v4 = vadd.f32 %v4715_v43, %v4714_v16  ;;  %v6621_v23 = vadd.f32 %v4771_v6, %v6498_v17 }
 0x196   : > { %v4717_v33 = vpop.f32.mrf.mxu1  ;;  %v4773_v46 = vpop.f32.mrf.mxu0 }
 0x197   : > { %v6618_v13 = vadd.f32 %v4716_v4, %v6279_v1  ;;  %v4774_v40 = vadd.f32 %v4773_v46, %v4772_v53 }
 0x198   : > { %v4718_v28 = vpop.f32.mrf.mxu1  ;;  %v4775_v50 = vpop.f32.mrf.mxu0 }
 0x199   : > { %v4719_v9 = vadd.f32 %v4718_v28, %v4717_v33  ;;  %v6627_v39 = vadd.f32 %v4774_v40, %v6511_v60 }
 0x19a   : > { %v4720_v25 = vpop.f32.mrf.mxu1  ;;  %v4776_v1 = vpop.f32.mrf.mxu0 }
 0x19b   : > { %v6624_v29 = vadd.f32 %v4719_v9, %v6314_v63  ;;  %v4777_v42 = vadd.f32 %v4776_v1, %v4775_v50 }
 0x19c   : > { %v4721_v7 = vpop.f32.mrf.mxu1  ;;  %v4778_v17 = vpop.f32.mrf.mxu0 }
 0x19d   : > { %v4722_v62 = vadd.f32 %v4721_v7, %v4720_v25  ;;  %v6633_v30 = vadd.f32 %v4777_v42, %v6523_v3 }
 0x19e   : > { %v4723_v36 = vpop.f32.mrf.mxu1  ;;  %v4779_v63 = vpop.f32.mrf.mxu0 }
 0x19f   : > { %v6630_v52 = vadd.f32 %v4722_v62, %v6327_v19  ;;  %v4780_v54 = vadd.f32 %v4779_v63, %v4778_v17 }
 0x1a0   : > { %v4724_v44 = vpop.f32.mrf.mxu1  ;;  %v4781_v60 = vpop.f32.mrf.mxu0 }
 0x1a1   : > { %v4725_v47 = vadd.f32 %v4724_v44, %v4723_v36  ;;  %v6639_v18 = vadd.f32 %v4780_v54, %v6534_v0 }
 0x1a2   : > { %v4726_v21 = vpop.f32.mrf.mxu1  ;;  %v4782_v19 = vpop.f32.mrf.mxu0 }
 0x1a3   : > { %v6636_v2 = vadd.f32 %v4725_v47, %v6358_v11  ;;  %v4783_v15 = vadd.f32 %v4782_v19, %v4781_v60 }
 0x1a4   : > { %v4727_v37 = vpop.f32.mrf.mxu1  ;;  %v4784_v3 = vpop.f32.mrf.mxu0 }
 0x1a5   : > { %v4728_v16 = vadd.f32 %v4727_v37, %v4726_v21  ;;  %v6645_v34 = vadd.f32 %v4783_v15, %v6543_v57 }
 0x1a6   : > { %v4729_v27 = vpop.f32.mrf.mxu1  ;;  %v4785_v11 = vpop.f32.mrf.mxu0 }
 0x1a7   : > { %v6642_v43 = vadd.f32 %v4728_v16, %v6371_v32  ;;  %v4786_v53 = vadd.f32 %v4785_v11, %v4784_v3 }
 0x1a8   : > { %v4730_v4 = vpop.f32.mrf.mxu1  ;;  %v4787_v0 = vpop.f32.mrf.mxu0 }
 0x1a9   : > { %v4731_v33 = vadd.f32 %v4730_v4, %v4729_v27  ;;  %v6651_v46 = vadd.f32 %v4786_v53, %v6552_v59 }
 0x1aa   : > { %v4732_v6 = vpop.f32.mrf.mxu1  ;;  %v4788_v32 = vpop.f32.mrf.mxu0 }
 0x1ab   : > { %v6648_v28 = vadd.f32 %v4731_v33, %v6400_v56  ;;  %v4789_v50 = vadd.f32 %v4788_v32, %v4787_v0 }
 0x1ac   : > { %v4733_v9 = vpop.f32.mrf.mxu1  ;;  %v4790_v57 = vpop.f32.mrf.mxu0 }
 0x1ad   : > { %6983 = vst [vmem:[#allocation3_spill] sm:$0xff] %v6648_v28  ;;  %v4734_v25 = vadd.f32 %v4733_v9, %v4732_v6  ;;  %v6657_v1 = vadd.f32 %v4789_v50, %v6559_v35 }
 0x1ae   : > { %v4863_v40 = vpop.f32.mrf.mxu1  ;;  %v4791_v56 = vpop.f32.mrf.mxu0 }
 0x1af   : > { %v6654_v7 = vadd.f32 %v4734_v25, %v6411_v5  ;;  %v4792_v17 = vadd.f32 %v4791_v56, %v4790_v57 }
 0x1b0   : > { %v4864_v62 = vpop.f32.mrf.mxu1  ;;  %v4793_v59 = vpop.f32.mrf.mxu0 }
 0x1b1   : > { %6984 = vst [vmem:[#allocation4_spill] sm:$0xff] %v6654_v7  ;;  %v4865_v36 = vadd.f32 %v4864_v62, %v4863_v40  ;;  %v6663_v63 = vadd.f32 %v4792_v17, %v6565_v55 }
 0x1b2   : > { %v4866_v42 = vpop.f32.mrf.mxu1  ;;  %v4794_v5 = vpop.f32.mrf.mxu0 }
 0x1b3   : > { %v6660_v44 = vadd.f32 %v4865_v36, %v6589_v31  ;;  %v4795_v60 = vadd.f32 %v4794_v5, %v4793_v59 }
 0x1b4   : > { %v4867_v47 = vpop.f32.mrf.mxu1  ;;  %v4796_v37 = vpop.f32.mrf.mxu0 }
 0x1b5   : > { %v4868_v21 = vadd.f32 %v4867_v47, %v4866_v42  ;;  %v6673_v19 = vadd.f32 %v4795_v60, %v6571_v49 }
 0x1b6   : > { %v6665_v54 = vpop.f32.mrf.mxu1  ;;  %v4797_v31 = vpop.f32.mrf.mxu0 }
 0x1b7   : > { %v6668_v35 = vadd.f32 %v4868_v21, %v6594_v10  ;;  %v4798_v15 = vadd.f32 %v4797_v31, %v4796_v37 }
 0x1b8   : > { %v6670_v16 = vpop.f32.mrf.mxu1  ;;  %v4799_v55 = vpop.f32.mrf.mxu0 }
 0x1b9   : > { %v6680_v4 = vadd.f32 %v4798_v15, %v6575_v58 }
 0x1ba   : > { %v6675_v27 = vpop.f32.mrf.mxu1  ;;  %v4800_v33 = vpop.f32.mrf.mxu0 }
 0x1bb   : > { %v4801_v10 = vadd.f32 %v4800_v33, %v4799_v55 }
 0x1bc   : > { %v6677_v3 = vpop.f32.mrf.mxu1  ;;  %v4802_v6 = vpop.f32.mrf.mxu0 }
 0x1bd   : > { %v6687_v49 = vadd.f32 %v4801_v10, %v6579_v12 }
 0x1be   : > { %v6682_v11 = vpop.f32.mrf.mxu1  ;;  %v4803_v0 = vpop.f32.mrf.mxu0 }
 0x1bf   : > { %v4804_v25 = vadd.f32 %v4803_v0, %v4802_v6 }
 0x1c0   : > { %v6684_v53 = vpop.f32.mrf.mxu1  ;;  %v4805_v32 = vpop.f32.mrf.mxu0 }
 0x1c1   : > { %v6694_v58 = vadd.f32 %v4804_v25, %v6582_v51 }
 0x1c2   : > { %v6689_v9 = vpop.f32.mrf.mxu1  ;;  %v4806_v50 = vpop.f32.mrf.mxu0 }
 0x1c3   : > { %6985 = vst [vmem:[#allocation5_spill] sm:$0xff] %v6694_v58  ;;  %v4807_v62 = vadd.f32 %v4806_v50, %v4805_v32 }
 0x1c4   : > { %v6691_v40 = vpop.f32.mrf.mxu1  ;;  %v4808_v36 = vpop.f32.mrf.mxu0 }
 0x1c5   : > { %v6701_v12 = vadd.f32 %v4807_v62, %v6584_v41 }
 0x1c6   : > { %v6696_v57 = vpop.f32.mrf.mxu1  ;;  %v4809_v42 = vpop.f32.mrf.mxu0 }
 0x1c7   : > { %v4810_v59 = vadd.f32 %v4809_v42, %v4808_v36 }
 0x1c8   : > { %v6698_v56 = vpop.f32.mrf.mxu1  ;;  %v4811_v47 = vpop.f32.mrf.mxu0 }
 0x1c9   : > { %v6708_v51 = vadd.f32 %v4810_v59, %v6586_v22 }
 0x1ca   : > { %v6703_v17 = vpop.f32.mrf.mxu1  ;;  %v4812_v5 = vpop.f32.mrf.mxu0 }
 0x1cb   : > { %v4813_v37 = vadd.f32 %v4812_v5, %v4811_v47 }
 0x1cc   : > { %v6705_v21 = vpop.f32.mrf.mxu1  ;;  %v4814_v31 = vpop.f32.mrf.mxu0 }
 0x1cd   : > { %v6715_v41 = vadd.f32 %v4813_v37, %v6591_v45 }
 0x1ce   : > { %v6710_v60 = vpop.f32.mrf.mxu1  ;;  %v4815_v55 = vpop.f32.mrf.mxu0 }
 0x1cf   : > { %6986 = vst [vmem:[#allocation6_spill] sm:$0xff] %v6715_v41  ;;  %v4816_v10 = vadd.f32 %v4815_v55, %v4814_v31 }
 0x1d0   : > { %v6712_v15 = vpop.f32.mrf.mxu1  ;;  %v4817_v6 = vpop.f32.mrf.mxu0 }
 0x1d1   : > { %v6722_v22 = vadd.f32 %v4816_v10, %v6596_v24 }
 0x1d2   : > { %v6717_v33 = vpop.f32.mrf.mxu1  ;;  %v4818_v25 = vpop.f32.mrf.mxu0 }
 0x1d3   : > { %6987 = vst [vmem:[#allocation7_spill] sm:$0xff] %v6722_v22  ;;  %v4819_v50 = vadd.f32 %v4818_v25, %v4817_v6 }
 0x1d4   : > { %v6719_v0 = vpop.f32.mrf.mxu1  ;;  %v4820_v62 = vpop.f32.mrf.mxu0 }
 0x1d5   : > { %v6729_v45 = vadd.f32 %v4819_v50, %v6601_v61 }
 0x1d6   : > { %v6724_v32 = vpop.f32.mrf.mxu1  ;;  %v4821_v42 = vpop.f32.mrf.mxu0 }
 0x1d7   : > { %6988 = vst [vmem:[#allocation8_spill] sm:$0xff] %v6729_v45  ;;  %v4822_v47 = vadd.f32 %v4821_v42, %v4820_v62 }
 0x1d8   : > { %v6726_v36 = vpop.f32.mrf.mxu1  ;;  %v4823_v5 = vpop.f32.mrf.mxu0 }
 0x1d9   : > { %v6736_v24 = vadd.f32 %v4822_v47, %v6606_v48 }
 0x1da   : > { %v6731_v59 = vpop.f32.mrf.mxu1  ;;  %v4824_v31 = vpop.f32.mrf.mxu0 }
 0x1db   : > { %6989 = vst [vmem:[#allocation9_spill] sm:$0xff] %v6736_v24  ;;  %v4825_v10 = vadd.f32 %v4824_v31, %v4823_v5 }
 0x1dc   : > { %v6733_v37 = vpop.f32.mrf.mxu1  ;;  %v4826_v6 = vpop.f32.mrf.mxu0 }
 0x1dd   : > { %v6743_v61 = vadd.f32 %v4825_v10, %v6612_v14 }
 0x1de   : > { %v6738_v55 = vpop.f32.mrf.mxu1  ;;  %v4827_v50 = vpop.f32.mrf.mxu0 }
 0x1df   : > { %6990 = vst [vmem:[#allocation10_spill] sm:$0xff] %v6743_v61  ;;  %v4828_v62 = vadd.f32 %v4827_v50, %v4826_v6 }
 0x1e0   : > { %v6740_v25 = vpop.f32.mrf.mxu1  ;;  %v4829_v42 = vpop.f32.mrf.mxu0 }
 0x1e1   : > { %v6750_v48 = vadd.f32 %v4828_v62, %v6618_v13 }
 0x1e2   : > { %v6745_v7 = vpop.f32.mrf.mxu1  ;;  %v4830_v47 = vpop.f32.mrf.mxu0 }
 0x1e3   : > { %6991 = vst [vmem:[#allocation11_spill] sm:$0xff] %v6750_v48  ;;  %v4831_v5 = vadd.f32 %v4830_v47, %v4829_v42 }
 0x1e4   : > { %v6747_v28 = vpop.f32.mrf.mxu1  ;;  %v4832_v31 = vpop.f32.mrf.mxu0 }
 0x1e5   : > { %v6757_v14 = vadd.f32 %v4831_v5, %v6624_v29 }
 0x1e6   : > { %v6752_v22 = vpop.f32.mrf.mxu1  ;;  %v4833_v10 = vpop.f32.mrf.mxu0 }
 0x1e7   : > { %6992 = vst [vmem:[#allocation12_spill] sm:$0xff] %v6757_v14  ;;  %v4834_v6 = vadd.f32 %v4833_v10, %v4832_v31 }
 0x1e8   : > { %v6754_v24 = vpop.f32.mrf.mxu1  ;;  %v4835_v50 = vpop.f32.mrf.mxu0 }
 0x1e9   : > { %v6764_v13 = vadd.f32 %v4834_v6, %v6630_v52 }
 0x1ea   : > { %v6759_v61 = vpop.f32.mrf.mxu1  ;;  %v4836_v62 = vpop.f32.mrf.mxu0 }
 0x1eb   : > { %6993 = vst [vmem:[#allocation13_spill] sm:$0xff] %v6764_v13  ;;  %v4837_v42 = vadd.f32 %v4836_v62, %v4835_v50 }
 0x1ec   : > { %v6761_v41 = vpop.f32.mrf.mxu1  ;;  %v4838_v47 = vpop.f32.mrf.mxu0 }
 0x1ed   : > { %v6771_v29 = vadd.f32 %v4837_v42, %v6636_v2  ;;  %v4871_v2 = vadd.f32 %v6670_v16, %v6665_v54 }
 0x1ee   : > { %v6766_v48 = vpop.f32.mrf.mxu1  ;;  %v4839_v5 = vpop.f32.mrf.mxu0 }
 0x1ef   : > { %6994 = vst [vmem:[#allocation14_spill] sm:$0xff] %v6771_v29  ;;  %v4840_v31 = vadd.f32 %v4839_v5, %v4838_v47  ;;  %v4874_v5 = vadd.f32 %v6677_v3, %v6675_v27  ;;  %v4883_v27 = vadd.f32 %v6698_v56, %v6696_v57 }
 0x1f0   : > { %v6768_v45 = vpop.f32.mrf.mxu1  ;;  %v6775_v10 = vpop.f32.mrf.mxu0 }
 0x1f1   : > { %6995 = vst [vmem:[#allocation15_spill] sm:$0xff] %v6775_v10  ;;  %v6780_v52 = vadd.f32 %v4840_v31, %v6642_v43  ;;  %v3709_v43 = vadd.f32 %v4871_v2, %v6599_v20  ;;  %v3712_v3 = vadd.f32 %v4874_v5, %v6604_v26  ;;  %v4877_v2 = vadd.f32 %v6684_v53, %v6682_v11 }
 0x1f2   : > { %v6773_v14 = vpop.f32.mrf.mxu1  ;;  %v6782_v6 = vpop.f32.mrf.mxu0  ;;  %v3725_v26 = vadd.f32 %v4883_v27, %v6621_v23  ;;  %v4880_v11 = vadd.f32 %v6691_v40, %v6689_v9 }
 0x1f3   : > { %6996 = vst [vmem:[#allocation16_spill] sm:$0xff] %v6780_v52  ;;  %6997 = vst [vmem:[#allocation17_spill] sm:$0xff] %v6782_v6  ;;  %v3717_v57 = vadd.f32 %v4877_v2, %v6609_v8 }
 0x1f4   : > { %v6777_v58 = vpop.f32.mrf.mxu1  ;;  %v6788_v62 = vpop.f32.mrf.mxu0  ;;  %v3720_v2 = vadd.f32 %v4880_v11, %v6615_v38  ;;  %v4892_v11 = vadd.f32 %v6719_v0, %v6717_v33 }
 0x1f5   : > { %6998 = vst [vmem:[#allocation18_spill] sm:$0xff] %v6788_v62 }
 0x1f6   : > { %v6784_v50 = vpop.f32.mrf.mxu1  ;;  %v6792_v29 = vpop.f32.mrf.mxu0 }
 0x1f7   : > { %6999 = vst [vmem:[#allocation19_spill] sm:$0xff] %v6792_v29 }
 0x1f8   : > { %v6790_v42 = vpop.f32.mrf.mxu1  ;;  %v5001_v54 = vpop.f32.mrf.mxu0 }
 0x1f9   : > { %v3870_v31 = vadd.f32 %v5001_v54, %v3709_v43  ;;  %v4886_v54 = vadd.f32 %v6705_v21, %v6703_v17 }
 0x1fa   : > { %v6794_v47 = vpop.f32.mrf.mxu1  ;;  %v3861_v52 = vpop.f32.mrf.mxu0 }
 0x1fb   : > { %3990 = vst [vmem:[%s6804_s7 + $0x10] sm:$0xff] %v3870_v31  ;;  %v3862_v20 = vadd.f32 %v3861_v52, %v6660_v44  ;;  %v3728_v23 = vadd.f32 %v4886_v54, %v6627_v39  ;;  %v4059_v9 = vmul.f32 %v3870_v31, %v3870_v31 }
 0x1fc   : > { %v6806_v16 = vpop.f32.mrf.mxu1  ;;  %v5002_v62 = vpop.f32.mrf.mxu0 }
 0x1fd   : > { %3988 = vst [vmem:[%s6804_s7] sm:$0xff] %v3862_v20  ;;  %v3873_v43 = vadd.f32 %v5002_v62, %v3712_v3  ;;  %v4057_v52 = vmul.f32 %v3862_v20, %v3862_v20  ;;  %v4889_v3 = vadd.f32 %v6712_v15, %v6710_v60 }
 0x1fe   : > { %v6808_v29 = vpop.f32.mrf.mxu1  ;;  %v3864_v6 = vpop.f32.mrf.mxu0 }
 0x1ff   : > { %3991 = vst [vmem:[%s6804_s7 + $0x18] sm:$0xff] %v3873_v43  ;;  %v3865_v44 = vadd.f32 %v3864_v6, %v6668_v35  ;;  %v4895_v35 = vadd.f32 %v6726_v36, %v6724_v32  ;;  %v4060_v32 = vmul.f32 %v3873_v43, %v3873_v43 }
 0x200   : > { %v6817_v13 = vpop.f32.mrf.mxu1  ;;  %v5005_v53 = vpop.f32.mrf.mxu0 }
 0x201   : > { %3989 = vst [vmem:[%s6804_s7 + $0x8] sm:$0xff] %v3865_v44  ;;  %v4020_v17 = vadd.f32 %v3865_v44, %v3862_v20  ;;  %v4058_v21 = vmul.f32 %v3865_v44, %v3865_v44  ;;  %v3886_v62 = vadd.f32 %v5005_v53, %v3725_v26  ;;  %v3741_v53 = vadd.f32 %v4895_v35, %v6645_v34 }
 0x202   : > { %v6822_v10 = vpop.f32.mrf.mxu1  ;;  %v3877_v6 = vpop.f32.mrf.mxu0 }
 0x203   : > { %v4021_v40 = vadd.f32 %v4020_v17, %v3870_v31  ;;  %v4089_v27 = vadd.f32 %v4058_v21, %v4057_v52  ;;  %3994 = vst [vmem:[%s6804_s7 + $0x30] sm:$0xff] %v3886_v62  ;;  %v3878_v8 = vadd.f32 %v3877_v6, %v3717_v57  ;;  %v4898_v31 = vadd.f32 %v6733_v37, %v6731_v59 }
 0x204   : > { %v6830_v56 = vpop.f32.mrf.mxu1  ;;  %v5006_v20 = vpop.f32.mrf.mxu0  ;;  %v3733_v17 = vadd.f32 %v4889_v3, %v6633_v30  ;;  %v4907_v6 = vadd.f32 %v6754_v24, %v6752_v22  ;;  %v4063_v33 = vmul.f32 %v3886_v62, %v3886_v62 }
 0x205   : > { %v4090_v36 = vadd.f32 %v4089_v27, %v4059_v9  ;;  %3992 = vst [vmem:[%s6804_s7 + $0x20] sm:$0xff] %v3878_v8  ;;  %v4022_v39 = vadd.f32 %v4021_v40, %v3873_v43  ;;  %v3889_v54 = vadd.f32 %v5006_v20, %v3728_v23  ;;  %v4061_v15 = vmul.f32 %v3878_v8, %v3878_v8 }
 0x206   : > { %v6836_v5 = vpop.f32.mrf.mxu1  ;;  %v3880_v26 = vpop.f32.mrf.mxu0  ;;  %v3744_v9 = vadd.f32 %v4898_v31, %v6651_v46  ;;  %v3736_v20 = vadd.f32 %v4892_v11, %v6639_v18 }
 0x207   : > { %v4023_v60 = vadd.f32 %v4022_v39, %v3878_v8  ;;  %v4091_v52 = vadd.f32 %v4090_v36, %v4060_v32  ;;  %3995 = vst [vmem:[%s6804_s7 + $0x38] sm:$0xff] %v3889_v54  ;;  %v3881_v38 = vadd.f32 %v3880_v26, %v3720_v2  ;;  %v4901_v8 = vadd.f32 %v6740_v25, %v6738_v55 }
 0x208   : > { %v6842_v44 = vpop.f32.mrf.mxu1  ;;  %v5009_v43 = vpop.f32.mrf.mxu0  ;;  %v4064_v22 = vmul.f32 %v3889_v54, %v3889_v54  ;;  %v3757_v39 = vadd.f32 %v4907_v6, %v6673_v19 }
 0x209   : > { %v4092_v59 = vadd.f32 %v4091_v52, %v4061_v15  ;;  %3993 = vst [vmem:[%s6804_s7 + $0x28] sm:$0xff] %v3881_v38  ;;  %v4024_v37 = vadd.f32 %v4023_v60, %v3881_v38  ;;  %v4062_v34 = vmul.f32 %v3881_v38, %v3881_v38  ;;  %v3902_v35 = vadd.f32 %v5009_v43, %v3741_v53 }
 0x20a   : > { %v6848_v57 = vpop.f32.mrf.mxu1  ;;  %v3893_v23 = vpop.f32.mrf.mxu0  ;;  %v4904_v53 = vadd.f32 %v6747_v28, %v6745_v7  ;;  %v3749_v60 = vadd.f32 %v4901_v8, %v6657_v1  ;;  %v4919_v38 = vadd.f32 %v6790_v42, %v6784_v50  ;;  %v4916_v8 = vadd.f32 %v6777_v58, %v6773_v14 }
 0x20b   : > { %v4025_v0 = vadd.f32 %v4024_v37, %v3886_v62  ;;  %v4093_v27 = vadd.f32 %v4092_v59, %v4062_v34  ;;  %3998 = vst [vmem:[%s6804_s7 + $0x50] sm:$0xff] %v3902_v35  ;;  %v3894_v30 = vadd.f32 %v3893_v23, %v3733_v17  ;;  %v4910_v62 = vadd.f32 %v6761_v41, %v6759_v61 }
 0x20c   : > { %v6854_v21 = vpop.f32.mrf.mxu1  ;;  %v5010_v3 = vpop.f32.mrf.mxu0  ;;  %v4067_v28 = vmul.f32 %v3902_v35, %v3902_v35  ;;  %v4913_v37 = vadd.f32 %v6768_v45, %v6766_v48  ;;  %v3752_v6 = vadd.f32 %v4904_v53, %v6663_v63 }
 0x20d   : > { %v4094_v24 = vadd.f32 %v4093_v27, %v4063_v33  ;;  %3996 = vst [vmem:[%s6804_s7 + $0x40] sm:$0xff] %v3894_v30  ;;  %v4026_v46 = vadd.f32 %v4025_v0, %v3889_v54  ;;  %v3905_v32 = vadd.f32 %v5010_v3, %v3744_v9  ;;  %v4065_v25 = vmul.f32 %v3894_v30, %v3894_v30 }
 0x20e   : > { %v6860_v40 = vpop.f32.mrf.mxu1  ;;  %v3896_v36 = vpop.f32.mrf.mxu0  ;;  %v3760_v43 = vadd.f32 %v4910_v62, %v6680_v4  ;;  %v3773_v0 = vadd.f32 %v4919_v38, %v6701_v12 }
 0x20f   : > { %v4027_v55 = vadd.f32 %v4026_v46, %v3894_v30  ;;  %v4095_v26 = vadd.f32 %v4094_v24, %v4064_v22  ;;  %3999 = vst [vmem:[%s6804_s7 + $0x58] sm:$0xff] %v3905_v32  ;;  %v3897_v18 = vadd.f32 %v3896_v36, %v3736_v20  ;;  %v4068_v9 = vmul.f32 %v3905_v32, %v3905_v32 }
 0x210   : > { %v6866_v2 = vpop.f32.mrf.mxu1  ;;  %v5013_v54 = vpop.f32.mrf.mxu0  ;;  %v3765_v20 = vadd.f32 %v4913_v37, %v6687_v49  ;;  %v4931_v46 = vadd.f32 %v6842_v44, %v6836_v5 }
 0x211   : > { %v4096_v41 = vadd.f32 %v4095_v26, %v4065_v25  ;;  %3997 = vst [vmem:[%s6804_s7 + $0x48] sm:$0xff] %v3897_v18  ;;  %v4028_v61 = vadd.f32 %v4027_v55, %v3897_v18  ;;  %v4066_v19 = vmul.f32 %v3897_v18, %v3897_v18  ;;  %v3918_v52 = vadd.f32 %v5013_v54, %v3757_v39  ;;  %v7000_v26 = vld [vmem:[#allocation5_spill] sm:$0xff] }
 0x212   : > { %v6872_v31 = vpop.f32.mrf.mxu1  ;;  %v3909_v11 = vpop.f32.mrf.mxu0  ;;  %v4925_v55 = vadd.f32 %v6817_v13, %v6808_v29  ;;  %v3768_v18 = vadd.f32 %v4916_v8, %v7000_v26 }
 0x213   : > { %v4029_v7 = vadd.f32 %v4028_v61, %v3902_v35  ;;  %v4097_v59 = vadd.f32 %v4096_v41, %v4066_v19  ;;  %4002 = vst [vmem:[%s6804_s7 + $0x70] sm:$0xff] %v3918_v52  ;;  %v3910_v1 = vadd.f32 %v3909_v11, %v3749_v60  ;;  %v4922_v35 = vadd.f32 %v6806_v16, %v6794_v47  ;;  %v7001_v61 = vld [vmem:[#allocation8_spill] sm:$0xff] }
 0x214   : > { %v6878_v15 = vpop.f32.mrf.mxu1  ;;  %v5014_v34 = vpop.f32.mrf.mxu0  ;;  %v4071_v58 = vmul.f32 %v3918_v52, %v3918_v52  ;;  %v4934_v60 = vadd.f32 %v6854_v21, %v6848_v57  ;;  %v3789_v19 = vadd.f32 %v4931_v46, %v7001_v61  ;;  %v7011_v61 = vld [vmem:[#allocation18_spill] sm:$0xff] }
 0x215   : > { %v4098_v50 = vadd.f32 %v4097_v59, %v4067_v28  ;;  %4000 = vst [vmem:[%s6804_s7 + $0x60] sm:$0xff] %v3910_v1  ;;  %v4030_v42 = vadd.f32 %v4029_v7, %v3905_v32  ;;  %v3921_v4 = vadd.f32 %v5014_v34, %v3760_v43  ;;  %v4069_v48 = vmul.f32 %v3910_v1, %v3910_v1  ;;  %v7002_v7 = vld [vmem:[#allocation6_spill] sm:$0xff] }
 0x216   : > { %v6884_v17 = vpop.f32.mrf.mxu1  ;;  %v3912_v33 = vpop.f32.mrf.mxu0  ;;  %v3776_v62 = vadd.f32 %v4922_v35, %v6708_v51  ;;  %v4928_v43 = vadd.f32 %v6830_v56, %v6822_v10  ;;  %v3781_v59 = vadd.f32 %v4925_v55, %v7002_v7  ;;  %v7009_v55 = vld [vmem:[#allocation13_spill] sm:$0xff] }
 0x217   : > { %v4031_v45 = vadd.f32 %v4030_v42, %v3910_v1  ;;  %v4099_v30 = vadd.f32 %v4098_v50, %v4068_v9  ;;  %4003 = vst [vmem:[%s6804_s7 + $0x78] sm:$0xff] %v3921_v4  ;;  %v3913_v63 = vadd.f32 %v3912_v33, %v3752_v6  ;;  %v4072_v5 = vmul.f32 %v3921_v4, %v3921_v4  ;;  %v7003_v50 = vld [vmem:[#allocation9_spill] sm:$0xff] }
 0x218   : > { %v4942_v23 = vpop.f32.mrf.mxu1  ;;  %v5017_v3 = vpop.f32.mrf.mxu0  ;;  %v3792_v42 = vadd.f32 %v4934_v60, %v7003_v50  ;;  %v7010_v60 = vld [vmem:[#allocation3_spill] sm:$0xff] }
 0x219   : > { %v4100_v24 = vadd.f32 %v4099_v30, %v4069_v48  ;;  %4001 = vst [vmem:[%s6804_s7 + $0x68] sm:$0xff] %v3913_v63  ;;  %v4032_v47 = vadd.f32 %v4031_v45, %v3913_v63  ;;  %v4070_v16 = vmul.f32 %v3913_v63, %v3913_v63  ;;  %v3934_v12 = vadd.f32 %v5017_v3, %v3773_v0  ;;  %v7004_v0 = vld [vmem:[#allocation7_spill] sm:$0xff]  ;;  %v7005_v48 = vld [vmem:[#allocation12_spill] sm:$0xff] }
 0x21a   : > { %v6894_v27 = vpop.f32.mrf.mxu1  ;;  %v3925_v32 = vpop.f32.mrf.mxu0  ;;  %v4943_v1 = vadd.f32 %v4942_v23, %v6884_v17  ;;  %v4937_v17 = vadd.f32 %v6866_v2, %v6860_v40  ;;  %v3784_v45 = vadd.f32 %v4928_v43, %v7004_v0 }
 0x21b   : > { %v4033_v14 = vadd.f32 %v4032_v47, %v3918_v52  ;;  %v4101_v39 = vadd.f32 %v4100_v24, %v4070_v16  ;;  %4006 = vst [vmem:[%s6804_s7 + $0x90] sm:$0xff] %v3934_v12  ;;  %v3926_v49 = vadd.f32 %v3925_v32, %v3765_v20  ;;  %v4075_v35 = vmul.f32 %v3934_v12, %v3934_v12  ;;  %v7006_v16 = vld [vmem:[#allocation15_spill] sm:$0xff] }
 0x21c   : > { %v4945_v22 = vpop.f32.mrf.mxu1  ;;  %v5018_v25 = vpop.f32.mrf.mxu0  ;;  %v3805_v30 = vadd.f32 %v4943_v1, %v7005_v48 }
 0x21d   : > { %v4102_v44 = vadd.f32 %v4101_v39, %v4071_v58  ;;  %4004 = vst [vmem:[%s6804_s7 + $0x80] sm:$0xff] %v3926_v49  ;;  %v4034_v51 = vadd.f32 %v4033_v14, %v3921_v4  ;;  %v3937_v54 = vadd.f32 %v5018_v25, %v3776_v62  ;;  %v4073_v29 = vmul.f32 %v3926_v49, %v3926_v49  ;;  %v7008_v39 = vld [vmem:[#allocation10_spill] sm:$0xff] }
 0x21e   : > { %v6904_v36 = vpop.f32.mrf.mxu1  ;;  %v3928_v41 = vpop.f32.mrf.mxu0  ;;  %v4946_v63 = vadd.f32 %v4945_v22, %v6894_v27  ;;  %v4940_v27 = vadd.f32 %v6878_v15, %v6872_v31 }
 0x21f   : > { %v4035_v13 = vadd.f32 %v4034_v51, %v3926_v49  ;;  %v4103_v38 = vadd.f32 %v4102_v44, %v4072_v5  ;;  %4007 = vst [vmem:[%s6804_s7 + $0x98] sm:$0xff] %v3937_v54  ;;  %v3929_v11 = vadd.f32 %v3928_v41, %v3768_v18  ;;  %v4076_v3 = vmul.f32 %v3937_v54, %v3937_v54 }
 0x220   : > { %v6910_v53 = vpop.f32.mrf.mxu1  ;;  %v5021_v28 = vpop.f32.mrf.mxu0  ;;  %v3797_v49 = vadd.f32 %v4937_v17, %v7008_v39  ;;  %v3808_v25 = vadd.f32 %v4946_v63, %v7009_v55 }
 0x221   : > { %v4104_v21 = vadd.f32 %v4103_v38, %v4073_v29  ;;  %4005 = vst [vmem:[%s6804_s7 + $0x88] sm:$0xff] %v3929_v11  ;;  %v4036_v37 = vadd.f32 %v4035_v13, %v3929_v11  ;;  %v4074_v34 = vmul.f32 %v3929_v11, %v3929_v11  ;;  %v3950_v6 = vadd.f32 %v5021_v28, %v3789_v19  ;;  %v7012_v19 = vld [vmem:[#allocation19_spill] sm:$0xff] }
 0x222   : > { %v6916_v52 = vpop.f32.mrf.mxu1  ;;  %v3941_v9 = vpop.f32.mrf.mxu0  ;;  %v4846_v13 = vadd.f32 %v7012_v19, %v7011_v61  ;;  %v4949_v15 = vadd.f32 %v6910_v53, %v6904_v36  ;;  %v7015_v53 = vld [vmem:[#allocation14_spill] sm:$0xff] }
 0x223   : > { %v4037_v10 = vadd.f32 %v4036_v37, %v3934_v12  ;;  %v4105_v56 = vadd.f32 %v4104_v21, %v4074_v34  ;;  %4010 = vst [vmem:[%s6804_s7 + $0xb0] sm:$0xff] %v3950_v6  ;;  %v3942_v33 = vadd.f32 %v3941_v9, %v3781_v59  ;;  %v7007_v12 = vld [vmem:[#allocation17_spill] sm:$0xff]  ;;  %v4079_v29 = vmul.f32 %v3950_v6, %v3950_v6  ;;  %v7013_v59 = vld [vmem:[#allocation11_spill] sm:$0xff] }
 0x224   : > { %v6923_v57 = vpop.f32.mrf.mxu1  ;;  %v5022_v23 = vpop.f32.mrf.mxu0  ;;  %v4843_v46 = vadd.f32 %v7007_v12, %v7006_v16  ;;  %v3800_v1 = vadd.f32 %v4940_v27, %v7013_v59 }
 0x225   : > { %v4106_v20 = vadd.f32 %v4105_v56, %v4075_v35  ;;  %4008 = vst [vmem:[%s6804_s7 + $0xa0] sm:$0xff] %v3942_v33  ;;  %v4038_v24 = vadd.f32 %v4037_v10, %v3937_v54  ;;  %v3953_v47 = vadd.f32 %v5022_v23, %v3792_v42  ;;  %v4077_v62 = vmul.f32 %v3942_v33, %v3942_v33  ;;  %v7014_v42 = vld [vmem:[#allocation4_spill] sm:$0xff] }
 0x226   : > { %v4953_v4 = vpop.f32.mrf.mxu1  ;;  %v3944_v32 = vpop.f32.mrf.mxu0  ;;  %v3660_v41 = vadd.f32 %v4843_v46, %v7010_v60  ;;  %v4952_v35 = vadd.f32 %v6923_v57, %v6916_v52 }
 0x227   : > { %v4039_v2 = vadd.f32 %v4038_v24, %v3942_v33  ;;  %v4107_v58 = vadd.f32 %v4106_v20, %v4076_v3  ;;  %4011 = vst [vmem:[%s6804_s7 + $0xb8] sm:$0xff] %v3953_v47  ;;  %v3945_v14 = vadd.f32 %v3944_v32, %v3784_v45  ;;  %v4080_v28 = vmul.f32 %v3953_v47, %v3953_v47  ;;  %v7016_v3 = vld [vmem:[#allocation16_spill] sm:$0xff] }
 0x228   : > { %v4954_v8 = vpop.f32.mrf.mxu1  ;;  %v5025_v22 = vpop.f32.mrf.mxu0  ;;  %v3816_v20 = vadd.f32 %v4952_v35, %v7016_v3 }
 0x229   : > { %v4955_v26 = vadd.f32 %v4954_v8, %v4953_v4  ;;  %v4108_v18 = vadd.f32 %v4107_v58, %v4077_v62  ;;  %4009 = vst [vmem:[%s6804_s7 + $0xa8] sm:$0xff] %v3945_v14  ;;  %v4040_v5 = vadd.f32 %v4039_v2, %v3945_v14  ;;  %v4078_v44 = vmul.f32 %v3945_v14, %v3945_v14 }
 0x22a   : > { %v4956_v40 = vpop.f32.mrf.mxu1  ;;  %v3966_v51 = vadd.f32 %v5025_v22, %v3805_v30  ;;  %v3957_v31 = vpop.f32.mrf.mxu0  ;;  %v3663_v4 = vadd.f32 %v4846_v13, %v7014_v42 }
 0x22b   : > { %v4041_v38 = vadd.f32 %v4040_v5, %v3950_v6  ;;  %v4109_v11 = vadd.f32 %v4108_v18, %v4078_v44  ;;  %v3958_v43 = vadd.f32 %v3957_v31, %v3797_v49  ;;  %v3821_v50 = vadd.f32 %v4955_v26, %v3660_v41 }
 0x22c   : > { %v4957_v54 = vpop.f32.mrf.mxu1  ;;  %4014 = vst [vmem:[%s6804_s7 + $0xd0] sm:$0xff] %v3966_v51  ;;  %v5026_v7 = vpop.f32.mrf.mxu0  ;;  %v3813_v6 = vadd.f32 %v4949_v15, %v7015_v53  ;;  %v4083_v24 = vmul.f32 %v3966_v51, %v3966_v51 }
 0x22d   : > { %v4958_v21 = vadd.f32 %v4957_v54, %v4956_v40  ;;  %v4110_v37 = vadd.f32 %v4109_v11, %v4079_v29  ;;  %4012 = vst [vmem:[%s6804_s7 + $0xc0] sm:$0xff] %v3958_v43  ;;  %v4042_v34 = vadd.f32 %v4041_v38, %v3953_v47  ;;  %v3969_v9 = vadd.f32 %v5026_v7, %v3808_v25 }
 0x22e   : > { %v3960_v36 = vpop.f32.mrf.mxu0  ;;  %v4081_v56 = vmul.f32 %v3958_v43, %v3958_v43 }
 0x22f   : > { %v4043_v10 = vadd.f32 %v4042_v34, %v3958_v43  ;;  %v4111_v33 = vadd.f32 %v4110_v37, %v4080_v28  ;;  %4015 = vst [vmem:[%s6804_s7 + $0xd8] sm:$0xff] %v3969_v9  ;;  %v3961_v17 = vadd.f32 %v3960_v36, %v3800_v1  ;;  %v3824_v0 = vadd.f32 %v4958_v21, %v3663_v4 }
 0x230   : > { %v5029_v23 = vpop.f32.mrf.mxu0  ;;  %v4084_v16 = vmul.f32 %v3969_v9, %v3969_v9 }
 0x231   : > { %v4112_v45 = vadd.f32 %v4111_v33, %v4081_v56  ;;  %4013 = vst [vmem:[%s6804_s7 + $0xc8] sm:$0xff] %v3961_v17  ;;  %v4044_v48 = vadd.f32 %v4043_v10, %v3961_v17  ;;  %v4082_v30 = vmul.f32 %v3961_v17, %v3961_v17  ;;  %v3982_v63 = vadd.f32 %v5029_v23, %v3821_v50 }
 0x232   : > { %v3973_v8 = vpop.f32.mrf.mxu0 }
 0x233   : > { %v4045_v52 = vadd.f32 %v4044_v48, %v3966_v51  ;;  %v4113_v57 = vadd.f32 %v4112_v45, %v4082_v30  ;;  %v3974_v47 = vadd.f32 %v3973_v8, %v3813_v6  ;;  %4018 = vst [vmem:[%s6804_s7 + $0xf0] sm:$0xff] %v3982_v63  ;;  %v4087_v55 = vmul.f32 %v3982_v63, %v3982_v63 }
 0x234   : > { %v5030_v12 = vpop.f32.mrf.mxu0 }
 0x235   : > { %v4114_v46 = vadd.f32 %v4113_v57, %v4083_v24  ;;  %4016 = vst [vmem:[%s6804_s7 + $0xe0] sm:$0xff] %v3974_v47  ;;  %v4046_v32 = vadd.f32 %v4045_v52, %v3969_v9  ;;  %v4085_v40 = vmul.f32 %v3974_v47, %v3974_v47  ;;  %v3985_v2 = vadd.f32 %v5030_v12, %v3824_v0 }
 0x236   : > { %v3976_v62 = vpop.f32.mrf.mxu0 }
 0x237   : > { %v4047_v58 = vadd.f32 %v4046_v32, %v3974_v47  ;;  %v4115_v14 = vadd.f32 %v4114_v46, %v4084_v16  ;;  %v3977_v27 = vadd.f32 %v3976_v62, %v3816_v20  ;;  %4019 = vst [vmem:[%s6804_s7 + $0xf8] sm:$0xff] %v3985_v2  ;;  %v4088_v18 = vmul.f32 %v3985_v2, %v3985_v2 }
 0x239   : > { %v4116_v22 = vadd.f32 %v4115_v14, %v4085_v40  ;;  %4017 = vst [vmem:[%s6804_s7 + $0xe8] sm:$0xff] %v3977_v27  ;;  %v4048_v39 = vadd.f32 %v4047_v58, %v3977_v27  ;;  %v4086_v49 = vmul.f32 %v3977_v27, %v3977_v27 }
 0x23b   : > { %v4117_v25 = vadd.f32 %v4116_v22, %v4086_v49  ;;  %v4049_v26 = vadd.f32 %v4048_v39, %v3982_v63 }
 0x23d   : > { %v4118_v5 = vadd.f32 %v4117_v25, %v4087_v55  ;;  %v4050_v44 = vadd.f32 %v4049_v26, %v3985_v2 }
 0x23f   : > { %v4051_v51 = vrot.slane %v4050_v44, 4  ;;  %v4119_v54 = vadd.f32 %v4118_v5, %v4088_v18 }
 0x241   : > { %v4052_v60 = vadd.f32 %v4051_v51, %v4050_v44  ;;  %v4120_v41 = vrot.slane %v4119_v54, 4 }
 0x243   : > { %v4053_v61 = vrot.slane %v4052_v60, 2  ;;  %v4121_v19 = vadd.f32 %v4120_v41, %v4119_v54 }
 0x245   : > { %v4054_v13 = vadd.f32 %v4053_v61, %v4052_v60  ;;  %v4122_v31 = vrot.slane %v4121_v19, 2 }
 0x247   : > { %v4055_v15 = vrot.slane %v4054_v13, 1  ;;  %v4123_v29 = vadd.f32 %v4122_v31, %v4121_v19 }
 0x249   : > { %v4124_v38 = vrot.slane %v4123_v29, 1  ;;  %v4056_v11 = vadd.f32 %v4055_v15, %v4054_v13 }
 0x24b   : > { %v4125_v43 = vadd.f32 %v4124_v38, %v4123_v29 }
 0x24d   : > { %v4127_v28 = vsel %vm403_vm0, %v4056_v11, %v4125_v43 }
 0x24e   : > { %4128 = vst [vmem:[%s235_s10] sm:$0x3] %v4127_v28 }
 0x24f PF: > { %s16_s18 = sadd.s32 1, %s5292_s18  }
 0x250   : > { %p13_p4 = scmp.ge.s32.totalorder %s16_s18, 4  }
 0x252   :  { %15 = sbr.rel (!%p13_p4) target bundleno = 1 (0x1), region = 81 }

</bundles_post_ra>
